<compile_context>
chip_gen: v7x
topology: tpu7x:2x2x1
jax: 0.10.0
libtpu: 0.0.40
codegen_flags: <defaults>
</compile_context>

<pallas_src>
import functools

import jax
import jax.numpy as jnp
from jax.experimental import pallas as pl
from jax.experimental.pallas import tpu as pltpu


# ----------------------------------------------------------------------------
# Kernel 1: full TransformerEncoder stack, grid = (batch_block, layer).
# Post-LN, ReLU FFN, eps=1e-5 (PyTorch TransformerEncoderLayer defaults).
# The activation is carried across the layer axis in a VMEM scratch.
# ----------------------------------------------------------------------------
def encoder_stack_kernel(x_ref, bias_ref, w_in_ref, b_in_ref, wo_ref, bo_ref,
                         ln1g_ref, ln1b_ref, w1_ref, b1_ref, w2_ref, b2_ref,
                         ln2g_ref, ln2b_ref, out_ref, h_scr, *, num_heads):
    layer = pl.program_id(1)

    @pl.when(layer == 0)
    def _():
        h_scr[...] = x_ref[...]                      # load embedding into the carry

    x3 = h_scr[...]                                  # (Bt, S, D) f32, layer-carried
    Bt, S, D = x3.shape
    H = num_heads
    hd = D // H

    # --- packed Q/K/V in-projection: one (Bt*S, D) @ (D, 3D) MXU matmul --------
    x2f = x3.reshape(Bt * S, D)
    qkv = jnp.dot(x2f.astype(jnp.bfloat16), w_in_ref[...],
                  preferred_element_type=jnp.float32) + b_in_ref[...]    # (Bt*S, 3D)
    qkv = qkv.reshape(Bt, S, 3 * D)
    kb = bias_ref[...]                               # (Bt, 1, S): 0 valid / -1e9 padded

    # --- per-head attention; q already scaled by 1/sqrt(hd) via the weights ----
    # Static unroll over heads keeps only a (Bt, S, S) score block live per head.
    ctx_heads = []
    for hh in range(H):
        q = qkv[:, :, hh * hd:(hh + 1) * hd].astype(jnp.bfloat16)
        k = qkv[:, :, D + hh * hd:D + (hh + 1) * hd].astype(jnp.bfloat16)
        v = qkv[:, :, 2 * D + hh * hd:2 * D + (hh + 1) * hd].astype(jnp.bfloat16)
        s = jnp.einsum("bqd,bkd->bqk", q, k,
                       preferred_element_type=jnp.float32) + kb          # (Bt, S, S)
        m = jnp.max(s, axis=-1, keepdims=True)
        e = jnp.exp(s - m)
        p = e * pl.reciprocal(jnp.sum(e, axis=-1, keepdims=True), approx=True)
        ctx_heads.append(jnp.einsum("bqk,bkd->bqd", p.astype(jnp.bfloat16), v,
                                    preferred_element_type=jnp.float32))  # (Bt, S, hd)
    ctx = jnp.concatenate(ctx_heads, axis=-1)        # (Bt, S, D) f32

    # --- single (D, D) output projection ----------------------------------------
    attn = jnp.dot(ctx.reshape(Bt * S, D).astype(jnp.bfloat16), wo_ref[...],
                   preferred_element_type=jnp.float32) + bo_ref[...]     # (Bt*S, D)

    # --- residual + LayerNorm 1 (f32) --------------------------------------------
    h1 = x2f + attn
    mu = jnp.mean(h1, axis=-1, keepdims=True)
    var = jnp.mean((h1 - mu) ** 2, axis=-1, keepdims=True)
    h1 = (h1 - mu) * jax.lax.rsqrt(var + 1e-5) * ln1g_ref[...] + ln1b_ref[...]

    # --- feed-forward (ReLU), bf16 MXU inputs, f32 accumulation -------------------
    ff = jnp.dot(h1.astype(jnp.bfloat16), w1_ref[...],
                 preferred_element_type=jnp.float32) + b1_ref[...]
    ff = jnp.maximum(ff, 0.0)
    ff = jnp.dot(ff.astype(jnp.bfloat16), w2_ref[...],
                 preferred_element_type=jnp.float32) + b2_ref[...]

    # --- residual + LayerNorm 2 ---------------------------------------------------
    h2 = h1 + ff
    mu2 = jnp.mean(h2, axis=-1, keepdims=True)
    var2 = jnp.mean((h2 - mu2) ** 2, axis=-1, keepdims=True)
    y = ((h2 - mu2) * jax.lax.rsqrt(var2 + 1e-5) * ln2g_ref[...] + ln2b_ref[...])
    y = y.reshape(Bt, S, D)

    h_scr[...] = y                                   # carry to next layer

    @pl.when(layer == pl.num_programs(1) - 1)
    def _():
        out_ref[...] = y                             # single HBM writeback per batch block


# ----------------------------------------------------------------------------
# Kernel 2: mlm_gene_id head, tiled over a 128-multiple padded vocab axis.
# Computed over all S rows (row 0 dropped in the wrapper -> no sublane-offset slice).
# ----------------------------------------------------------------------------
def mlm_id_kernel(h_ref, w_ref, b_ref, out_ref):
    out_ref[0] = jnp.dot(h_ref[0].astype(jnp.bfloat16), w_ref[...],
                         preferred_element_type=jnp.float32) + b_ref[...]


# ----------------------------------------------------------------------------
# Parameter init (synthetic). PyTorch mapping:
#   Linear(in, out).weight (out, in)      -> stored as (in, out)
#   MHA in_proj_weight (3D, D)            -> w_in (D, 3D), q block pre-scaled by 1/sqrt(hd)
#   MHA out_proj.weight^T                 -> wo (D, D)
# ----------------------------------------------------------------------------
def init_params(key, gene_vocab, cell_vocab, num_bins, d_model, num_heads, num_layers):
    D = d_model
    hd = D // num_heads
    ffd = 4 * D
    L = num_layers
    keys = iter(jax.random.split(key, 32))

    def nrm(shape, scale=0.02):
        return scale * jax.random.normal(next(keys), shape, dtype=jnp.float32)

    q_scale = 1.0 / float(hd) ** 0.5
    wq = nrm((L, D, D)) * q_scale
    wk = nrm((L, D, D))
    wv = nrm((L, D, D))
    bq = nrm((L, 1, D)) * q_scale
    bk = nrm((L, 1, D))
    bv = nrm((L, 1, D))

    return {
        "gene_id_emb": nrm((gene_vocab, D)),
        "cell_emb": nrm((cell_vocab, D)),
        "expr_w": nrm((num_bins, D)),                 # gene_expr_embedding (XLA glue)
        "expr_b": nrm((D,)),
        "mlm_id_w": nrm((D, gene_vocab)).astype(jnp.bfloat16),
        "mlm_id_b": nrm((1, gene_vocab)),
        "mlm_ex_w": nrm((D, num_bins)),               # tiny head, XLA
        "mlm_ex_b": nrm((num_bins,)),
        "contr_w": nrm((D, D)),                       # tiny head, XLA
        "contr_b": nrm((D,)),
        "stack": {
            # packed in-proj: columns [0:D)=q (pre-scaled), [D:2D)=k, [2D:3D)=v
            "w_in": jnp.concatenate([wq, wk, wv], axis=-1).astype(jnp.bfloat16),
            "b_in": jnp.concatenate([bq, bk, bv], axis=-1),
            "wo": nrm((L, D, D)).astype(jnp.bfloat16),
            "bo": nrm((L, 1, D)),
            "ln1_g": jnp.ones((L, 1, D), jnp.float32),
            "ln1_b": jnp.zeros((L, 1, D), jnp.float32),
            "w1": nrm((L, D, ffd)).astype(jnp.bfloat16),
            "b1": nrm((L, 1, ffd)),
            "w2": nrm((L, ffd, D)).astype(jnp.bfloat16),
            "b2": nrm((L, 1, D)),
            "ln2_g": jnp.ones((L, 1, D), jnp.float32),
            "ln2_b": jnp.zeros((L, 1, D), jnp.float32),
        },
    }


def _vmem_limit_bytes(frac=0.75, fallback=48 * 1024 * 1024):
    """~75% of physical VMEM: ~48 MiB on v7x, ~96 MiB on v5e/v6e."""
    try:
        return int(pltpu.get_tpu_info().vmem_capacity_bytes * frac)
    except Exception:
        return fallback


def _largest_divisor_leq(n, cap):
    for d in range(min(n, cap), 0, -1):
        if n % d == 0:
            return d
    return 1


# ----------------------------------------------------------------------------
# Forward wrapper (glue in XLA; transformer stack + vocab head in Pallas)
# ----------------------------------------------------------------------------
def sc_encoder_forward(params, gene_id, gene_expr, cell_type, *, seq_len, num_heads,
                       batch_block=8):
    B, Lg = gene_id.shape
    NB = gene_expr.shape[-1]
    D = params["gene_id_emb"].shape[-1]
    Vg = params["mlm_id_w"].shape[-1]
    stk = params["stack"]
    n_layers = stk["w_in"].shape[0]
    ffd = stk["w1"].shape[-1]
    assert D % num_heads == 0

    # ---- embedding combine (gathers + tiny K=num_bins linear) in plain XLA ----
    gid_emb = jnp.take(params["gene_id_emb"], gene_id, axis=0)            # (B, Lg, D)
    gexpr_emb = gene_expr.astype(jnp.float32) @ params["expr_w"] + params["expr_b"]
    cell_emb = jnp.take(params["cell_emb"], cell_type, axis=0)            # (B, D)
    emb = jnp.concatenate([cell_emb[:, None, :], gid_emb + gexpr_emb], axis=1)
    S = min(Lg + 1, seq_len)
    emb = emb[:, :S]                                                      # (B, S, D)

    # src_key_padding mask (all sequences share length S -> no padded keys here)
    seq_lengths = jnp.full((B,), S, dtype=jnp.int32)
    attn_mask = jnp.arange(seq_len)[None, :] < seq_lengths[:, None]       # (B, seq_len)
    attn_bias = jnp.where(attn_mask[:, :S], 0.0, -1e9).astype(jnp.float32)[:, None, :]

    # ---- fused transformer encoder stack ---------------------------------------
    # NOTE(v7x megacore): pick batch_block so B // Bt >= 2 when B allows it.
    Bt = _largest_divisor_leq(B, batch_block)
    vmem_limit = _vmem_limit_bytes()

    def wspec(shape):
        return pl.BlockSpec(shape, lambda b, l: (l,) + (0,) * (len(shape) - 1))

    h = pl.pallas_call(
        functools.partial(encoder_stack_kernel, num_heads=num_heads),
        out_shape=jax.ShapeDtypeStruct((B, S, D), jnp.float32),
        grid=(B // Bt, n_layers),
        in_specs=[
            pl.BlockSpec((Bt, S, D), lambda b, l: (b, 0, 0)),      # emb (read at l==0)
            pl.BlockSpec((Bt, 1, S), lambda b, l: (b, 0, 0)),      # key-padding bias
            wspec((None, D, 3 * D)),                               # w_in (q pre-scaled)
            wspec((None, 1, 3 * D)),                               # b_in
            wspec((None, D, D)),                                   # wo
            wspec((None, 1, D)),                                   # bo
            wspec((None, 1, D)),                                   # ln1_g
            wspec((None, 1, D)),                                   # ln1_b
            wspec((None, D, ffd)),                                 # w1
            wspec((None, 1, ffd)),                                 # b1
            wspec((None, ffd, D)),                                 # w2
            wspec((None, 1, D)),                                   # b2
            wspec((None, 1, D)),                                   # ln2_g
            wspec((None, 1, D)),                                   # ln2_b
        ],
        out_specs=pl.BlockSpec((Bt, S, D), lambda b, l: (b, 0, 0)),
        scratch_shapes=[pltpu.VMEM((Bt, S, D), jnp.float32)],      # layer-carried activation
        compiler_params=pltpu.CompilerParams(
            dimension_semantics=("parallel", "arbitrary"),
            vmem_limit_bytes=vmem_limit),
    )(emb, attn_bias,
      stk["w_in"], stk["b_in"], stk["wo"], stk["bo"],
      stk["ln1_g"], stk["ln1_b"],
      stk["w1"], stk["b1"], stk["w2"], stk["b2"],
      stk["ln2_g"], stk["ln2_b"])

    # ---- mlm_gene_id head: vocab padded + tiled (lane-dense 128-multiples) -----
    tile_target = 1024 if vmem_limit > 64 * 1024 * 1024 else 512
    TILE_V = min(tile_target, ((Vg + 127) // 128) * 128)
    Vg_pad = ((Vg + TILE_V - 1) // TILE_V) * TILE_V
    nv = Vg_pad // TILE_V
    wid = jnp.pad(params["mlm_id_w"], ((0, 0), (0, Vg_pad - Vg)))
    bid = jnp.pad(params["mlm_id_b"], ((0, 0), (0, Vg_pad - Vg)))

    mlm_id_full = pl.pallas_call(
        mlm_id_kernel,
        out_shape=jax.ShapeDtypeStruct((B, S, Vg_pad), jnp.float32),
        grid=(nv, B),          # batch innermost -> weight tile reused across batch steps
        in_specs=[
            pl.BlockSpec((1, S, D), lambda v, b: (b, 0, 0)),
            pl.BlockSpec((D, TILE_V), lambda v, b: (0, v)),
            pl.BlockSpec((1, TILE_V), lambda v, b: (0, v)),
        ],
        out_specs=pl.BlockSpec((1, S, TILE_V), lambda v, b: (b, 0, v)),
        compiler_params=pltpu.CompilerParams(
            dimension_semantics=("parallel", "parallel"),
            vmem_limit_bytes=vmem_limit),
    )(h, wid, bid)
    mlm_id = mlm_id_full[:, 1:, :Vg]

    # ---- tiny heads in plain XLA (lane-sparse NB=num_bins output; per review) ---
    tok = h[:, 1:, :]
    mlm_ex = tok @ params["mlm_ex_w"] + params["mlm_ex_b"]                # (B, S-1, NB)
    contr = h[:, 0, :] @ params["contr_w"] + params["contr_b"]            # (B, D)

    return mlm_id, mlm_ex, contr, attn_mask


# ----------------------------------------------------------------------------
if __name__ == "__main__":
    GENE_VOCAB = 64
    CELL_VOCAB = 8
    NUM_BINS = 16
    SEQ_LEN = 8          # total tokens = 1 cell token + (SEQ_LEN-1) gene tokens
    D_MODEL = 128
    NUM_HEADS = 8
    NUM_LAYERS = 2
    B = 2
    Lg = SEQ_LEN - 1     # genes per cell

    root = jax.random.PRNGKey(0)
    k_p, k_id, k_bin, k_cell = jax.random.split(root, 4)

    params = init_params(k_p, GENE_VOCAB, CELL_VOCAB, NUM_BINS,
                         D_MODEL, NUM_HEADS, NUM_LAYERS)

    gene_id = jax.random.randint(k_id, (B, Lg), 0, GENE_VOCAB, dtype=jnp.int32)
    bins = jax.random.randint(k_bin, (B, Lg), 0, NUM_BINS, dtype=jnp.int32)
    gene_expr = jax.nn.one_hot(bins, NUM_BINS, dtype=jnp.float32)    # binned expression
    cell_type = jax.random.randint(k_cell, (B,), 0, CELL_VOCAB, dtype=jnp.int32)

    fwd = jax.jit(functools.partial(sc_encoder_forward,
                                    seq_len=SEQ_LEN, num_heads=NUM_HEADS))
    mlm_id, mlm_ex, contr, attn_mask = fwd(params, gene_id, gene_expr, cell_type)
    jax.block_until_ready((mlm_id, mlm_ex, contr, attn_mask))

    assert mlm_id.shape == (B, SEQ_LEN - 1, GENE_VOCAB)
    assert mlm_ex.shape == (B, SEQ_LEN - 1, NUM_BINS)
    assert contr.shape == (B, D_MODEL)
    assert attn_mask.shape == (B, SEQ_LEN)
    assert bool(jnp.all(jnp.isfinite(mlm_id)))
    assert bool(jnp.all(jnp.isfinite(mlm_ex)))
    assert bool(jnp.all(jnp.isfinite(contr)))

    print("KERNEL_OK")
</pallas_src>

<mosaic_0001>
module attributes {stable_mosaic.version = 11 : i64} {
  func.func @encoder_stack_kernel(%arg0: i32, %arg1: i32, %arg2: memref<2x8x128xf32, #tpu.memory_space<vmem>>, %arg3: memref<2x1x8xf32, #tpu.memory_space<vmem>>, %arg4: memref<1x128x384xbf16, #tpu.memory_space<vmem>>, %arg5: memref<1x1x384xf32, #tpu.memory_space<vmem>>, %arg6: memref<1x128x128xbf16, #tpu.memory_space<vmem>>, %arg7: memref<1x1x128xf32, #tpu.memory_space<vmem>>, %arg8: memref<1x1x128xf32, #tpu.memory_space<vmem>>, %arg9: memref<1x1x128xf32, #tpu.memory_space<vmem>>, %arg10: memref<1x128x512xbf16, #tpu.memory_space<vmem>>, %arg11: memref<1x1x512xf32, #tpu.memory_space<vmem>>, %arg12: memref<1x512x128xbf16, #tpu.memory_space<vmem>>, %arg13: memref<1x1x128xf32, #tpu.memory_space<vmem>>, %arg14: memref<1x1x128xf32, #tpu.memory_space<vmem>>, %arg15: memref<1x1x128xf32, #tpu.memory_space<vmem>>, %arg16: memref<2x8x128xf32, #tpu.memory_space<vmem>>, %arg17: memref<2x8x128xf32, #tpu.memory_space<vmem>>) attributes {dimension_semantics = [#tpu.dimension_semantics<parallel>, #tpu.dimension_semantics<arbitrary>], iteration_bounds = array<i64: 1, 2>, scalar_prefetch = 0 : i64, scratch_operands = 1 : i64, tpu.core_type = #tpu.core_type<tc>, window_params = [{transform_indices = @transform_0, window_bounds = array<i64: 2, 8, 128>}, {transform_indices = @transform_1, window_bounds = array<i64: 2, 1, 8>}, {transform_indices = @transform_2, window_bounds = array<i64: 1, 128, 384>}, {transform_indices = @transform_3, window_bounds = array<i64: 1, 1, 384>}, {transform_indices = @transform_4, window_bounds = array<i64: 1, 128, 128>}, {transform_indices = @transform_5, window_bounds = array<i64: 1, 1, 128>}, {transform_indices = @transform_6, window_bounds = array<i64: 1, 1, 128>}, {transform_indices = @transform_7, window_bounds = array<i64: 1, 1, 128>}, {transform_indices = @transform_8, window_bounds = array<i64: 1, 128, 512>}, {transform_indices = @transform_9, window_bounds = array<i64: 1, 1, 512>}, {transform_indices = @transform_10, window_bounds = array<i64: 1, 512, 128>}, {transform_indices = @transform_11, window_bounds = array<i64: 1, 1, 128>}, {transform_indices = @transform_12, window_bounds = array<i64: 1, 1, 128>}, {transform_indices = @transform_13, window_bounds = array<i64: 1, 1, 128>}, {transform_indices = @transform_14, window_bounds = array<i64: 2, 8, 128>}]} {
    %c0_i32 = arith.constant 0 : i32
    %0 = arith.cmpi eq, %arg1, %c0_i32 : i32
    %1 = arith.extui %0 : i1 to i32
    %c0_i32_0 = arith.constant 0 : i32
    %2 = arith.cmpi ne, %1, %c0_i32_0 : i32
    scf.if %2 {
      %c0_92 = arith.constant 0 : index
      %c0_93 = arith.constant 0 : index
      %c0_94 = arith.constant 0 : index
      %270 = vector.load %arg2[%c0_92, %c0_93, %c0_94] : memref<2x8x128xf32, #tpu.memory_space<vmem>>, vector<2x8x128xf32>
      %c0_95 = arith.constant 0 : index
      %c0_96 = arith.constant 0 : index
      %c0_97 = arith.constant 0 : index
      %271 = vector.load %arg17[%c0_95, %c0_96, %c0_97] : memref<2x8x128xf32, #tpu.memory_space<vmem>>, vector<2x8x128xf32>
      tpu.vector_store %arg17[%c0_95, %c0_96, %c0_97], %270 {strides = array<i32>} : memref<2x8x128xf32, #tpu.memory_space<vmem>>, vector<2x8x128xf32>,
    } else {
    }
    %c0 = arith.constant 0 : index
    %c0_1 = arith.constant 0 : index
    %c0_2 = arith.constant 0 : index
    %3 = vector.load %arg17[%c0, %c0_1, %c0_2] : memref<2x8x128xf32, #tpu.memory_space<vmem>>, vector<2x8x128xf32>
    %4 = vector.shape_cast %3 : vector<2x8x128xf32> to vector<16x128xf32>
    %5 = arith.truncf %4 : vector<16x128xf32> to vector<16x128xbf16>
    %c0_3 = arith.constant 0 : index
    %c0_4 = arith.constant 0 : index
    %c0_5 = arith.constant 0 : index
    %6 = vector.load %arg4[%c0_3, %c0_4, %c0_5] : memref<1x128x384xbf16, #tpu.memory_space<vmem>>, vector<1x128x384xbf16>
    %7 = vector.shape_cast %6 : vector<1x128x384xbf16> to vector<128x384xbf16>
    %cst = arith.constant dense<0.000000e+00> : vector<16x384xf32>
    %8 = tpu.matmul %5, %7, %cst {dimension_numbers = #tpu.dot_dimension_numbers<[1], [0], [0], [1], [0, 0, 1, 1], [], []>} : vector<16x128xbf16>, vector<128x384xbf16>, vector<16x384xf32> -> vector<16x384xf32>
    %c0_6 = arith.constant 0 : index
    %c0_7 = arith.constant 0 : index
    %c0_8 = arith.constant 0 : index
    %9 = vector.load %arg5[%c0_6, %c0_7, %c0_8] : memref<1x1x384xf32, #tpu.memory_space<vmem>>, vector<1x1x384xf32>
    %10 = vector.shape_cast %9 : vector<1x1x384xf32> to vector<1x384xf32>
    %11 = vector.broadcast %10 : vector<1x384xf32> to vector<16x384xf32>
    %12 = arith.addf %8, %11 : vector<16x384xf32>
    %13 = vector.shape_cast %12 : vector<16x384xf32> to vector<2x8x384xf32>
    %c0_9 = arith.constant 0 : index
    %c0_10 = arith.constant 0 : index
    %c0_11 = arith.constant 0 : index
    %14 = vector.load %arg3[%c0_9, %c0_10, %c0_11] : memref<2x1x8xf32, #tpu.memory_space<vmem>>, vector<2x1x8xf32>
    %15 = vector.extract_strided_slice %13 {offsets = [0, 0, 0], sizes = [2, 8, 16], strides = [1, 1, 1]} : vector<2x8x384xf32> to vector<2x8x16xf32>
    %16 = arith.truncf %15 : vector<2x8x16xf32> to vector<2x8x16xbf16>
    %17 = vector.extract_strided_slice %13 {offsets = [0, 0, 128], sizes = [2, 8, 16], strides = [1, 1, 1]} : vector<2x8x384xf32> to vector<2x8x16xf32>
    %18 = arith.truncf %17 : vector<2x8x16xf32> to vector<2x8x16xbf16>
    %19 = vector.extract_strided_slice %13 {offsets = [0, 0, 256], sizes = [2, 8, 16], strides = [1, 1, 1]} : vector<2x8x384xf32> to vector<2x8x16xf32>
    %20 = arith.truncf %19 : vector<2x8x16xf32> to vector<2x8x16xbf16>
    "tpu.trace_start"() <{level = 10 : i32, message = "bqd,bkd->bqk"}> : () -> ()
    %cst_12 = arith.constant dense<0.000000e+00> : vector<2x8x8xf32>
    %21 = tpu.matmul %16, %18, %cst_12 {dimension_numbers = #tpu.dot_dimension_numbers<[2], [2], [1], [1], [0, 0, 0, 1, 1, 1], [0], [0]>} : vector<2x8x16xbf16>, vector<2x8x16xbf16>, vector<2x8x8xf32> -> vector<2x8x8xf32>
    "tpu.trace_stop"() : () -> ()
    %22 = vector.broadcast %14 : vector<2x1x8xf32> to vector<2x8x8xf32>
    %23 = arith.addf %21, %22 : vector<2x8x8xf32>
    %cst_13 = arith.constant dense<0xFF800000> : vector<2x8xf32>
    %24 = vector.multi_reduction <maximumf>, %23, %cst_13 [2] : vector<2x8x8xf32> to vector<2x8xf32>
    %25 = vector.shape_cast %24 : vector<2x8xf32> to vector<2x8x1xf32>
    %26 = vector.broadcast %25 : vector<2x8x1xf32> to vector<2x8x8xf32>
    %27 = arith.subf %23, %26 : vector<2x8x8xf32>
    %28 = math.exp %27 : vector<2x8x8xf32>
    %cst_14 = arith.constant dense<0.000000e+00> : vector<2x8xf32>
    %29 = vector.multi_reduction <add>, %28, %cst_14 [2] : vector<2x8x8xf32> to vector<2x8xf32>
    %30 = vector.shape_cast %29 : vector<2x8xf32> to vector<2x8x1xf32>
    %31 = tpu.reciprocal %30 {approx = true} : vector<2x8x1xf32> -> vector<2x8x1xf32>
    %32 = vector.broadcast %31 : vector<2x8x1xf32> to vector<2x8x8xf32>
    %33 = arith.mulf %28, %32 : vector<2x8x8xf32>
    %34 = arith.truncf %33 : vector<2x8x8xf32> to vector<2x8x8xbf16>
    "tpu.trace_start"() <{level = 10 : i32, message = "bqk,bkd->bqd"}> : () -> ()
    %cst_15 = arith.constant dense<0.000000e+00> : vector<2x8x16xf32>
    %35 = tpu.matmul %34, %20, %cst_15 {dimension_numbers = #tpu.dot_dimension_numbers<[2], [1], [1], [2], [0, 0, 0, 1, 1, 2], [0], [0]>} : vector<2x8x8xbf16>, vector<2x8x16xbf16>, vector<2x8x16xf32> -> vector<2x8x16xf32>
    "tpu.trace_stop"() : () -> ()
    %36 = vector.extract_strided_slice %13 {offsets = [0, 0, 16], sizes = [2, 8, 16], strides = [1, 1, 1]} : vector<2x8x384xf32> to vector<2x8x16xf32>
    %37 = arith.truncf %36 : vector<2x8x16xf32> to vector<2x8x16xbf16>
    %38 = vector.extract_strided_slice %13 {offsets = [0, 0, 144], sizes = [2, 8, 16], strides = [1, 1, 1]} : vector<2x8x384xf32> to vector<2x8x16xf32>
    %39 = arith.truncf %38 : vector<2x8x16xf32> to vector<2x8x16xbf16>
    %40 = vector.extract_strided_slice %13 {offsets = [0, 0, 272], sizes = [2, 8, 16], strides = [1, 1, 1]} : vector<2x8x384xf32> to vector<2x8x16xf32>
    %41 = arith.truncf %40 : vector<2x8x16xf32> to vector<2x8x16xbf16>
    "tpu.trace_start"() <{level = 10 : i32, message = "bqd,bkd->bqk"}> : () -> ()
    %cst_16 = arith.constant dense<0.000000e+00> : vector<2x8x8xf32>
    %42 = tpu.matmul %37, %39, %cst_16 {dimension_numbers = #tpu.dot_dimension_numbers<[2], [2], [1], [1], [0, 0, 0, 1, 1, 1], [0], [0]>} : vector<2x8x16xbf16>, vector<2x8x16xbf16>, vector<2x8x8xf32> -> vector<2x8x8xf32>
    "tpu.trace_stop"() : () -> ()
    %43 = vector.broadcast %14 : vector<2x1x8xf32> to vector<2x8x8xf32>
    %44 = arith.addf %42, %43 : vector<2x8x8xf32>
    %cst_17 = arith.constant dense<0xFF800000> : vector<2x8xf32>
    %45 = vector.multi_reduction <maximumf>, %44, %cst_17 [2] : vector<2x8x8xf32> to vector<2x8xf32>
    %46 = vector.shape_cast %45 : vector<2x8xf32> to vector<2x8x1xf32>
    %47 = vector.broadcast %46 : vector<2x8x1xf32> to vector<2x8x8xf32>
    %48 = arith.subf %44, %47 : vector<2x8x8xf32>
    %49 = math.exp %48 : vector<2x8x8xf32>
    %cst_18 = arith.constant dense<0.000000e+00> : vector<2x8xf32>
    %50 = vector.multi_reduction <add>, %49, %cst_18 [2] : vector<2x8x8xf32> to vector<2x8xf32>
    %51 = vector.shape_cast %50 : vector<2x8xf32> to vector<2x8x1xf32>
    %52 = tpu.reciprocal %51 {approx = true} : vector<2x8x1xf32> -> vector<2x8x1xf32>
    %53 = vector.broadcast %52 : vector<2x8x1xf32> to vector<2x8x8xf32>
    %54 = arith.mulf %49, %53 : vector<2x8x8xf32>
    %55 = arith.truncf %54 : vector<2x8x8xf32> to vector<2x8x8xbf16>
    "tpu.trace_start"() <{level = 10 : i32, message = "bqk,bkd->bqd"}> : () -> ()
    %cst_19 = arith.constant dense<0.000000e+00> : vector<2x8x16xf32>
    %56 = tpu.matmul %55, %41, %cst_19 {dimension_numbers = #tpu.dot_dimension_numbers<[2], [1], [1], [2], [0, 0, 0, 1, 1, 2], [0], [0]>} : vector<2x8x8xbf16>, vector<2x8x16xbf16>, vector<2x8x16xf32> -> vector<2x8x16xf32>
    "tpu.trace_stop"() : () -> ()
    %57 = vector.extract_strided_slice %13 {offsets = [0, 0, 32], sizes = [2, 8, 16], strides = [1, 1, 1]} : vector<2x8x384xf32> to vector<2x8x16xf32>
    %58 = arith.truncf %57 : vector<2x8x16xf32> to vector<2x8x16xbf16>
    %59 = vector.extract_strided_slice %13 {offsets = [0, 0, 160], sizes = [2, 8, 16], strides = [1, 1, 1]} : vector<2x8x384xf32> to vector<2x8x16xf32>
    %60 = arith.truncf %59 : vector<2x8x16xf32> to vector<2x8x16xbf16>
    %61 = vector.extract_strided_slice %13 {offsets = [0, 0, 288], sizes = [2, 8, 16], strides = [1, 1, 1]} : vector<2x8x384xf32> to vector<2x8x16xf32>
    %62 = arith.truncf %61 : vector<2x8x16xf32> to vector<2x8x16xbf16>
    "tpu.trace_start"() <{level = 10 : i32, message = "bqd,bkd->bqk"}> : () -> ()
    %cst_20 = arith.constant dense<0.000000e+00> : vector<2x8x8xf32>
    %63 = tpu.matmul %58, %60, %cst_20 {dimension_numbers = #tpu.dot_dimension_numbers<[2], [2], [1], [1], [0, 0, 0, 1, 1, 1], [0], [0]>} : vector<2x8x16xbf16>, vector<2x8x16xbf16>, vector<2x8x8xf32> -> vector<2x8x8xf32>
    "tpu.trace_stop"() : () -> ()
    %64 = vector.broadcast %14 : vector<2x1x8xf32> to vector<2x8x8xf32>
    %65 = arith.addf %63, %64 : vector<2x8x8xf32>
    %cst_21 = arith.constant dense<0xFF800000> : vector<2x8xf32>
    %66 = vector.multi_reduction <maximumf>, %65, %cst_21 [2] : vector<2x8x8xf32> to vector<2x8xf32>
    %67 = vector.shape_cast %66 : vector<2x8xf32> to vector<2x8x1xf32>
    %68 = vector.broadcast %67 : vector<2x8x1xf32> to vector<2x8x8xf32>
    %69 = arith.subf %65, %68 : vector<2x8x8xf32>
    %70 = math.exp %69 : vector<2x8x8xf32>
    %cst_22 = arith.constant dense<0.000000e+00> : vector<2x8xf32>
    %71 = vector.multi_reduction <add>, %70, %cst_22 [2] : vector<2x8x8xf32> to vector<2x8xf32>
    %72 = vector.shape_cast %71 : vector<2x8xf32> to vector<2x8x1xf32>
    %73 = tpu.reciprocal %72 {approx = true} : vector<2x8x1xf32> -> vector<2x8x1xf32>
    %74 = vector.broadcast %73 : vector<2x8x1xf32> to vector<2x8x8xf32>
    %75 = arith.mulf %70, %74 : vector<2x8x8xf32>
    %76 = arith.truncf %75 : vector<2x8x8xf32> to vector<2x8x8xbf16>
    "tpu.trace_start"() <{level = 10 : i32, message = "bqk,bkd->bqd"}> : () -> ()
    %cst_23 = arith.constant dense<0.000000e+00> : vector<2x8x16xf32>
    %77 = tpu.matmul %76, %62, %cst_23 {dimension_numbers = #tpu.dot_dimension_numbers<[2], [1], [1], [2], [0, 0, 0, 1, 1, 2], [0], [0]>} : vector<2x8x8xbf16>, vector<2x8x16xbf16>, vector<2x8x16xf32> -> vector<2x8x16xf32>
    "tpu.trace_stop"() : () -> ()
    %78 = vector.extract_strided_slice %13 {offsets = [0, 0, 48], sizes = [2, 8, 16], strides = [1, 1, 1]} : vector<2x8x384xf32> to vector<2x8x16xf32>
    %79 = arith.truncf %78 : vector<2x8x16xf32> to vector<2x8x16xbf16>
    %80 = vector.extract_strided_slice %13 {offsets = [0, 0, 176], sizes = [2, 8, 16], strides = [1, 1, 1]} : vector<2x8x384xf32> to vector<2x8x16xf32>
    %81 = arith.truncf %80 : vector<2x8x16xf32> to vector<2x8x16xbf16>
    %82 = vector.extract_strided_slice %13 {offsets = [0, 0, 304], sizes = [2, 8, 16], strides = [1, 1, 1]} : vector<2x8x384xf32> to vector<2x8x16xf32>
    %83 = arith.truncf %82 : vector<2x8x16xf32> to vector<2x8x16xbf16>
    "tpu.trace_start"() <{level = 10 : i32, message = "bqd,bkd->bqk"}> : () -> ()
    %cst_24 = arith.constant dense<0.000000e+00> : vector<2x8x8xf32>
    %84 = tpu.matmul %79, %81, %cst_24 {dimension_numbers = #tpu.dot_dimension_numbers<[2], [2], [1], [1], [0, 0, 0, 1, 1, 1], [0], [0]>} : vector<2x8x16xbf16>, vector<2x8x16xbf16>, vector<2x8x8xf32> -> vector<2x8x8xf32>
    "tpu.trace_stop"() : () -> ()
    %85 = vector.broadcast %14 : vector<2x1x8xf32> to vector<2x8x8xf32>
    %86 = arith.addf %84, %85 : vector<2x8x8xf32>
    %cst_25 = arith.constant dense<0xFF800000> : vector<2x8xf32>
    %87 = vector.multi_reduction <maximumf>, %86, %cst_25 [2] : vector<2x8x8xf32> to vector<2x8xf32>
    %88 = vector.shape_cast %87 : vector<2x8xf32> to vector<2x8x1xf32>
    %89 = vector.broadcast %88 : vector<2x8x1xf32> to vector<2x8x8xf32>
    %90 = arith.subf %86, %89 : vector<2x8x8xf32>
    %91 = math.exp %90 : vector<2x8x8xf32>
    %cst_26 = arith.constant dense<0.000000e+00> : vector<2x8xf32>
    %92 = vector.multi_reduction <add>, %91, %cst_26 [2] : vector<2x8x8xf32> to vector<2x8xf32>
    %93 = vector.shape_cast %92 : vector<2x8xf32> to vector<2x8x1xf32>
    %94 = tpu.reciprocal %93 {approx = true} : vector<2x8x1xf32> -> vector<2x8x1xf32>
    %95 = vector.broadcast %94 : vector<2x8x1xf32> to vector<2x8x8xf32>
    %96 = arith.mulf %91, %95 : vector<2x8x8xf32>
    %97 = arith.truncf %96 : vector<2x8x8xf32> to vector<2x8x8xbf16>
    "tpu.trace_start"() <{level = 10 : i32, message = "bqk,bkd->bqd"}> : () -> ()
    %cst_27 = arith.constant dense<0.000000e+00> : vector<2x8x16xf32>
    %98 = tpu.matmul %97, %83, %cst_27 {dimension_numbers = #tpu.dot_dimension_numbers<[2], [1], [1], [2], [0, 0, 0, 1, 1, 2], [0], [0]>} : vector<2x8x8xbf16>, vector<2x8x16xbf16>, vector<2x8x16xf32> -> vector<2x8x16xf32>
    "tpu.trace_stop"() : () -> ()
    %99 = vector.extract_strided_slice %13 {offsets = [0, 0, 64], sizes = [2, 8, 16], strides = [1, 1, 1]} : vector<2x8x384xf32> to vector<2x8x16xf32>
    %100 = arith.truncf %99 : vector<2x8x16xf32> to vector<2x8x16xbf16>
    %101 = vector.extract_strided_slice %13 {offsets = [0, 0, 192], sizes = [2, 8, 16], strides = [1, 1, 1]} : vector<2x8x384xf32> to vector<2x8x16xf32>
    %102 = arith.truncf %101 : vector<2x8x16xf32> to vector<2x8x16xbf16>
    %103 = vector.extract_strided_slice %13 {offsets = [0, 0, 320], sizes = [2, 8, 16], strides = [1, 1, 1]} : vector<2x8x384xf32> to vector<2x8x16xf32>
    %104 = arith.truncf %103 : vector<2x8x16xf32> to vector<2x8x16xbf16>
    "tpu.trace_start"() <{level = 10 : i32, message = "bqd,bkd->bqk"}> : () -> ()
    %cst_28 = arith.constant dense<0.000000e+00> : vector<2x8x8xf32>
    %105 = tpu.matmul %100, %102, %cst_28 {dimension_numbers = #tpu.dot_dimension_numbers<[2], [2], [1], [1], [0, 0, 0, 1, 1, 1], [0], [0]>} : vector<2x8x16xbf16>, vector<2x8x16xbf16>, vector<2x8x8xf32> -> vector<2x8x8xf32>
    "tpu.trace_stop"() : () -> ()
    %106 = vector.broadcast %14 : vector<2x1x8xf32> to vector<2x8x8xf32>
    %107 = arith.addf %105, %106 : vector<2x8x8xf32>
    %cst_29 = arith.constant dense<0xFF800000> : vector<2x8xf32>
    %108 = vector.multi_reduction <maximumf>, %107, %cst_29 [2] : vector<2x8x8xf32> to vector<2x8xf32>
    %109 = vector.shape_cast %108 : vector<2x8xf32> to vector<2x8x1xf32>
    %110 = vector.broadcast %109 : vector<2x8x1xf32> to vector<2x8x8xf32>
    %111 = arith.subf %107, %110 : vector<2x8x8xf32>
    %112 = math.exp %111 : vector<2x8x8xf32>
    %cst_30 = arith.constant dense<0.000000e+00> : vector<2x8xf32>
    %113 = vector.multi_reduction <add>, %112, %cst_30 [2] : vector<2x8x8xf32> to vector<2x8xf32>
    %114 = vector.shape_cast %113 : vector<2x8xf32> to vector<2x8x1xf32>
    %115 = tpu.reciprocal %114 {approx = true} : vector<2x8x1xf32> -> vector<2x8x1xf32>
    %116 = vector.broadcast %115 : vector<2x8x1xf32> to vector<2x8x8xf32>
    %117 = arith.mulf %112, %116 : vector<2x8x8xf32>
    %118 = arith.truncf %117 : vector<2x8x8xf32> to vector<2x8x8xbf16>
    "tpu.trace_start"() <{level = 10 : i32, message = "bqk,bkd->bqd"}> : () -> ()
    %cst_31 = arith.constant dense<0.000000e+00> : vector<2x8x16xf32>
    %119 = tpu.matmul %118, %104, %cst_31 {dimension_numbers = #tpu.dot_dimension_numbers<[2], [1], [1], [2], [0, 0, 0, 1, 1, 2], [0], [0]>} : vector<2x8x8xbf16>, vector<2x8x16xbf16>, vector<2x8x16xf32> -> vector<2x8x16xf32>
    "tpu.trace_stop"() : () -> ()
    %120 = vector.extract_strided_slice %13 {offsets = [0, 0, 80], sizes = [2, 8, 16], strides = [1, 1, 1]} : vector<2x8x384xf32> to vector<2x8x16xf32>
    %121 = arith.truncf %120 : vector<2x8x16xf32> to vector<2x8x16xbf16>
    %122 = vector.extract_strided_slice %13 {offsets = [0, 0, 208], sizes = [2, 8, 16], strides = [1, 1, 1]} : vector<2x8x384xf32> to vector<2x8x16xf32>
    %123 = arith.truncf %122 : vector<2x8x16xf32> to vector<2x8x16xbf16>
    %124 = vector.extract_strided_slice %13 {offsets = [0, 0, 336], sizes = [2, 8, 16], strides = [1, 1, 1]} : vector<2x8x384xf32> to vector<2x8x16xf32>
    %125 = arith.truncf %124 : vector<2x8x16xf32> to vector<2x8x16xbf16>
    "tpu.trace_start"() <{level = 10 : i32, message = "bqd,bkd->bqk"}> : () -> ()
    %cst_32 = arith.constant dense<0.000000e+00> : vector<2x8x8xf32>
    %126 = tpu.matmul %121, %123, %cst_32 {dimension_numbers = #tpu.dot_dimension_numbers<[2], [2], [1], [1], [0, 0, 0, 1, 1, 1], [0], [0]>} : vector<2x8x16xbf16>, vector<2x8x16xbf16>, vector<2x8x8xf32> -> vector<2x8x8xf32>
    "tpu.trace_stop"() : () -> ()
    %127 = vector.broadcast %14 : vector<2x1x8xf32> to vector<2x8x8xf32>
    %128 = arith.addf %126, %127 : vector<2x8x8xf32>
    %cst_33 = arith.constant dense<0xFF800000> : vector<2x8xf32>
    %129 = vector.multi_reduction <maximumf>, %128, %cst_33 [2] : vector<2x8x8xf32> to vector<2x8xf32>
    %130 = vector.shape_cast %129 : vector<2x8xf32> to vector<2x8x1xf32>
    %131 = vector.broadcast %130 : vector<2x8x1xf32> to vector<2x8x8xf32>
    %132 = arith.subf %128, %131 : vector<2x8x8xf32>
    %133 = math.exp %132 : vector<2x8x8xf32>
    %cst_34 = arith.constant dense<0.000000e+00> : vector<2x8xf32>
    %134 = vector.multi_reduction <add>, %133, %cst_34 [2] : vector<2x8x8xf32> to vector<2x8xf32>
    %135 = vector.shape_cast %134 : vector<2x8xf32> to vector<2x8x1xf32>
    %136 = tpu.reciprocal %135 {approx = true} : vector<2x8x1xf32> -> vector<2x8x1xf32>
    %137 = vector.broadcast %136 : vector<2x8x1xf32> to vector<2x8x8xf32>
    %138 = arith.mulf %133, %137 : vector<2x8x8xf32>
    %139 = arith.truncf %138 : vector<2x8x8xf32> to vector<2x8x8xbf16>
    "tpu.trace_start"() <{level = 10 : i32, message = "bqk,bkd->bqd"}> : () -> ()
    %cst_35 = arith.constant dense<0.000000e+00> : vector<2x8x16xf32>
    %140 = tpu.matmul %139, %125, %cst_35 {dimension_numbers = #tpu.dot_dimension_numbers<[2], [1], [1], [2], [0, 0, 0, 1, 1, 2], [0], [0]>} : vector<2x8x8xbf16>, vector<2x8x16xbf16>, vector<2x8x16xf32> -> vector<2x8x16xf32>
    "tpu.trace_stop"() : () -> ()
    %141 = vector.extract_strided_slice %13 {offsets = [0, 0, 96], sizes = [2, 8, 16], strides = [1, 1, 1]} : vector<2x8x384xf32> to vector<2x8x16xf32>
    %142 = arith.truncf %141 : vector<2x8x16xf32> to vector<2x8x16xbf16>
    %143 = vector.extract_strided_slice %13 {offsets = [0, 0, 224], sizes = [2, 8, 16], strides = [1, 1, 1]} : vector<2x8x384xf32> to vector<2x8x16xf32>
    %144 = arith.truncf %143 : vector<2x8x16xf32> to vector<2x8x16xbf16>
    %145 = vector.extract_strided_slice %13 {offsets = [0, 0, 352], sizes = [2, 8, 16], strides = [1, 1, 1]} : vector<2x8x384xf32> to vector<2x8x16xf32>
    %146 = arith.truncf %145 : vector<2x8x16xf32> to vector<2x8x16xbf16>
    "tpu.trace_start"() <{level = 10 : i32, message = "bqd,bkd->bqk"}> : () -> ()
    %cst_36 = arith.constant dense<0.000000e+00> : vector<2x8x8xf32>
    %147 = tpu.matmul %142, %144, %cst_36 {dimension_numbers = #tpu.dot_dimension_numbers<[2], [2], [1], [1], [0, 0, 0, 1, 1, 1], [0], [0]>} : vector<2x8x16xbf16>, vector<2x8x16xbf16>, vector<2x8x8xf32> -> vector<2x8x8xf32>
    "tpu.trace_stop"() : () -> ()
    %148 = vector.broadcast %14 : vector<2x1x8xf32> to vector<2x8x8xf32>
    %149 = arith.addf %147, %148 : vector<2x8x8xf32>
    %cst_37 = arith.constant dense<0xFF800000> : vector<2x8xf32>
    %150 = vector.multi_reduction <maximumf>, %149, %cst_37 [2] : vector<2x8x8xf32> to vector<2x8xf32>
    %151 = vector.shape_cast %150 : vector<2x8xf32> to vector<2x8x1xf32>
    %152 = vector.broadcast %151 : vector<2x8x1xf32> to vector<2x8x8xf32>
    %153 = arith.subf %149, %152 : vector<2x8x8xf32>
    %154 = math.exp %153 : vector<2x8x8xf32>
    %cst_38 = arith.constant dense<0.000000e+00> : vector<2x8xf32>
    %155 = vector.multi_reduction <add>, %154, %cst_38 [2] : vector<2x8x8xf32> to vector<2x8xf32>
    %156 = vector.shape_cast %155 : vector<2x8xf32> to vector<2x8x1xf32>
    %157 = tpu.reciprocal %156 {approx = true} : vector<2x8x1xf32> -> vector<2x8x1xf32>
    %158 = vector.broadcast %157 : vector<2x8x1xf32> to vector<2x8x8xf32>
    %159 = arith.mulf %154, %158 : vector<2x8x8xf32>
    %160 = arith.truncf %159 : vector<2x8x8xf32> to vector<2x8x8xbf16>
    "tpu.trace_start"() <{level = 10 : i32, message = "bqk,bkd->bqd"}> : () -> ()
    %cst_39 = arith.constant dense<0.000000e+00> : vector<2x8x16xf32>
    %161 = tpu.matmul %160, %146, %cst_39 {dimension_numbers = #tpu.dot_dimension_numbers<[2], [1], [1], [2], [0, 0, 0, 1, 1, 2], [0], [0]>} : vector<2x8x8xbf16>, vector<2x8x16xbf16>, vector<2x8x16xf32> -> vector<2x8x16xf32>
    "tpu.trace_stop"() : () -> ()
    %162 = vector.extract_strided_slice %13 {offsets = [0, 0, 112], sizes = [2, 8, 16], strides = [1, 1, 1]} : vector<2x8x384xf32> to vector<2x8x16xf32>
    %163 = arith.truncf %162 : vector<2x8x16xf32> to vector<2x8x16xbf16>
    %164 = vector.extract_strided_slice %13 {offsets = [0, 0, 240], sizes = [2, 8, 16], strides = [1, 1, 1]} : vector<2x8x384xf32> to vector<2x8x16xf32>
    %165 = arith.truncf %164 : vector<2x8x16xf32> to vector<2x8x16xbf16>
    %166 = vector.extract_strided_slice %13 {offsets = [0, 0, 368], sizes = [2, 8, 16], strides = [1, 1, 1]} : vector<2x8x384xf32> to vector<2x8x16xf32>
    %167 = arith.truncf %166 : vector<2x8x16xf32> to vector<2x8x16xbf16>
    "tpu.trace_start"() <{level = 10 : i32, message = "bqd,bkd->bqk"}> : () -> ()
    %cst_40 = arith.constant dense<0.000000e+00> : vector<2x8x8xf32>
    %168 = tpu.matmul %163, %165, %cst_40 {dimension_numbers = #tpu.dot_dimension_numbers<[2], [2], [1], [1], [0, 0, 0, 1, 1, 1], [0], [0]>} : vector<2x8x16xbf16>, vector<2x8x16xbf16>, vector<2x8x8xf32> -> vector<2x8x8xf32>
    "tpu.trace_stop"() : () -> ()
    %169 = vector.broadcast %14 : vector<2x1x8xf32> to vector<2x8x8xf32>
    %170 = arith.addf %168, %169 : vector<2x8x8xf32>
    %cst_41 = arith.constant dense<0xFF800000> : vector<2x8xf32>
    %171 = vector.multi_reduction <maximumf>, %170, %cst_41 [2] : vector<2x8x8xf32> to vector<2x8xf32>
    %172 = vector.shape_cast %171 : vector<2x8xf32> to vector<2x8x1xf32>
    %173 = vector.broadcast %172 : vector<2x8x1xf32> to vector<2x8x8xf32>
    %174 = arith.subf %170, %173 : vector<2x8x8xf32>
    %175 = math.exp %174 : vector<2x8x8xf32>
    %cst_42 = arith.constant dense<0.000000e+00> : vector<2x8xf32>
    %176 = vector.multi_reduction <add>, %175, %cst_42 [2] : vector<2x8x8xf32> to vector<2x8xf32>
    %177 = vector.shape_cast %176 : vector<2x8xf32> to vector<2x8x1xf32>
    %178 = tpu.reciprocal %177 {approx = true} : vector<2x8x1xf32> -> vector<2x8x1xf32>
    %179 = vector.broadcast %178 : vector<2x8x1xf32> to vector<2x8x8xf32>
    %180 = arith.mulf %175, %179 : vector<2x8x8xf32>
    %181 = arith.truncf %180 : vector<2x8x8xf32> to vector<2x8x8xbf16>
    "tpu.trace_start"() <{level = 10 : i32, message = "bqk,bkd->bqd"}> : () -> ()
    %cst_43 = arith.constant dense<0.000000e+00> : vector<2x8x16xf32>
    %182 = tpu.matmul %181, %167, %cst_43 {dimension_numbers = #tpu.dot_dimension_numbers<[2], [1], [1], [2], [0, 0, 0, 1, 1, 2], [0], [0]>} : vector<2x8x8xbf16>, vector<2x8x16xbf16>, vector<2x8x16xf32> -> vector<2x8x16xf32>
    "tpu.trace_stop"() : () -> ()
    %183 = tpu.concatenate %35, %56, %77, %98, %119, %140, %161, %182 in 2 : vector<2x8x16xf32>, vector<2x8x16xf32>, vector<2x8x16xf32>, vector<2x8x16xf32>, vector<2x8x16xf32>, vector<2x8x16xf32>, vector<2x8x16xf32>, vector<2x8x16xf32> -> vector<2x8x128xf32>
    %184 = vector.shape_cast %183 : vector<2x8x128xf32> to vector<16x128xf32>
    %185 = arith.truncf %184 : vector<16x128xf32> to vector<16x128xbf16>
    %c0_44 = arith.constant 0 : index
    %c0_45 = arith.constant 0 : index
    %c0_46 = arith.constant 0 : index
    %186 = vector.load %arg6[%c0_44, %c0_45, %c0_46] : memref<1x128x128xbf16, #tpu.memory_space<vmem>>, vector<1x128x128xbf16>
    %187 = vector.shape_cast %186 : vector<1x128x128xbf16> to vector<128x128xbf16>
    %cst_47 = arith.constant dense<0.000000e+00> : vector<16x128xf32>
    %188 = tpu.matmul %185, %187, %cst_47 {dimension_numbers = #tpu.dot_dimension_numbers<[1], [0], [0], [1], [0, 0, 1, 1], [], []>} : vector<16x128xbf16>, vector<128x128xbf16>, vector<16x128xf32> -> vector<16x128xf32>
    %c0_48 = arith.constant 0 : index
    %c0_49 = arith.constant 0 : index
    %c0_50 = arith.constant 0 : index
    %189 = vector.load %arg7[%c0_48, %c0_49, %c0_50] : memref<1x1x128xf32, #tpu.memory_space<vmem>>, vector<1x1x128xf32>
    %190 = vector.shape_cast %189 : vector<1x1x128xf32> to vector<1x128xf32>
    %191 = vector.broadcast %190 : vector<1x128xf32> to vector<16x128xf32>
    %192 = arith.addf %188, %191 : vector<16x128xf32>
    %193 = arith.addf %4, %192 : vector<16x128xf32>
    %cst_51 = arith.constant dense<0.000000e+00> : vector<16xf32>
    %194 = vector.multi_reduction <add>, %193, %cst_51 [1] : vector<16x128xf32> to vector<16xf32>
    %195 = vector.shape_cast %194 : vector<16xf32> to vector<16x1xf32>
    %cst_52 = arith.constant 1.280000e+02 : f32
    %196 = vector.broadcast %cst_52 : f32 to vector<16x1xf32>
    %197 = arith.divf %195, %196 : vector<16x1xf32>
    %198 = vector.broadcast %197 : vector<16x1xf32> to vector<16x128xf32>
    %199 = arith.subf %193, %198 : vector<16x128xf32>
    %200 = arith.mulf %199, %199 : vector<16x128xf32>
    %cst_53 = arith.constant dense<0.000000e+00> : vector<16xf32>
    %201 = vector.multi_reduction <add>, %200, %cst_53 [1] : vector<16x128xf32> to vector<16xf32>
    %202 = vector.shape_cast %201 : vector<16xf32> to vector<16x1xf32>
    %cst_54 = arith.constant 1.280000e+02 : f32
    %203 = vector.broadcast %cst_54 : f32 to vector<16x1xf32>
    %204 = arith.divf %202, %203 : vector<16x1xf32>
    %205 = vector.broadcast %197 : vector<16x1xf32> to vector<16x128xf32>
    %206 = arith.subf %193, %205 : vector<16x128xf32>
    %cst_55 = arith.constant 9.99999974E-6 : f32
    %207 = vector.broadcast %cst_55 : f32 to vector<16x1xf32>
    %208 = arith.addf %204, %207 : vector<16x1xf32>
    %209 = math.rsqrt %208 : vector<16x1xf32>
    %210 = vector.broadcast %209 : vector<16x1xf32> to vector<16x128xf32>
    %211 = arith.mulf %206, %210 : vector<16x128xf32>
    %c0_56 = arith.constant 0 : index
    %c0_57 = arith.constant 0 : index
    %c0_58 = arith.constant 0 : index
    %212 = vector.load %arg8[%c0_56, %c0_57, %c0_58] : memref<1x1x128xf32, #tpu.memory_space<vmem>>, vector<1x1x128xf32>
    %213 = vector.shape_cast %212 : vector<1x1x128xf32> to vector<1x128xf32>
    %214 = vector.broadcast %213 : vector<1x128xf32> to vector<16x128xf32>
    %215 = arith.mulf %211, %214 : vector<16x128xf32>
    %c0_59 = arith.constant 0 : index
    %c0_60 = arith.constant 0 : index
    %c0_61 = arith.constant 0 : index
    %216 = vector.load %arg9[%c0_59, %c0_60, %c0_61] : memref<1x1x128xf32, #tpu.memory_space<vmem>>, vector<1x1x128xf32>
    %217 = vector.shape_cast %216 : vector<1x1x128xf32> to vector<1x128xf32>
    %218 = vector.broadcast %217 : vector<1x128xf32> to vector<16x128xf32>
    %219 = arith.addf %215, %218 : vector<16x128xf32>
    %220 = arith.truncf %219 : vector<16x128xf32> to vector<16x128xbf16>
    %c0_62 = arith.constant 0 : index
    %c0_63 = arith.constant 0 : index
    %c0_64 = arith.constant 0 : index
    %221 = vector.load %arg10[%c0_62, %c0_63, %c0_64] : memref<1x128x512xbf16, #tpu.memory_space<vmem>>, vector<1x128x512xbf16>
    %222 = vector.shape_cast %221 : vector<1x128x512xbf16> to vector<128x512xbf16>
    %cst_65 = arith.constant dense<0.000000e+00> : vector<16x512xf32>
    %223 = tpu.matmul %220, %222, %cst_65 {dimension_numbers = #tpu.dot_dimension_numbers<[1], [0], [0], [1], [0, 0, 1, 1], [], []>} : vector<16x128xbf16>, vector<128x512xbf16>, vector<16x512xf32> -> vector<16x512xf32>
    %c0_66 = arith.constant 0 : index
    %c0_67 = arith.constant 0 : index
    %c0_68 = arith.constant 0 : index
    %224 = vector.load %arg11[%c0_66, %c0_67, %c0_68] : memref<1x1x512xf32, #tpu.memory_space<vmem>>, vector<1x1x512xf32>
    %225 = vector.shape_cast %224 : vector<1x1x512xf32> to vector<1x512xf32>
    %226 = vector.broadcast %225 : vector<1x512xf32> to vector<16x512xf32>
    %227 = arith.addf %223, %226 : vector<16x512xf32>
    %cst_69 = arith.constant 0.000000e+00 : f32
    %228 = vector.broadcast %cst_69 : f32 to vector<16x512xf32>
    %229 = arith.maximumf %227, %228 : vector<16x512xf32>
    %230 = arith.truncf %229 : vector<16x512xf32> to vector<16x512xbf16>
    %c0_70 = arith.constant 0 : index
    %c0_71 = arith.constant 0 : index
    %c0_72 = arith.constant 0 : index
    %231 = vector.load %arg12[%c0_70, %c0_71, %c0_72] : memref<1x512x128xbf16, #tpu.memory_space<vmem>>, vector<1x512x128xbf16>
    %232 = vector.shape_cast %231 : vector<1x512x128xbf16> to vector<512x128xbf16>
    %cst_73 = arith.constant dense<0.000000e+00> : vector<16x128xf32>
    %233 = tpu.matmul %230, %232, %cst_73 {dimension_numbers = #tpu.dot_dimension_numbers<[1], [0], [0], [1], [0, 0, 1, 1], [], []>} : vector<16x512xbf16>, vector<512x128xbf16>, vector<16x128xf32> -> vector<16x128xf32>
    %c0_74 = arith.constant 0 : index
    %c0_75 = arith.constant 0 : index
    %c0_76 = arith.constant 0 : index
    %234 = vector.load %arg13[%c0_74, %c0_75, %c0_76] : memref<1x1x128xf32, #tpu.memory_space<vmem>>, vector<1x1x128xf32>
    %235 = vector.shape_cast %234 : vector<1x1x128xf32> to vector<1x128xf32>
    %236 = vector.broadcast %235 : vector<1x128xf32> to vector<16x128xf32>
    %237 = arith.addf %233, %236 : vector<16x128xf32>
    %238 = arith.addf %219, %237 : vector<16x128xf32>
    %cst_77 = arith.constant dense<0.000000e+00> : vector<16xf32>
    %239 = vector.multi_reduction <add>, %238, %cst_77 [1] : vector<16x128xf32> to vector<16xf32>
    %240 = vector.shape_cast %239 : vector<16xf32> to vector<16x1xf32>
    %cst_78 = arith.constant 1.280000e+02 : f32
    %241 = vector.broadcast %cst_78 : f32 to vector<16x1xf32>
    %242 = arith.divf %240, %241 : vector<16x1xf32>
    %243 = vector.broadcast %242 : vector<16x1xf32> to vector<16x128xf32>
    %244 = arith.subf %238, %243 : vector<16x128xf32>
    %245 = arith.mulf %244, %244 : vector<16x128xf32>
    %cst_79 = arith.constant dense<0.000000e+00> : vector<16xf32>
    %246 = vector.multi_reduction <add>, %245, %cst_79 [1] : vector<16x128xf32> to vector<16xf32>
    %247 = vector.shape_cast %246 : vector<16xf32> to vector<16x1xf32>
    %cst_80 = arith.constant 1.280000e+02 : f32
    %248 = vector.broadcast %cst_80 : f32 to vector<16x1xf32>
    %249 = arith.divf %247, %248 : vector<16x1xf32>
    %250 = vector.broadcast %242 : vector<16x1xf32> to vector<16x128xf32>
    %251 = arith.subf %238, %250 : vector<16x128xf32>
    %cst_81 = arith.constant 9.99999974E-6 : f32
    %252 = vector.broadcast %cst_81 : f32 to vector<16x1xf32>
    %253 = arith.addf %249, %252 : vector<16x1xf32>
    %254 = math.rsqrt %253 : vector<16x1xf32>
    %255 = vector.broadcast %254 : vector<16x1xf32> to vector<16x128xf32>
    %256 = arith.mulf %251, %255 : vector<16x128xf32>
    %c0_82 = arith.constant 0 : index
    %c0_83 = arith.constant 0 : index
    %c0_84 = arith.constant 0 : index
    %257 = vector.load %arg14[%c0_82, %c0_83, %c0_84] : memref<1x1x128xf32, #tpu.memory_space<vmem>>, vector<1x1x128xf32>
    %258 = vector.shape_cast %257 : vector<1x1x128xf32> to vector<1x128xf32>
    %259 = vector.broadcast %258 : vector<1x128xf32> to vector<16x128xf32>
    %260 = arith.mulf %256, %259 : vector<16x128xf32>
    %c0_85 = arith.constant 0 : index
    %c0_86 = arith.constant 0 : index
    %c0_87 = arith.constant 0 : index
    %261 = vector.load %arg15[%c0_85, %c0_86, %c0_87] : memref<1x1x128xf32, #tpu.memory_space<vmem>>, vector<1x1x128xf32>
    %262 = vector.shape_cast %261 : vector<1x1x128xf32> to vector<1x128xf32>
    %263 = vector.broadcast %262 : vector<1x128xf32> to vector<16x128xf32>
    %264 = arith.addf %260, %263 : vector<16x128xf32>
    %265 = vector.shape_cast %264 : vector<16x128xf32> to vector<2x8x128xf32>
    %c0_88 = arith.constant 0 : index
    %c0_89 = arith.constant 0 : index
    %c0_90 = arith.constant 0 : index
    %266 = vector.load %arg17[%c0_88, %c0_89, %c0_90] : memref<2x8x128xf32, #tpu.memory_space<vmem>>, vector<2x8x128xf32>
    tpu.vector_store %arg17[%c0_88, %c0_89, %c0_90], %265 {strides = array<i32>} : memref<2x8x128xf32, #tpu.memory_space<vmem>>, vector<2x8x128xf32>,
    %c1_i32 = arith.constant 1 : i32
    %267 = arith.cmpi eq, %arg1, %c1_i32 : i32
    %268 = arith.extui %267 : i1 to i32
    %c0_i32_91 = arith.constant 0 : i32
    %269 = arith.cmpi ne, %268, %c0_i32_91 : i32
    scf.if %269 {
      %c0_92 = arith.constant 0 : index
      %c0_93 = arith.constant 0 : index
      %c0_94 = arith.constant 0 : index
      %270 = vector.load %arg16[%c0_92, %c0_93, %c0_94] : memref<2x8x128xf32, #tpu.memory_space<vmem>>, vector<2x8x128xf32>
      tpu.vector_store %arg16[%c0_92, %c0_93, %c0_94], %265 {strides = array<i32>} : memref<2x8x128xf32, #tpu.memory_space<vmem>>, vector<2x8x128xf32>,
    } else {
    }
    return
  }
  func.func @transform_0(%arg0: i32, %arg1: i32) -> (i32, i32, i32) {
    %c0_i32 = arith.constant 0 : i32
    %c0_i32_0 = arith.constant 0 : i32
    %c0_i32_1 = arith.constant 0 : i32
    return %arg0, %c0_i32, %c0_i32_0 : i32, i32, i32
  }
  func.func @transform_1(%arg0: i32, %arg1: i32) -> (i32, i32, i32) {
    %c0_i32 = arith.constant 0 : i32
    %c0_i32_0 = arith.constant 0 : i32
    %c0_i32_1 = arith.constant 0 : i32
    return %arg0, %c0_i32, %c0_i32_0 : i32, i32, i32
  }
  func.func @transform_2(%arg0: i32, %arg1: i32) -> (i32, i32, i32) {
    %c0_i32 = arith.constant 0 : i32
    %c0_i32_0 = arith.constant 0 : i32
    %c0_i32_1 = arith.constant 0 : i32
    return %arg1, %c0_i32, %c0_i32_0 : i32, i32, i32
  }
  func.func @transform_3(%arg0: i32, %arg1: i32) -> (i32, i32, i32) {
    %c0_i32 = arith.constant 0 : i32
    %c0_i32_0 = arith.constant 0 : i32
    %c0_i32_1 = arith.constant 0 : i32
    return %arg1, %c0_i32, %c0_i32_0 : i32, i32, i32
  }
  func.func @transform_4(%arg0: i32, %arg1: i32) -> (i32, i32, i32) {
    %c0_i32 = arith.constant 0 : i32
    %c0_i32_0 = arith.constant 0 : i32
    %c0_i32_1 = arith.constant 0 : i32
    return %arg1, %c0_i32, %c0_i32_0 : i32, i32, i32
  }
  func.func @transform_5(%arg0: i32, %arg1: i32) -> (i32, i32, i32) {
    %c0_i32 = arith.constant 0 : i32
    %c0_i32_0 = arith.constant 0 : i32
    %c0_i32_1 = arith.constant 0 : i32
    return %arg1, %c0_i32, %c0_i32_0 : i32, i32, i32
  }
  func.func @transform_6(%arg0: i32, %arg1: i32) -> (i32, i32, i32) {
    %c0_i32 = arith.constant 0 : i32
    %c0_i32_0 = arith.constant 0 : i32
    %c0_i32_1 = arith.constant 0 : i32
    return %arg1, %c0_i32, %c0_i32_0 : i32, i32, i32
  }
  func.func @transform_7(%arg0: i32, %arg1: i32) -> (i32, i32, i32) {
    %c0_i32 = arith.constant 0 : i32
    %c0_i32_0 = arith.constant 0 : i32
    %c0_i32_1 = arith.constant 0 : i32
    return %arg1, %c0_i32, %c0_i32_0 : i32, i32, i32
  }
  func.func @transform_8(%arg0: i32, %arg1: i32) -> (i32, i32, i32) {
    %c0_i32 = arith.constant 0 : i32
    %c0_i32_0 = arith.constant 0 : i32
    %c0_i32_1 = arith.constant 0 : i32
    return %arg1, %c0_i32, %c0_i32_0 : i32, i32, i32
  }
  func.func @transform_9(%arg0: i32, %arg1: i32) -> (i32, i32, i32) {
    %c0_i32 = arith.constant 0 : i32
    %c0_i32_0 = arith.constant 0 : i32
    %c0_i32_1 = arith.constant 0 : i32
    return %arg1, %c0_i32, %c0_i32_0 : i32, i32, i32
  }
  func.func @transform_10(%arg0: i32, %arg1: i32) -> (i32, i32, i32) {
    %c0_i32 = arith.constant 0 : i32
    %c0_i32_0 = arith.constant 0 : i32
    %c0_i32_1 = arith.constant 0 : i32
    return %arg1, %c0_i32, %c0_i32_0 : i32, i32, i32
  }
  func.func @transform_11(%arg0: i32, %arg1: i32) -> (i32, i32, i32) {
    %c0_i32 = arith.constant 0 : i32
    %c0_i32_0 = arith.constant 0 : i32
    %c0_i32_1 = arith.constant 0 : i32
    return %arg1, %c0_i32, %c0_i32_0 : i32, i32, i32
  }
  func.func @transform_12(%arg0: i32, %arg1: i32) -> (i32, i32, i32) {
    %c0_i32 = arith.constant 0 : i32
    %c0_i32_0 = arith.constant 0 : i32
    %c0_i32_1 = arith.constant 0 : i32
    return %arg1, %c0_i32, %c0_i32_0 : i32, i32, i32
  }
  func.func @transform_13(%arg0: i32, %arg1: i32) -> (i32, i32, i32) {
    %c0_i32 = arith.constant 0 : i32
    %c0_i32_0 = arith.constant 0 : i32
    %c0_i32_1 = arith.constant 0 : i32
    return %arg1, %c0_i32, %c0_i32_0 : i32, i32, i32
  }
  func.func @transform_14(%arg0: i32, %arg1: i32) -> (i32, i32, i32) {
    %c0_i32 = arith.constant 0 : i32
    %c0_i32_0 = arith.constant 0 : i32
    %c0_i32_1 = arith.constant 0 : i32
    return %arg0, %c0_i32, %c0_i32_0 : i32, i32, i32
  }
}

module attributes {stable_mosaic.version = 11 : i64} {
  func.func @mlm_id_kernel(%arg0: i32, %arg1: i32, %arg2: memref<1x8x128xf32, #tpu.memory_space<vmem>>, %arg3: memref<128x128xbf16, #tpu.memory_space<vmem>>, %arg4: memref<1x128xf32, #tpu.memory_space<vmem>>, %arg5: memref<1x8x128xf32, #tpu.memory_space<vmem>>) attributes {dimension_semantics = [#tpu.dimension_semantics<parallel>, #tpu.dimension_semantics<parallel>], iteration_bounds = array<i64: 1, 2>, scalar_prefetch = 0 : i64, scratch_operands = 0 : i64, tpu.core_type = #tpu.core_type<tc>, window_params = [{transform_indices = @transform_0, window_bounds = array<i64: 1, 8, 128>}, {transform_indices = @transform_1, window_bounds = array<i64: 128, 128>}, {transform_indices = @transform_2, window_bounds = array<i64: 1, 128>}, {transform_indices = @transform_3, window_bounds = array<i64: 1, 8, 128>}]} {
    %c0 = arith.constant 0 : index
    %c0_0 = arith.constant 0 : index
    %c0_1 = arith.constant 0 : index
    %0 = vector.load %arg2[%c0, %c0_0, %c0_1] : memref<1x8x128xf32, #tpu.memory_space<vmem>>, vector<1x8x128xf32>
    %1 = vector.shape_cast %0 : vector<1x8x128xf32> to vector<8x128xf32>
    %2 = arith.truncf %1 : vector<8x128xf32> to vector<8x128xbf16>
    %c0_2 = arith.constant 0 : index
    %c0_3 = arith.constant 0 : index
    %3 = vector.load %arg3[%c0_2, %c0_3] : memref<128x128xbf16, #tpu.memory_space<vmem>>, vector<128x128xbf16>
    %cst = arith.constant dense<0.000000e+00> : vector<8x128xf32>
    %4 = tpu.matmul %2, %3, %cst {dimension_numbers = #tpu.dot_dimension_numbers<[1], [0], [0], [1], [0, 0, 1, 1], [], []>} : vector<8x128xbf16>, vector<128x128xbf16>, vector<8x128xf32> -> vector<8x128xf32>
    %c0_4 = arith.constant 0 : index
    %c0_5 = arith.constant 0 : index
    %5 = vector.load %arg4[%c0_4, %c0_5] : memref<1x128xf32, #tpu.memory_space<vmem>>, vector<1x128xf32>
    %6 = vector.broadcast %5 : vector<1x128xf32> to vector<8x128xf32>
    %7 = arith.addf %4, %6 : vector<8x128xf32>
    %c0_6 = arith.constant 0 : index
    %c0_7 = arith.constant 0 : index
    %c0_8 = arith.constant 0 : index
    %8 = vector.load %arg5[%c0_6, %c0_7, %c0_8] : memref<1x8x128xf32, #tpu.memory_space<vmem>>, vector<1x8x128xf32>
    %9 = vector.shape_cast %8 : vector<1x8x128xf32> to vector<8x128xf32>
    %10 = vector.shape_cast %7 : vector<8x128xf32> to vector<1x8x128xf32>
    tpu.vector_store %arg5[%c0_6, %c0_7, %c0_8], %10 {strides = array<i32>} : memref<1x8x128xf32, #tpu.memory_space<vmem>>, vector<1x8x128xf32>,
    return
  }
  func.func @transform_0(%arg0: i32, %arg1: i32) -> (i32, i32, i32) {
    %c0_i32 = arith.constant 0 : i32
    %c0_i32_0 = arith.constant 0 : i32
    %c0_i32_1 = arith.constant 0 : i32
    return %arg1, %c0_i32, %c0_i32_0 : i32, i32, i32
  }
  func.func @transform_1(%arg0: i32, %arg1: i32) -> (i32, i32) {
    %c0_i32 = arith.constant 0 : i32
    %c0_i32_0 = arith.constant 0 : i32
    return %c0_i32, %arg0 : i32, i32
  }
  func.func @transform_2(%arg0: i32, %arg1: i32) -> (i32, i32) {
    %c0_i32 = arith.constant 0 : i32
    %c0_i32_0 = arith.constant 0 : i32
    return %c0_i32, %arg0 : i32, i32
  }
  func.func @transform_3(%arg0: i32, %arg1: i32) -> (i32, i32, i32) {
    %c0_i32 = arith.constant 0 : i32
    %c0_i32_0 = arith.constant 0 : i32
    return %arg1, %c0_i32, %arg0 : i32, i32, i32
  }
}

</mosaic_0001>

<bundles_post_ra>
// kernel: sc_encoder_forward.3
= control target key start
LH: loop header
LB: loop body
LE: loop exit
PB: predicated region body
PF: predicated region fallthrough
CT: control target
= control target key end

     0   :  { %s560_s12 = smov 0   ;;  %s562_s13 = smov 0   ;;  %s620_s0 = inlined_call_operand.vmem [shape: f32[2,8,128], index: 0, kind: input, shape index: {}]   ;;  %s621_s1 = inlined_call_operand.vmem [shape: bf16[128,128], index: 1, kind: input, shape index: {}]   ;;  %s622_s2 = inlined_call_operand.vmem [shape: f32[1,128], index: 2, kind: input, shape index: {}]   ;;  %s623_s3 = inlined_call_operand.vmem [shape: f32[2,8,128], index: 3, kind: output, shape index: {}]  }
   0x1   :  { %s564_s14 = smov 0  }
   0x2 LB: > { %s22_s15 = sadd.s32 1, %s532_s13  ;;  %p437_p0 = scmp.ge.s32.totalorder %s536_s14, 1  ;;  %s536_s14 = sphi %s564_s14, %s13_s14   ;;  %s532_s13 = sphi %s562_s13, %s625_s13   ;;  %s528_s12 = sphi %s560_s12, %s624_s12  }
   0x3   : > { %p23_p1 = scmp.ge.s32.totalorder %s22_s15, 2  ;;  %p167_p2 = scmp.lt.s32.totalorder %s536_s14, 3 }
   0x5   : > { %s627_s15 = smov (%p23_p1, %s22_s15), 0  ;;  %p168_p3 = pnand %p437_p0, %p167_p2 }
   0x6   : > { %v506_v0 = vld [vmem:[%s621_s1] sm:$0xff] (!%p168_p3)   ;;  %v538_v1 = vmov (!%p168_p3), 0.0   ;;  %v507_v2 = vld [vmem:[%s621_s1 + $0x8] sm:$0xff] (!%p168_p3)   ;;  %vm539_vm0 = vmmov (!%p168_p3), 0   ;;  %v508_v3 = vld [vmem:[%s621_s1 + $0x10] sm:$0xff] (!%p168_p3)   ;;  %p199_p4 = scmp.lt.s32.totalorder (!%p168_p3), %s528_s12, 1 }
   0x7   : > { %171 = sbr.rel (%p168_p3) target bundleno = 254 (0xfe), region = 32  ;;  %460 = vmatprep.subr.bf16.mxu0 (!%p168_p3), %v538_v1  ;;  %476 = vmatprep.mubr.msk.bf16.mxu0 (!%p168_p3), %vm539_vm0, %v538_v1  ;;  %v509_v4 = vld [vmem:[%s621_s1 + $0x18] sm:$0xff] (!%p168_p3)   ;;  %v510_v5 = vld [vmem:[%s621_s1 + $0x20] sm:$0xff] (!%p168_p3)   ;;  %v511_v6 = vld [vmem:[%s621_s1 + $0x28] sm:$0xff] (!%p168_p3)  }
   0x8   : > { %461 = vmatpush3.bf16.msra.mxu0 (!%p168_p3), %v506_v0  ;;  %v512_v7 = vld [vmem:[%s621_s1 + $0x30] sm:$0xff] (!%p168_p3)   ;;  %v513_v8 = vld [vmem:[%s621_s1 + $0x38] sm:$0xff] (!%p168_p3)   ;;  %v440_v11 = vld [vmem:[%s622_s2] ss:$0 sm:$0xff] (!%p168_p3) }
   0x9   : > { %462 = vmatprep.subr.bf16.mxu0 (!%p168_p3), %v538_v1 }
   0xc   : > { %463 = vmatpush3.bf16.msra.mxu0 (!%p168_p3), %v507_v2 }
   0xd   : > { %464 = vmatprep.subr.bf16.mxu0 (!%p168_p3), %v538_v1 }
   0xe   : > { %s629_s12 = smov (!%p199_p4, %s528_s12), 1 }
   0xf   : > { %s438_s28 = sshll.u32 %s629_s12, 3 }
  0x10   : > { %465 = vmatpush3.bf16.msra.mxu0 %v508_v3  ;;  %s202_s6 = scalar_lea.vmem %s620_s0, %s438_s28  ;;  %s216_s16 = scalar_lea.vmem %s623_s3, %s438_s28 }
  0x11   : > { %466 = vmatprep.subr.bf16.mxu0 %v538_v1  ;;  %v218_v9 = vld [vmem:[%s202_s6] sm:$0xff] }
  0x12   : > { %v219_v10 = vpack.c.bf16 %v218_v9, %v218_v9 }
  0x14   : > { %467 = vmatpush3.bf16.msra.mxu0 %v509_v4 }
  0x15   : > { %468 = vmatprep.subr.bf16.mxu0 %v538_v1 }
  0x18   : > { %469 = vmatpush3.bf16.msra.mxu0 %v510_v5 }
  0x19   : > { %470 = vmatprep.subr.bf16.mxu0 %v538_v1 }
  0x1c   : > { %471 = vmatpush3.bf16.msra.mxu0 %v511_v6 }
  0x1d   : > { %472 = vmatprep.subr.bf16.mxu0 %v538_v1 }
  0x20   : > { %473 = vmatpush3.bf16.msra.mxu0 %v512_v7 }
  0x21   : > { %474 = vmatprep.subr.bf16.mxu0 %v538_v1 }
  0x24   : > { %475 = vmatpush3.bf16.msra.mxu0 %v513_v8 }
  0x27   : > { %477 = vmatmul.mubr.bf16.vlgmr.msra.gmra.mrb[0].mxu0 %v219_v10 }
  0xfa   : > { %v325_v12 = vpop.f32.mrb[0].mxu0 }
  0xfb   : > { %v326_v13 = vadd.f32 %v440_v11, %v325_v12  ;;  %v478_v14 = vpop.f32.mrb[1].mxu0 }
  0xfc   : > { %v328_v15 = vpop.f32.mrb[2].mxu0 }
  0xfd   : > { %331 = vst [vmem:[%s216_s16] sm:$0xff] %v326_v13  ;;  %v479_v16 = vpop.f32.mrb[3].mxu0 }
  0xfe PF: > { %s13_s14 = sadd.s32 1, %s536_s14   ;;  %s624_s12 = smov %s532_s13 }
  0xff   : > { %p10_p5 = scmp.ge.s32.totalorder %s13_s14, 4   ;;  %s625_s13 = smov %s627_s15 }
 0x101   :  { %12 = sbr.rel (!%p10_p5) target bundleno = 2 (0x2), region = 68 }

// kernel: sc_encoder_forward.2
= control target key start
LH: loop header
LB: loop body
LE: loop exit
PB: predicated region body
PF: predicated region fallthrough
CT: control target
= control target key end

     0   :  { %s5899_s0 = inlined_call_operand.vmem [shape: f32[2,8,128], index: 0, kind: input, shape index: {}]   ;;  %s5900_s1 = inlined_call_operand.vmem [shape: f32[2,1,8], index: 1, kind: input, shape index: {}]   ;;  %s5901_s2 = inlined_call_operand.vmem [shape: bf16[2,128,384], index: 2, kind: input, shape index: {}]   ;;  %s5902_s3 = inlined_call_operand.vmem [shape: f32[2,1,384], index: 3, kind: input, shape index: {}]   ;;  %s5903_s4 = inlined_call_operand.hbm [shape: bf16[2,128,128], index: 4, kind: input, shape index: {}]   ;;  %s5904_s5 = inlined_call_operand.vmem [shape: f32[2,1,128], index: 5, kind: input, shape index: {}]   ;;  %s5905_s6 = inlined_call_operand.vmem [shape: f32[2,1,128], index: 6, kind: input, shape index: {}]   ;;  %s5906_s7 = inlined_call_operand.vmem [shape: f32[2,1,128], index: 7, kind: input, shape index: {}]   ;;  %s5907_s8 = inlined_call_operand.hbm [shape: bf16[2,128,512], index: 8, kind: input, shape index: {}]   ;;  %s5908_s9 = inlined_call_operand.vmem [shape: f32[2,1,512], index: 9, kind: input, shape index: {}]   ;;  %s5909_s10 = inlined_call_operand.hbm [shape: bf16[2,512,128], index: 10, kind: input, shape index: {}]   ;;  %s5910_s11 = inlined_call_operand.vmem [shape: f32[2,1,128], index: 11, kind: input, shape index: {}]   ;;  %s5911_s12 = inlined_call_operand.vmem [shape: f32[2,1,128], index: 12, kind: input, shape index: {}]   ;;  %s5912_s13 = inlined_call_operand.vmem [shape: f32[2,1,128], index: 13, kind: input, shape index: {}]   ;;  %s5913_s14 = inlined_call_operand.vmem [shape: f32[2,8,128], index: 14, kind: output, shape index: {}]  }
   0x1   :  { %5925 = sst [smem:[#allocation15_spill]] %s5899_s0 }
   0x2   :  { %5926 = sst [smem:[#allocation16_spill]] %s5900_s1 }
   0x3   :  { %5927 = sst [smem:[#allocation17_spill]] %s5901_s2 }
   0x4   :  { %5928 = sst [smem:[#allocation18_spill]] %s5903_s4 }
   0x5   :  { %5929 = sst [smem:[#allocation19_spill]] %s5907_s8 }
   0x6   :  { %5930 = sst [smem:[#allocation20_spill]] %s5909_s10 }
   0x7   :  { %5931 = sst [smem:[#allocation21_spill]] %s5911_s12 }
   0x8   :  { %5932 = sst [smem:[#allocation22_spill]] %s5912_s13 }
   0x9   :  { %5933 = sst [smem:[#allocation23_spill]] %s5913_s14 }
   0xa   :  { %19 = vsyncpa [#allocation4], 0 }
   0xb   :  { %21 = vsyncpa [#allocation4 + $0x1], 0 }
   0xc   :  { %22 = vsyncpa [#allocation6], 0 }
   0xd   :  { %24 = vsyncpa [#allocation6 + $0x1], 0  ;;  %s5053_s29 = smov 0   ;;  %s5055_s30 = smov 0  }
   0xe   :  { %s5057_s15 = smov 0   ;;  %s5059_s16 = smov 0  }
   0xf   :  { %s5061_s17 = smov 0   ;;  %s5063_s18 = smov 0  }
  0x10 LB: > { %5934 = sst [smem:[#allocation10_spill]] %s4943_s30  ;;  %s5914_s19 = sadd.s32 4294967295, %s4959_s18   ;;  %s4959_s18 = sphi %s5063_s18, %s30_s18   ;;  %s4955_s17 = sphi %s5061_s17, %s5967_s17   ;;  %s4951_s16 = sphi %s5059_s16, %s5966_s16   ;;  %s4947_s15 = sphi %s5057_s15, %s5965_s15   ;;  %s4943_s30 = sphi %s5055_s30, %s5964_s30   ;;  %s4939_s29 = sphi %s5053_s29, %s5963_s29  }
  0x11   : > { %5935 = sst [smem:[#allocation11_spill]] %s4947_s15  ;;  %s39_s20 = sadd.s32 1, %s4955_s17 }
  0x12   : > { %5936 = sst [smem:[#allocation12_spill]] %s4955_s17  ;;  %p40_p0 = scmp.ge.s32.totalorder %s39_s20, 2 }
  0x13   : > { %s153_s21 = sadd.s32 1, %s4947_s15  ;;  %p160_p1 = scmp.ne.s32.totalorder %s4947_s15, %s4943_s30 }
  0x14   : > { %p161_p2 = scmp.eq.s32.totalorder %s4959_s18, 0  ;;  %s5969_s20 = smov (%p40_p0, %s39_s20), 0 }
  0x15   : > { %5937 = sst [smem:[#allocation13_spill]] %s5969_s20  ;;  %p166_p4 = scmp.ne.s32.totalorder %s4943_s30, %s4939_s29 }
  0x16   : > { %p162_p3 = por %p161_p2, %p160_p1  ;;  %s150_s22 = ssub.s32 %s4955_s17, %s5969_s20 }
  0x17   : > { %p167_p5 = scmp.eq.s32.totalorder %s5914_s19, 0  ;;  %p151_p6 = scmp.eq.s32.totalorder %s150_s22, 0 }
  0x18   : > { %p4521_p8 = scmp.lt.s32.totalorder %s4959_s18, 2  ;;  %s5103_s25 = sand.u32 1, %s4947_s15  }
  0x19   : > { %p5094_p7 = por %p167_p5, %p166_p4  ;;  %s521_s27 = sand.u32 1, %s4959_s18  }
  0x1a   : > { %s5100_s24 = scalar_select %p151_p6, %s4947_s15, %s153_s21  }
  0x1b   : > { %s5938_s23 = scalar_select %p5094_p7, 1, 0 }
  0x1c   : > { %5939 = sst [smem:[#allocation14_spill]] %s5100_s24  ;;  %p5105_p9 = pnand %p4521_p8, %p162_p3 }
  0x1d   : > { %s5919_s28 = sshll.u32 %s5103_s25, 8  ;;  %s5920_s29 = sshll.u32 %s4955_s17, 12 }
  0x1e   : > { %s5941_s8 = sld [smem:[#allocation19_spill]]  ;;  %s525_s21 = scalar_lea.vmem [#allocation5], %s5919_s28 }
  0x1f   : > { %s532_s24 = sshll.u32 %s525_s21, 4  ;;  %s5123_s15 = scalar_lea.sflag [#allocation6], %s521_s27  ;;  %s5121_s24 = int_to_ptr.vmem [resolvable:$true] %s532_s24 }
  0x20   : > { %p5129_p11 = pneg %p5105_p9 }
  0x24   : > { %s5117_s20 = scalar_lea.hbm %s5941_s8, %s5920_s29  ;;  %s4820_s28 = scalar_lea.hbm %s5941_s8, 8192 }
  0x25   : > { %s4815_s14 = scalar_lea.hbm %s5117_s20, 4096  ;;  %p4821_p0 = scmp.lt.u32.totalorder %s5117_s20, %s5941_s8 }
  0x26   : > { %p4816_p10 = scmp.ne.s32.totalorder %s5117_s20, %s4815_s14  ;;  %p4822_p1 = scmp.lt.u32.totalorder %s4820_s28, %s4815_s14 }
  0x27   : > { %p4824_p3 = scmp.lt.u32.totalorder %s4815_s14, %s5117_s20 }
  0x28   : > { %p4818_p12 = pnand %p5129_p11, %p4816_p10  ;;  %p4823_p2 = por %p4822_p1, %p4821_p0 }
  0x2a   : > { %p4819_p13 = pneg %p4818_p12  ;;  %p4825_p4 = por %p4824_p3, %p4823_p2 }
  0x2c   : > { %p4826_p5 = pnand %p4825_p4, %p4819_p13 }
  0x2e   : > { %4829 = shalt.err (!%p4826_p5)
}
  0x2f   : > { %s4830_s27 = scalar_lea.vmem %s5121_s24, 4096  ;;  %s4961_s19 = smov [#allocation5]  }
  0x30   : > { %p4831_p6 = scmp.ne.s32.totalorder %s5121_s24, %s4830_s27  ;;  %s4835_s22 = sshll.u32 %s4961_s19, 4  ;;  %s4836_s22 = int_to_ptr.vmem [resolvable:$false] %s4835_s22 }
  0x31   : > { %s4837_s29 = scalar_lea.vmem %s4836_s22, 8192  ;;  %p4838_p12 = scmp.lt.s32.totalorder %s5121_s24, %s4836_s22 }
  0x32   : > { %p4833_p8 = pnand %p4831_p6, %p5129_p11  ;;  %p4839_p7 = scmp.lt.s32.totalorder %s4837_s29, %s4830_s27 }
  0x34   : > { %p4834_p10 = pneg %p4833_p8  ;;  %p4840_p0 = por %p4839_p7, %p4838_p12 }
  0x36   : > { %p4841_p1 = pnand %p4840_p0, %p4834_p10 }
  0x38   : > { %4844 = shalt.err (!%p4841_p1)
}
  0x39   : > { %s4962_s14 = smov 256   ;;  %s4963_s28 = smov 16  }
  0x3a   : > { %4517 = dma.hbm_to_vmem [thread:$0]  (!%p5105_p9), %s5117_s20, 4096, %s5121_s24, %s5123_s15, %s4962_s14, %s4962_s14, %s4963_s28  }
  0x3b   : > { %s5943_s21 = sshll.u32 %s4955_s17, 12  ;;  %s5944_s10 = sld [smem:[#allocation20_spill]] }
  0x3c   : > { %s5945_s29 = sshll.u32 %s5103_s25, 8  ;;  %p3994_p7 = scmp.ge.s32.totalorder %s4959_s18, 1 }
  0x3d   : > { %s553_s8 = scalar_lea.vmem [#allocation7], %s5945_s29  ;;  %p586_p13 = scmp.lt.s32.totalorder %s4959_s18, 3 }
  0x3e   : > { %s560_s0 = sshll.u32 %s553_s8, 4  ;;  %s3985_s12 = sshll.u32 %s5103_s25, 6  ;;  %s5162_s0 = int_to_ptr.vmem [resolvable:$true] %s560_s0 }
  0x3f   : > { %p5166_p2 = pnand %p3994_p7, %p586_p13  ;;  %s4142_s20 = sshll.u32 %s4955_s17, 10 }
  0x40   : > { %s5947_s4 = sld [smem:[#allocation18_spill]]  ;;  %s486_s8 = scalar_lea.vmem [#allocation3], %s3985_s12 }
  0x41   : > { %s5158_s22 = scalar_lea.hbm %s5944_s10, %s5943_s21  ;;  %s493_s21 = sshll.u32 %s486_s8, 4  ;;  %s5177_s21 = int_to_ptr.vmem [resolvable:$true] %s493_s21 }
  0x42   : > { %s5946_s13 = scalar_select %p5166_p2, 1, 0 }
  0x43   : > { %s483_s27 = scalar_lea.sflag [#allocation4], %s5103_s25 }
  0x46   : > { %s5175_s28 = scalar_lea.hbm %s5947_s4, %s4142_s20  ;;  %s4850_s24 = scalar_lea.hbm %s5947_s4, 2048 }
  0x47   : > { %s4845_s19 = scalar_lea.hbm %s5175_s28, 1024  ;;  %p4851_p6 = scmp.lt.u32.totalorder %s5175_s28, %s5947_s4 }
  0x48   : > { %p4846_p3 = scmp.ne.s32.totalorder %s5175_s28, %s4845_s19  ;;  %p4852_p8 = scmp.lt.u32.totalorder %s4850_s24, %s4845_s19 }
  0x49   : > { %p4854_p12 = scmp.lt.u32.totalorder %s4845_s19, %s5175_s28 }
  0x4a   : > { %p4848_p4 = pnand %p4846_p3, %p5129_p11  ;;  %p4853_p10 = por %p4852_p8, %p4851_p6 }
  0x4c   : > { %p4849_p5 = pneg %p4848_p4  ;;  %p4855_p0 = por %p4854_p12, %p4853_p10 }
  0x4e   : > { %p4856_p1 = pnand %p4855_p0, %p4849_p5 }
  0x50   : > { %4859 = shalt.err (!%p4856_p1)
}
  0x51   : > { %s4860_s12 = scalar_lea.vmem %s5177_s21, 1024  ;;  %s4964_s17 = smov [#allocation3]  }
  0x52   : > { %p4861_p7 = scmp.ne.s32.totalorder %s5177_s21, %s4860_s12  ;;  %s4865_s8 = sshll.u32 %s4964_s17, 4  ;;  %s4866_s8 = int_to_ptr.vmem [resolvable:$false] %s4865_s8 }
  0x53   : > { %s4867_s29 = scalar_lea.vmem %s4866_s8, 2048  ;;  %p4868_p4 = scmp.lt.s32.totalorder %s5177_s21, %s4866_s8 }
  0x54   : > { %p4863_p13 = pnand %p4861_p7, %p5129_p11  ;;  %p4869_p2 = scmp.lt.s32.totalorder %s4867_s29, %s4860_s12 }
  0x56   : > { %p4864_p3 = pneg %p4863_p13  ;;  %p4870_p6 = por %p4869_p2, %p4868_p4 }
  0x58   : > { %p4871_p8 = pnand %p4870_p6, %p4864_p3 }
  0x5a   : > { %4874 = shalt.err (!%p4871_p8)
}
  0x5b   : > { %s4965_s19 = smov 64   ;;  %s4966_s24 = smov 4  }
  0x5c   : > { %4514 = dma.hbm_to_vmem [thread:$0]  (!%p5105_p9), %s5175_s28, 1024, %s5177_s21, %s483_s27, %s4965_s19, %s4965_s19, %s4966_s24  }
  0x5d   : > { %s4875_s20 = scalar_lea.hbm %s5158_s22, 4096  ;;  %s4880_s17 = scalar_lea.hbm %s5944_s10, 8192 }
  0x5e   : > { %p4876_p2 = scmp.ne.s32.totalorder %s5158_s22, %s4875_s20  ;;  %p4881_p12 = scmp.lt.u32.totalorder %s5158_s22, %s5944_s10 }
  0x5f   : > { %p4882_p0 = scmp.lt.u32.totalorder %s4880_s17, %s4875_s20  ;;  %p4884_p7 = scmp.lt.u32.totalorder %s4875_s20, %s5158_s22 }
  0x60   : > { %p4878_p5 = pnand %p4876_p2, %p5129_p11 }
  0x61   : > { %p4883_p1 = por %p4882_p0, %p4881_p12 }
  0x62   : > { %p4879_p10 = pneg %p4878_p5 }
  0x63   : > { %p4885_p13 = por %p4884_p7, %p4883_p1 }
  0x65   : > { %p4886_p3 = pnand %p4885_p13, %p4879_p10 }
  0x67   : > { %4889 = shalt.err (!%p4886_p3)
}
  0x68   : > { %s4890_s25 = scalar_lea.vmem %s5162_s0, 4096  ;;  %s4967_s28 = smov [#allocation7]  }
  0x69   : > { %p4891_p4 = scmp.ne.s32.totalorder %s5162_s0, %s4890_s25  ;;  %s4895_s21 = sshll.u32 %s4967_s28, 4  ;;  %s4896_s21 = int_to_ptr.vmem [resolvable:$false] %s4895_s21 }
  0x6a   : > { %s4897_s27 = scalar_lea.vmem %s4896_s21, 8192  ;;  %p4898_p2 = scmp.lt.s32.totalorder %s5162_s0, %s4896_s21 }
  0x6b   : > { %p4893_p6 = pnand %p4891_p4, %p5129_p11  ;;  %p4899_p5 = scmp.lt.s32.totalorder %s4897_s27, %s4890_s25 }
  0x6d   : > { %p4894_p8 = pneg %p4893_p6  ;;  %p4900_p12 = por %p4899_p5, %p4898_p2 }
  0x6f   : > { %p4901_p0 = pnand %p4900_p12, %p4894_p8 }
  0x71   : > { %4904 = shalt.err (!%p4901_p0)
}
  0x72   : > { %4520 = dma.hbm_to_vmem [thread:$0]  (!%p5105_p9), %s5158_s22, 4096, %s5162_s0, %s5123_s15, %s4965_s19, %s4965_s19, %s4966_s24  }
  0x73   : > { %p5948_p11 = scmp.ne.s32.totalorder %s5946_s13, 0 }
  0x74   : > { %s592_s1 = sand.u32 (!%p5948_p11), 1, %s4943_s30   ;;  %p5949_p10 = scmp.ne.s32.totalorder (!%p5948_p11), %s5938_s23, 0 }
  0x75   : > { %590 = sbr.rel (%p5948_p11) target bundleno = 6390 (0x18f6), region = 76  ;;  %s3995_s20 = sshll.u32 (!%p5948_p11), %s592_s1, 6 }
  0x76   : > { %s593_s14 = scalar_lea.sflag (!%p5948_p11), [#allocation4], %s592_s1  ;;  %s5234_s12 = scalar_lea.vmem (!%p5948_p11), [#allocation3], %s3995_s20 }
  0x7c   : > { %4930 = dma.done.wait (%p5949_p10), %s593_s14, 1024  }
  0x7d   : > { %4932 = vsyncadd (%p5949_p10), %s593_s14, 4294966272  ;;  %s5950_s26 = sadd.s32 4294967295, %s4959_s18   ;;  %s3996_s0 = sshll.u32 %s592_s1, 8 }
  0x7e   : > { %s601_s17 = sand.u32 1, %s5950_s26   ;;  %s5242_s13 = scalar_lea.vmem [#allocation5], %s3996_s0 }
  0x7f   : > { %s602_s15 = scalar_lea.sflag [#allocation6], %s601_s17 }
  0x80   : > { %4934 = dma.done.wait (%p5949_p10), %s602_s15, 8192  }
  0x81   : > { %4936 = vsyncadd (%p5949_p10), %s602_s15, 4294959104  ;;  %p720_p9 = scmp.lt.s32.totalorder %s4951_s16, 1  ;;  %s5951_s2 = sld [smem:[#allocation17_spill]] }
  0x82   : > { %s5953_s30 = sld [smem:[#allocation22_spill]]  ;;  %p4000_p1 = scmp.ne.s32.totalorder %s4951_s16, 0 }
  0x83   : > { %s5250_s22 = scalar_select %p720_p9, %s4951_s16, 1 }
  0x85   : > { %s4503_s19 = smul.u32 192, %s5250_s22  ;;  %s3999_s24 = sshll.u32 %s5250_s22, 2 }
  0x86   : > { %s4504_s29 = smul.u32 3, %s5250_s22  ;;  %s5280_s25 = scalar_lea.vmem %s5908_s9, %s3999_s24 }
  0x87   : > { %s5265_s20 = scalar_lea.vmem %s5951_s2, %s4503_s19  ;;  %s744_s19 = scalar_lea.vmem %s5910_s11, %s5250_s22 }
  0x88   : > { %s5274_s10 = scalar_lea.vmem %s5902_s3, %s4504_s29  ;;  %s5952_s2 = sld [smem:[#allocation21_spill]] }
  0x89   : > { %s750_s4 = scalar_lea.vmem %s5953_s30, %s5250_s22  ;;  %s5294_s29 = scalar_lea.vmem [#allocation7], %s3996_s0 }
  0x8a   : > { %761 = sbr.rel (%p4000_p1) target bundleno = 146 (0x92), region = 92  ;;  %s5954_s24 = sld [smem:[#allocation15_spill]] (!%p4000_p1) }
  0x8e   : > { %s747_s14 = scalar_lea.vmem %s5952_s2, %s5250_s22 }
  0x90   : > { %v762_v0 = vld [vmem:[%s5954_s24] sm:$0xff] (!%p4000_p1)  ;;  %v763_v1 = vld [vmem:[%s5954_s24 + $0x8] sm:$0xff] (!%p4000_p1) }
  0x91   : > { %764 = vst [vmem:[#allocation2] sm:$0xff] %v762_v0  ;;  %765 = vst [vmem:[#allocation2 + $0x8] sm:$0xff] %v763_v1 }
  0x92 PF: > { %v4619_v2 = vld [vmem:[%s5265_s20 + $0x4] ss:$12 sps:$4 sm:$0xff]   ;;  %v4621_v3 = vld [vmem:[%s5265_s20] ss:$12 sps:$4 sm:$0xff]   ;;  %v4968_v4 = vmov 0   ;;  %v4969_v5 = vmov 0.0   ;;  %v803_v31 = vlaneseq  ;;  %s5957_s17 = scalar_lea.vmem %s5904_s5, %s5250_s22 }
  0x93   : > { %978 = vmatprep.mubr.bf16.mxu0 %v4968_v4  ;;  %4271 = vmatprep.subr.bf16.mxu1 %v4969_v5  ;;  %v4622_v6 = vld [vmem:[%s5265_s20 + $0x1c] ss:$12 sps:$4 sm:$0xff]   ;;  %v4624_v7 = vld [vmem:[%s5265_s20 + $0x18] ss:$12 sps:$4 sm:$0xff]   ;;  %v4625_v8 = vld [vmem:[%s5265_s20 + $0x34] ss:$12 sps:$4 sm:$0xff]  }
  0x94   : > { %946 = vmatprep.subr.bf16.mxu0 %v4619_v2  ;;  %v4627_v9 = vld [vmem:[%s5265_s20 + $0x30] ss:$12 sps:$4 sm:$0xff]   ;;  %v4628_v10 = vld [vmem:[%s5265_s20 + $0x4c] ss:$12 sps:$4 sm:$0xff]   ;;  %v4630_v11 = vld [vmem:[%s5265_s20 + $0x48] ss:$12 sps:$4 sm:$0xff]  }
  0x95   : > { %947 = vmatpush1.bf16.msra.mxu0 %v4621_v3  ;;  %v4631_v12 = vld [vmem:[%s5265_s20 + $0x64] ss:$12 sps:$4 sm:$0xff]   ;;  %v4643_v13 = vld [vmem:[%s5265_s20 + $0x8] ss:$12 sps:$4 sm:$0xff]   ;;  %v4644_v14 = vld [vmem:[%s5265_s20 + $0x20] ss:$12 sps:$4 sm:$0xff]  }
  0x96   : > { %948 = vmatprep.subr.bf16.mxu0 %v4622_v6  ;;  %4272 = vmatpush3.bf16.msra.mxu1 %v4643_v13  ;;  %v4633_v15 = vld [vmem:[%s5265_s20 + $0x60] ss:$12 sps:$4 sm:$0xff]   ;;  %v4634_v16 = vld [vmem:[%s5265_s20 + $0x7c] ss:$12 sps:$4 sm:$0xff]   ;;  %v4645_v17 = vld [vmem:[%s5265_s20 + $0x38] ss:$12 sps:$4 sm:$0xff]  }
  0x97   : > { %4273 = vmatprep.subr.bf16.mxu1 %v4969_v5  ;;  %v4636_v18 = vld [vmem:[%s5265_s20 + $0x78] ss:$12 sps:$4 sm:$0xff]   ;;  %v4637_v19 = vld [vmem:[%s5265_s20 + $0x94] ss:$12 sps:$4 sm:$0xff]   ;;  %v4646_v20 = vld [vmem:[%s5265_s20 + $0x50] ss:$12 sps:$4 sm:$0xff]  }
  0x98   : > { %v4639_v21 = vld [vmem:[%s5265_s20 + $0x90] ss:$12 sps:$4 sm:$0xff]   ;;  %v4640_v22 = vld [vmem:[%s5265_s20 + $0xac] ss:$12 sps:$4 sm:$0xff]   ;;  %v4647_v23 = vld [vmem:[%s5265_s20 + $0x68] ss:$12 sps:$4 sm:$0xff]  }
  0x99   : > { %949 = vmatpush1.bf16.msra.mxu0 %v4624_v7  ;;  %v4642_v24 = vld [vmem:[%s5265_s20 + $0xa8] ss:$12 sps:$4 sm:$0xff]   ;;  %v766_v25 = vld [vmem:[#allocation2] sm:$0xff]  ;;  %v4650_v30 = vld [vmem:[%s5265_s20 + $0xb0] ss:$12 sps:$4 sm:$0xff]   ;;  %vm4970_vm0 = vmmov 0  }
  0x9a   : > { %950 = vmatprep.subr.bf16.mxu0 %v4625_v8  ;;  %4274 = vmatpush3.bf16.msra.mxu1 %v4644_v14  ;;  %v767_v26 = vld [vmem:[#allocation2 + $0x8] sm:$0xff]  ;;  %v4649_v29 = vld [vmem:[%s5265_s20 + $0x98] ss:$12 sps:$4 sm:$0xff]   ;;  %v5344_v32 = vshrl.u32 %v803_v31, 7  ;;  %v801_v34 = vld [vmem:[%s5274_s10] sm:$0x7] }
  0x9b   : > { %4275 = vmatprep.subr.bf16.mxu1 %v4969_v5  ;;  %v4648_v27 = vld [vmem:[%s5265_s20 + $0x80] ss:$12 sps:$4 sm:$0xff]   ;;  %v768_v28 = vpack.c.bf16 %v767_v26, %v766_v25  ;;  %4287 = vmatprep.mubr.msk.bf16.mxu1 %vm4970_vm0, %v4969_v5  ;;  %vm1050_vm1 = vcmask 130048   ;;  %vm1171_vm2 = vcmask 1043456   ;;  %s5955_s30 = sld [smem:[#allocation16_spill]]  ;;  %vm1143_vm3 = vcmask 64512  }
  0x9c   : > { %v809_v33 = vsub.s32 1, %v5344_v32  ;;  %v805_v36 = vsub.s32 0, %v5344_v32  ;;  %v813_v52 = vsub.s32 2, %v5344_v32  ;;  %s4971_s28 = smov 112   ;;  %s4972_s27 = smov 96   ;;  %vm2865_vm4 = vcmask 261120  }
  0x9d   : > { %951 = vmatpush1.bf16.msra.mxu0 %v4627_v9  ;;  %s4973_s1 = smov 80   ;;  %s4974_s26 = smov 64   ;;  %vm2868_vm5 = vcmask 392192   ;;  %vm2871_vm6 = vcmask 523264   ;;  %vm2874_vm7 = vcmask 654336   ;;  %vm2877_vm8 = vcmask 785408  }
  0x9e   : > { %952 = vmatprep.subr.bf16.mxu0 %v4628_v10  ;;  %4276 = vmatpush3.bf16.msra.mxu1 %v4645_v17  ;;  %v810_v35 = vrot.slane %v801_v34, %v809_v33  ;;  %v806_v42 = vrot.slane %v801_v34, %v805_v36  ;;  %v814_v53 = vrot.slane %v801_v34, %v813_v52  ;;  %s4975_s23 = smov 48   ;;  %s4976_s15 = smov 32   ;;  %vm2880_vm9 = vcmask 916480  }
  0x9f   : > { %4277 = vmatprep.subr.bf16.mxu1 %v4969_v5  ;;  %s4977_s8 = smov 16   ;;  %p4137_p7 = scmp.ne.s32.totalorder %s4951_s16, 1 }
  0xa1   : > { %953 = vmatpush1.bf16.msra.mxu0 %v4630_v11  ;;  %s5956_s0 = smov %s5955_s30  ;;  %v5386_v62 = vld [vmem:[%s5955_s30] ss:$0 sm:$0xff] }
  0xa2   : > { %954 = vmatprep.subr.bf16.mxu0 %v4631_v12  ;;  %4278 = vmatpush3.bf16.msra.mxu1 %v4646_v20  ;;  %v5393_v7 = vld [vmem:[%s5956_s0 + $0x1] ss:$0 sm:$0xff] }
  0xa3   : > { %4279 = vmatprep.subr.bf16.mxu1 %v4969_v5 }
  0xa5   : > { %955 = vmatpush1.bf16.msra.mxu0 %v4633_v15 }
  0xa6   : > { %956 = vmatprep.subr.bf16.mxu0 %v4634_v16  ;;  %4280 = vmatpush3.bf16.msra.mxu1 %v4647_v23 }
  0xa7   : > { %4281 = vmatprep.subr.bf16.mxu1 %v4969_v5 }
  0xa9   : > { %957 = vmatpush1.bf16.msra.mxu0 %v4636_v18 }
  0xaa   : > { %958 = vmatprep.subr.bf16.mxu0 %v4637_v19  ;;  %4282 = vmatpush3.bf16.msra.mxu1 %v4648_v27 }
  0xab   : > { %4283 = vmatprep.subr.bf16.mxu1 %v4969_v5 }
  0xad   : > { %959 = vmatpush1.bf16.msra.mxu0 %v4639_v21 }
  0xae   : > { %960 = vmatprep.subr.bf16.mxu0 %v4640_v22  ;;  %4284 = vmatpush3.bf16.msra.mxu1 %v4649_v29 }
  0xaf   : > { %4285 = vmatprep.subr.bf16.mxu1 %v4969_v5 }
  0xb1   : > { %961 = vmatpush1.bf16.msra.mxu0 %v4642_v24 }
  0xb2   : > { %4315 = vmatprep.subr.bf16.mxu0 %v4969_v5  ;;  %4286 = vmatpush3.bf16.msra.mxu1 %v4650_v30 }
  0xb3   : > { %4291 = vmatprep.subr.bf16.mxu1 %v4969_v5 }
  0xb4   : > { %979 = vmatmul.mubr.bf16.vlgmr.msra.gmra.mrb[0].mxu0 %v768_v28 }
  0xb5   : > { %4317 = vmatprep.mubr.msk.bf16.mxu0 %vm4970_vm0, %v4969_v5  ;;  %4288 = vmatmul.mubr.bf16.vlgmr.msra.gmra.mrb[0].mxu1 %v768_v28 }
  0xb6   : > { %4293 = vmatprep.mubr.msk.bf16.mxu1 %vm4970_vm0, %v4969_v5 }
 0x187   : > { %v980_v37 = vpop.f32.mrb[0].mxu0 }
 0x188   : > { %v982_v38 = vpop.f32.mrb[1].mxu0  ;;  %v981_v46 = vadd.f32 %v980_v37, %v806_v42  ;;  %v1023_v54 = vpop.f32.mrb[0].mxu1 }
 0x189   : > { %v983_v39 = vadd.f32 %v982_v38, %v810_v35  ;;  %v984_v40 = vpop.f32.mrb[2].mxu0  ;;  %v1024_v55 = vadd.f32 %v1023_v54, %v814_v53  ;;  %v4289_v56 = vpop.f32.mrb[1].mxu1 }
 0x18a   : > { %v986_v41 = vpop.f32.mrb[3].mxu0  ;;  %v5360_v48 = vpack.c.bf16 %v981_v46, %v981_v46  ;;  %v985_v50 = vadd.f32 %v984_v40, %v806_v42  ;;  %v1026_v57 = vpop.f32.mrb[2].mxu1 }
 0x18b   : > { %v5353_v43 = vpack.c.bf16 %v983_v39, %v983_v39  ;;  %v987_v44 = vadd.f32 %v986_v41, %v810_v35  ;;  %v5378_v58 = vpack.c.bf16 %v1024_v55, %v1024_v55  ;;  %v1027_v59 = vadd.f32 %v1026_v57, %v814_v53  ;;  %v4290_v60 = vpop.f32.mrb[3].mxu1 }
 0x18c   : > { %v5369_v51 = vpack.c.bf16 %v985_v50, %v985_v50 }
 0x18d   : > { %v1055_v45 = vsel %vm1050_vm1, %v5353_v43, 0  ;;  %v5358_v47 = vpack.c.bf16 %v987_v44, %v987_v44  ;;  %v1173_v61 = vsel %vm1171_vm2, %v5378_v58, 0  ;;  %v5409_v28 = vpack.c.bf16 %v1027_v59, %v1027_v59 }
 0x18e   : > { %4292 = vmatpush3.bf16.xpose.msra.mxu1 %v1055_v45 }
 0x18f   : > { %4297 = vmatprep.subr.bf16.mxu1 %v4969_v5  ;;  %v1101_v49 = vsel %vm1050_vm1, %v5358_v47, 0  ;;  %v1219_v31 = vsel %vm1171_vm2, %v5409_v28, 0 }
 0x195   : > { %4294 = vmatmul.mubr.msk.bf16.vlgmr.msra.gmra.mrb[4].mxu1 %vm1050_vm1, %v5360_v48 }
 0x196   : > { %4298 = vmatpush3.bf16.xpose.msra.mxu1 %v1101_v49  ;;  %4299 = vmatprep.mubr.msk.bf16.mxu1 %vm4970_vm0, %v4969_v5 }
 0x197   : > { %4303 = vmatprep.subr.bf16.mxu1 %v4969_v5 }
 0x19d   : > { %4300 = vmatmul.mubr.msk.bf16.vlgmr.msra.gmra.mrb[8].mxu1 %vm1050_vm1, %v5369_v51 }
 0x19e   : > { %4305 = vmatprep.mubr.msk.bf16.mxu1 %vm4970_vm0, %v4969_v5  ;;  %4304 = vmatpush3.bf16.msra.mxu1 %v1173_v61 }
 0x19f   : > { %4309 = vmatprep.subr.bf16.mxu1 %v4969_v5 }
 0x268   : > { %v1091_v63 = vpop.f32.mrb[4].mxu1 }
 0x269   : > { %v1092_v0 = vadd.f32 %v5386_v62, %v1091_v63  ;;  %v4295_v1 = vpop.f32.mrb[5].mxu1 }
 0x26a   : > { %v1094_v2 = vpop.f32.mrb[6].mxu1 }
 0x26b   : > { %v4296_v3 = vpop.f32.mrb[7].mxu1  ;;  %v1144_v6 = vsel %vm1143_vm3, %v1092_v0, -inf }
 0x26c   : > { %1145 = vmax.xlane.f32.xlu0 %v1144_v6 }
 0x270   : > { %v1137_v8 = vpop.f32.mrb[8].mxu1 }
 0x271   : > { %v1138_v9 = vadd.f32 %v5393_v7, %v1137_v8  ;;  %v4301_v10 = vpop.f32.mrb[9].mxu1 }
 0x272   : > { %v1140_v11 = vpop.f32.mrb[10].mxu1 }
 0x273   : > { %v4302_v12 = vpop.f32.mrb[11].mxu1  ;;  %v1147_v13 = vsel %vm1143_vm3, %v1138_v9, -inf }
 0x274   : > { %1148 = vmax.xlane.f32.xlu0 %v1147_v13 }
 0x28a   : > { %1265 = vrot.lane.b32.xlu0 %v5353_v43, %s4971_s28 }
 0x2f9   : > { %v1146_v14 = vpop.xlane.xlu0 %1145 }
 0x2fa   : > { %v1150_v15 = vsub.f32 %v1092_v0, %v1146_v14 }
 0x2fc   : > { %v1152_v16 = vmul.f32 1.442695, %v1150_v15 }
 0x2fe   : > { %4739 = vpow2.f32 %v1152_v16 }
 0x301   : > { %v1149_v17 = vpop.xlane.xlu0 %1148 }
 0x302   : > { %v1151_v22 = vsub.f32 %v1138_v9, %v1149_v17 }
 0x304   : > { %v1154_v23 = vmul.f32 1.442695, %v1151_v22 }
 0x305   : > { %v1266_v18 = vpop.permute.xlu0 %1265 }
 0x306   : > { %v1271_v19 = vsel %vm1050_vm1, %v1266_v18, 0  ;;  %4741 = vpow2.f32 %v1154_v23 }
 0x307   : > { %4316 = vmatpush3.bf16.xpose.msra.mxu0 %v1271_v19 }
 0x308   : > { %v4740_v20 = vpop.eup %4739  ;;  %4327 = vmatprep.subr.bf16.mxu0 %v4969_v5 }
 0x309   : > { %v1156_v21 = vsel %vm1143_vm3, %v4740_v20, 0.0 }
 0x30a   : > { %1157 = vadd.xlane.f32.xlu1 %v1156_v21 }
 0x310   : > { %v4742_v24 = vpop.eup %4741 }
 0x311   : > { %v1159_v25 = vsel %vm1143_vm3, %v4742_v24, 0.0 }
 0x31b   : > { %1317 = vrot.lane.b32.xlu1 %v5358_v47, %s4971_s28 }
 0x33f   : > { %1160 = vadd.xlane.f32.xlu1 %v1159_v25 }
 0x350   : > { %1262 = vrot.lane.b32.xlu1 %v5360_v48, %s4971_s28 }
 0x354   : > { %1314 = vrot.lane.b32.xlu1 %v5369_v51, %s4971_s28 }
 0x397   : > { %v1158_v26 = vpop.xlane.xlu1 %1157 }
 0x398   : > { %4743 = vrcp.f32 %v1158_v26 }
 0x39b   : > { %v1318_v34 = vpop.permute.xlu1 %1317 }
 0x39c   : > { %v1323_v41 = vsel %vm1050_vm1, %v1318_v34, 0 }
 0x3a2   : > { %v4744_v27 = vpop.eup %4743 }
 0x3a3   : > { %v1164_v29 = vmul.f32 %v4744_v27, %v4740_v20 }
 0x3a5   : > { %v1166_v30 = vpack.c.bf16 %v1164_v29, %v1164_v29 }
 0x3a7   : > { %4306 = vmatmul.mubr.msk.bf16.vlgmr.msra.gmra.mrb[12].mxu1 %vm1143_vm3, %v1166_v30 }
 0x3a8   : > { %4310 = vmatpush3.bf16.msra.mxu1 %v1219_v31  ;;  %4311 = vmatprep.mubr.msk.bf16.mxu1 %vm4970_vm0, %v4969_v5 }
 0x3a9   : > { %4321 = vmatprep.subr.bf16.mxu1 %v4969_v5 }
 0x3cc   : > { %v1161_v35 = vpop.xlane.xlu1 %1160 }
 0x3cd   : > { %4745 = vrcp.f32 %v1161_v35 }
 0x3d0   : > { %v1263_v37 = vpop.permute.xlu1 %1262 }
 0x3d1   : > { %4318 = vmatmul.mubr.msk.bf16.vlgmr.msra.gmra.mrb[4].mxu0 %vm1050_vm1, %v1263_v37 }
 0x3d2   : > { %4329 = vmatprep.mubr.msk.bf16.mxu0 %vm4970_vm0, %v4969_v5 }
 0x3d4   : > { %v1315_v42 = vpop.permute.xlu1 %1314 }
 0x3d7   : > { %v4746_v38 = vpop.eup %4745 }
 0x3d8   : > { %v1165_v39 = vmul.f32 %v4746_v38, %v4742_v24 }
 0x3da   : > { %v1167_v40 = vpack.c.bf16 %v1165_v39, %v1165_v39 }
 0x3dc   : > { %4312 = vmatmul.mubr.msk.bf16.vlgmr.msra.gmra.mrb[16].mxu1 %vm1143_vm3, %v1167_v40 }
 0x3dd   : > { %4322 = vmatpush3.bf16.xpose.msra.mxu1 %v1323_v41  ;;  %4323 = vmatprep.mubr.msk.bf16.mxu1 %vm4970_vm0, %v4969_v5 }
 0x3de   : > { %4333 = vmatprep.subr.bf16.mxu1 %v4969_v5 }
 0x3e4   : > { %4324 = vmatmul.mubr.msk.bf16.vlgmr.msra.gmra.mrb[20].mxu1 %vm1050_vm1, %v1315_v42 }
 0x3e5   : > { %4335 = vmatprep.mubr.msk.bf16.mxu1 %vm4970_vm0, %v4969_v5 }
 0x47a   : > { %v5428_v44 = vpop.f32.mrb[12].mxu1 }
 0x47b   : > { %v4307_v45 = vpop.f32.mrb[13].mxu1 }
 0x47c   : > { %v1212_v46 = vpop.f32.mrb[14].mxu1 }
 0x47d   : > { %v4308_v49 = vpop.f32.mrb[15].mxu1 }
 0x4a4   : > { %v1307_v50 = vpop.f32.mrb[4].mxu0 }
 0x4a5   : > { %v1308_v53 = vadd.f32 %v5386_v62, %v1307_v50  ;;  %v4319_v54 = vpop.f32.mrb[5].mxu0 }
 0x4a6   : > { %v1310_v55 = vpop.f32.mrb[6].mxu0 }
 0x4a7   : > { %v4320_v56 = vpop.f32.mrb[7].mxu0  ;;  %v1365_v57 = vsel %vm1143_vm3, %v1308_v53, -inf }
 0x4a8   : > { %1366 = vmax.xlane.f32.xlu0 %v1365_v57 }
 0x4af   : > { %v5432_v59 = vpop.f32.mrb[16].mxu1 }
 0x4b0   : > { %v4313_v60 = vpop.f32.mrb[17].mxu1 }
 0x4b1   : > { %v1258_v61 = vpop.f32.mrb[18].mxu1 }
 0x4b2   : > { %v4314_v63 = vpop.f32.mrb[19].mxu1 }
 0x4b7   : > { %v1359_v0 = vpop.f32.mrb[20].mxu1 }
 0x4b8   : > { %v1360_v1 = vadd.f32 %v5393_v7, %v1359_v0  ;;  %v4325_v2 = vpop.f32.mrb[21].mxu1 }
 0x4b9   : > { %v1362_v3 = vpop.f32.mrb[22].mxu1 }
 0x4ba   : > { %v4326_v6 = vpop.f32.mrb[23].mxu1  ;;  %v1368_v8 = vsel %vm1143_vm3, %v1360_v1, -inf }
 0x4bb   : > { %1369 = vmax.xlane.f32.xlu1 %v1368_v8 }
 0x4cc   : > { %1439 = vrot.lane.b32.xlu1 %v5409_v28, %s4971_s28 }
 0x4d0   : > { %1489 = vrot.lane.b32.xlu1 %v5353_v43, %s4972_s27 }
 0x4d4   : > { %1539 = vrot.lane.b32.xlu1 %v5358_v47, %s4972_s27 }
 0x4d8   : > { %1537 = vrot.lane.b32.xlu1 %v5369_v51, %s4972_s27 }
 0x535   : > { %v1367_v9 = vpop.xlane.xlu0 %1366 }
 0x536   : > { %v1371_v10 = vsub.f32 %v1308_v53, %v1367_v9 }
 0x538   : > { %v1373_v11 = vmul.f32 1.442695, %v1371_v10 }
 0x53a   : > { %4747 = vpow2.f32 %v1373_v11 }
 0x544   : > { %v4748_v12 = vpop.eup %4747 }
 0x545   : > { %v1377_v13 = vsel %vm1143_vm3, %v4748_v12, 0.0 }
 0x546   : > { %1378 = vadd.xlane.f32.xlu0 %v1377_v13 }
 0x548   : > { %v1370_v14 = vpop.xlane.xlu1 %1369 }
 0x549   : > { %v1372_v15 = vsub.f32 %v1360_v1, %v1370_v14 }
 0x54b   : > { %v1375_v16 = vmul.f32 1.442695, %v1372_v15 }
 0x54c   : > { %v1440_v17 = vpop.permute.xlu1 %1439 }
 0x54d   : > { %4749 = vpow2.f32 %v1375_v16  ;;  %v1445_v18 = vsel %vm1171_vm2, %v1440_v17, 0 }
 0x54e   : > { %4334 = vmatpush3.bf16.msra.mxu1 %v1445_v18 }
 0x54f   : > { %4345 = vmatprep.subr.bf16.mxu1 %v4969_v5 }
 0x550   : > { %v1490_v27 = vpop.permute.xlu1 %1489 }
 0x551   : > { %v1495_v35 = vsel %vm1050_vm1, %v1490_v27, 0 }
 0x554   : > { %v1540_v34 = vpop.permute.xlu1 %1539 }
 0x555   : > { %v1545_v38 = vsel %vm1050_vm1, %v1540_v34, 0 }
 0x557   : > { %v4750_v19 = vpop.eup %4749 }
 0x558   : > { %v1380_v20 = vsel %vm1143_vm3, %v4750_v19, 0.0  ;;  %v1538_v40 = vpop.permute.xlu1 %1537 }
 0x559   : > { %1381 = vadd.xlane.f32.xlu0 %v1380_v20 }
 0x56f   : > { %1390 = vrot.lane.b32.xlu0 %v5378_v58, %s4971_s28 }
 0x573   : > { %1487 = vrot.lane.b32.xlu0 %v5360_v48, %s4972_s27 }
 0x5d3   : > { %v1379_v21 = vpop.xlane.xlu0 %1378 }
 0x5d4   : > { %4751 = vrcp.f32 %v1379_v21 }
 0x5de   : > { %v4752_v22 = vpop.eup %4751 }
 0x5df   : > { %v1385_v24 = vmul.f32 %v4752_v22, %v4748_v12 }
 0x5e1   : > { %v1387_v29 = vpack.c.bf16 %v1385_v24, %v1385_v24 }
 0x5e6   : > { %v1382_v23 = vpop.xlane.xlu0 %1381 }
 0x5e7   : > { %4753 = vrcp.f32 %v1382_v23 }
 0x5ea   : > { %v1391_v25 = vpop.permute.xlu0 %1390 }
 0x5eb   : > { %v1396_v26 = vsel %vm1171_vm2, %v1391_v25, 0 }
 0x5ec   : > { %4328 = vmatpush3.bf16.msra.mxu0 %v1396_v26 }
 0x5ed   : > { %4339 = vmatprep.subr.bf16.mxu0 %v4969_v5 }
 0x5ee   : > { %v1488_v39 = vpop.permute.xlu0 %1487 }
 0x5ef   : > { %4330 = vmatmul.mubr.msk.bf16.vlgmr.msra.gmra.mrb[8].mxu0 %vm1143_vm3, %v1387_v29 }
 0x5f0   : > { %4341 = vmatprep.mubr.msk.bf16.mxu0 %vm4970_vm0, %v4969_v5 }
 0x5f1   : > { %v4754_v30 = vpop.eup %4753 }
 0x5f2   : > { %v1386_v31 = vmul.f32 %v4754_v30, %v4750_v19 }
 0x5f4   : > { %v1388_v37 = vpack.c.bf16 %v1386_v31, %v1386_v31 }
 0x5f5   : > { %4340 = vmatpush3.bf16.xpose.msra.mxu0 %v1495_v35 }
 0x5f6   : > { %4336 = vmatmul.mubr.msk.bf16.vlgmr.msra.gmra.mrb[24].mxu1 %vm1143_vm3, %v1388_v37  ;;  %4351 = vmatprep.subr.bf16.mxu0 %v4969_v5 }
 0x5f7   : > { %4346 = vmatpush3.bf16.xpose.msra.mxu1 %v1545_v38  ;;  %4347 = vmatprep.mubr.msk.bf16.mxu1 %vm4970_vm0, %v4969_v5 }
 0x5f8   : > { %4357 = vmatprep.subr.bf16.mxu1 %v4969_v5 }
 0x5fc   : > { %4342 = vmatmul.mubr.msk.bf16.vlgmr.msra.gmra.mrb[12].mxu0 %vm1050_vm1, %v1488_v39 }
 0x5fd   : > { %4353 = vmatprep.mubr.msk.bf16.mxu0 %vm4970_vm0, %v4969_v5 }
 0x5fe   : > { %4348 = vmatmul.mubr.msk.bf16.vlgmr.msra.gmra.mrb[28].mxu1 %vm1050_vm1, %v1538_v40 }
 0x5ff   : > { %4359 = vmatprep.mubr.msk.bf16.mxu1 %vm4970_vm0, %v4969_v5 }
 0x6c2   : > { %v5470_v41 = vpop.f32.mrb[8].mxu0 }
 0x6c3   : > { %v4331_v42 = vpop.f32.mrb[9].mxu0 }
 0x6c4   : > { %v1435_v45 = vpop.f32.mrb[10].mxu0 }
 0x6c5   : > { %v4332_v46 = vpop.f32.mrb[11].mxu0 }
 0x6c9   : > { %v5472_v49 = vpop.f32.mrb[24].mxu1 }
 0x6ca   : > { %v4584_v50 = vpack.i.bf16 %v5472_v49, %v5470_v41  ;;  %v4337_v53 = vpop.f32.mrb[25].mxu1 }
 0x6cb   : > { %v1484_v54 = vpop.f32.mrb[26].mxu1 }
 0x6cc   : > { %v4338_v55 = vpop.f32.mrb[27].mxu1 }
 0x6cf   : > { %v1531_v56 = vpop.f32.mrb[12].mxu0 }
 0x6d0   : > { %v1532_v57 = vadd.f32 %v5386_v62, %v1531_v56  ;;  %v4343_v60 = vpop.f32.mrb[13].mxu0 }
 0x6d1   : > { %v1534_v61 = vpop.f32.mrb[14].mxu0  ;;  %v1581_v63 = vpop.f32.mrb[28].mxu1 }
 0x6d2   : > { %v1582_v0 = vadd.f32 %v5393_v7, %v1581_v63  ;;  %v4344_v1 = vpop.f32.mrb[15].mxu0  ;;  %v4349_v2 = vpop.f32.mrb[29].mxu1  ;;  %v1587_v3 = vsel %vm1143_vm3, %v1532_v57, -inf }
 0x6d3   : > { %1588 = vmax.xlane.f32.xlu0 %v1587_v3  ;;  %v1584_v6 = vpop.f32.mrb[30].mxu1 }
 0x6d4   : > { %v4350_v8 = vpop.f32.mrb[31].mxu1  ;;  %v1590_v9 = vsel %vm1143_vm3, %v1582_v0, -inf }
 0x6d5   : > { %1591 = vmax.xlane.f32.xlu1 %v1590_v9 }
 0x6e6   : > { %1659 = vrot.lane.b32.xlu1 %v5409_v28, %s4972_s27 }
 0x6ea   : > { %1709 = vrot.lane.b32.xlu1 %v5353_v43, %s4973_s1 }
 0x6ee   : > { %1759 = vrot.lane.b32.xlu1 %v5358_v47, %s4973_s1 }
 0x6f2   : > { %1757 = vrot.lane.b32.xlu1 %v5369_v51, %s4973_s1 }
 0x760   : > { %v1589_v10 = vpop.xlane.xlu0 %1588 }
 0x761   : > { %v1593_v11 = vsub.f32 %v1532_v57, %v1589_v10 }
 0x762   : > { %v1592_v12 = vpop.xlane.xlu1 %1591 }
 0x763   : > { %v1595_v13 = vmul.f32 1.442695, %v1593_v11  ;;  %v1594_v14 = vsub.f32 %v1582_v0, %v1592_v12 }
 0x765   : > { %4755 = vpow2.f32 %v1595_v13  ;;  %v1597_v15 = vmul.f32 1.442695, %v1594_v14 }
 0x766   : > { %v1660_v16 = vpop.permute.xlu1 %1659 }
 0x767   : > { %4757 = vpow2.f32 %v1597_v15  ;;  %v1665_v17 = vsel %vm1171_vm2, %v1660_v16, 0 }
 0x768   : > { %4358 = vmatpush3.bf16.msra.mxu1 %v1665_v17 }
 0x769   : > { %4369 = vmatprep.subr.bf16.mxu1 %v4969_v5 }
 0x76a   : > { %v1710_v27 = vpop.permute.xlu1 %1709 }
 0x76b   : > { %v1715_v37 = vsel %vm1050_vm1, %v1710_v27, 0 }
 0x76e   : > { %v1760_v35 = vpop.permute.xlu1 %1759 }
 0x76f   : > { %v4756_v18 = vpop.eup %4755  ;;  %v1765_v39 = vsel %vm1050_vm1, %v1760_v35, 0 }
 0x770   : > { %v1599_v19 = vsel %vm1143_vm3, %v4756_v18, 0.0 }
 0x771   : > { %v4758_v20 = vpop.eup %4757  ;;  %1600 = vadd.xlane.f32.xlu0 %v1599_v19 }
 0x772   : > { %v1602_v21 = vsel %vm1143_vm3, %v4758_v20, 0.0  ;;  %v1758_v42 = vpop.permute.xlu1 %1757 }
 0x775   : > { %1603 = vadd.xlane.f32.xlu0 %v1602_v21 }
 0x78b   : > { %1611 = vrot.lane.b32.xlu0 %v5378_v58, %s4972_s27 }
 0x78f   : > { %1707 = vrot.lane.b32.xlu0 %v5360_v48, %s4973_s1 }
 0x7fe   : > { %v1601_v22 = vpop.xlane.xlu0 %1600 }
 0x7ff   : > { %4759 = vrcp.f32 %v1601_v22 }
 0x802   : > { %v1604_v23 = vpop.xlane.xlu0 %1603 }
 0x803   : > { %4761 = vrcp.f32 %v1604_v23 }
 0x806   : > { %v1612_v24 = vpop.permute.xlu0 %1611 }
 0x807   : > { %v1617_v25 = vsel %vm1171_vm2, %v1612_v24, 0 }
 0x808   : > { %4352 = vmatpush3.bf16.msra.mxu0 %v1617_v25 }
 0x809   : > { %v4760_v26 = vpop.eup %4759  ;;  %4363 = vmatprep.subr.bf16.mxu0 %v4969_v5 }
 0x80a   : > { %v1607_v29 = vmul.f32 %v4760_v26, %v4756_v18  ;;  %v1708_v40 = vpop.permute.xlu0 %1707 }
 0x80c   : > { %v1609_v30 = vpack.c.bf16 %v1607_v29, %v1607_v29 }
 0x80d   : > { %v4762_v31 = vpop.eup %4761 }
 0x80e   : > { %v1608_v34 = vmul.f32 %v4762_v31, %v4758_v20  ;;  %4354 = vmatmul.mubr.msk.bf16.vlgmr.msra.gmra.mrb[16].mxu0 %vm1143_vm3, %v1609_v30 }
 0x80f   : > { %4365 = vmatprep.mubr.msk.bf16.mxu0 %vm4970_vm0, %v4969_v5 }
 0x810   : > { %v1610_v38 = vpack.c.bf16 %v1608_v34, %v1608_v34 }
 0x811   : > { %4364 = vmatpush3.bf16.xpose.msra.mxu0 %v1715_v37 }
 0x812   : > { %4360 = vmatmul.mubr.msk.bf16.vlgmr.msra.gmra.mrb[32].mxu1 %vm1143_vm3, %v1610_v38  ;;  %4375 = vmatprep.subr.bf16.mxu0 %v4969_v5 }
 0x813   : > { %4370 = vmatpush3.bf16.xpose.msra.mxu1 %v1765_v39  ;;  %4371 = vmatprep.mubr.msk.bf16.mxu1 %vm4970_vm0, %v4969_v5 }
 0x814   : > { %4381 = vmatprep.subr.bf16.mxu1 %v4969_v5 }
 0x818   : > { %4366 = vmatmul.mubr.msk.bf16.vlgmr.msra.gmra.mrb[20].mxu0 %vm1050_vm1, %v1708_v40 }
 0x819   : > { %4377 = vmatprep.mubr.msk.bf16.mxu0 %vm4970_vm0, %v4969_v5 }
 0x81a   : > { %4372 = vmatmul.mubr.msk.bf16.vlgmr.msra.gmra.mrb[36].mxu1 %vm1050_vm1, %v1758_v42 }
 0x81b   : > { %4383 = vmatprep.mubr.msk.bf16.mxu1 %vm4970_vm0, %v4969_v5 }
 0x8e1   : > { %v5514_v45 = vpop.f32.mrb[16].mxu0 }
 0x8e2   : > { %v4355_v46 = vpop.f32.mrb[17].mxu0 }
 0x8e3   : > { %v1656_v53 = vpop.f32.mrb[18].mxu0 }
 0x8e4   : > { %v4356_v54 = vpop.f32.mrb[19].mxu0 }
 0x8e5   : > { %v5516_v55 = vpop.f32.mrb[32].mxu1 }
 0x8e6   : > { %v4589_v56 = vpack.i.bf16 %v5516_v55, %v5514_v45  ;;  %v4361_v57 = vpop.f32.mrb[33].mxu1 }
 0x8e7   : > { %v1704_v60 = vpop.f32.mrb[34].mxu1 }
 0x8e8   : > { %v4362_v61 = vpop.f32.mrb[35].mxu1 }
 0x8eb   : > { %v1751_v63 = vpop.f32.mrb[20].mxu0 }
 0x8ec   : > { %v1752_v0 = vadd.f32 %v5386_v62, %v1751_v63  ;;  %v4367_v1 = vpop.f32.mrb[21].mxu0 }
 0x8ed   : > { %v1754_v2 = vpop.f32.mrb[22].mxu0  ;;  %v1801_v3 = vpop.f32.mrb[36].mxu1 }
 0x8ee   : > { %v1802_v6 = vadd.f32 %v5393_v7, %v1801_v3  ;;  %v4368_v8 = vpop.f32.mrb[23].mxu0  ;;  %v4373_v9 = vpop.f32.mrb[37].mxu1  ;;  %v1807_v10 = vsel %vm1143_vm3, %v1752_v0, -inf }
 0x8ef   : > { %1808 = vmax.xlane.f32.xlu0 %v1807_v10  ;;  %v1804_v11 = vpop.f32.mrb[38].mxu1 }
 0x8f0   : > { %v4374_v12 = vpop.f32.mrb[39].mxu1  ;;  %v1810_v13 = vsel %vm1143_vm3, %v1802_v6, -inf }
 0x8f1   : > { %1811 = vmax.xlane.f32.xlu1 %v1810_v13 }
 0x902   : > { %1879 = vrot.lane.b32.xlu1 %v5409_v28, %s4973_s1 }
 0x906   : > { %1929 = vrot.lane.b32.xlu1 %v5353_v43, %s4974_s26 }
 0x90a   : > { %1979 = vrot.lane.b32.xlu1 %v5358_v47, %s4974_s26 }
 0x90e   : > { %1977 = vrot.lane.b32.xlu1 %v5369_v51, %s4974_s26 }
 0x97c   : > { %v1809_v14 = vpop.xlane.xlu0 %1808 }
 0x97d   : > { %v1813_v15 = vsub.f32 %v1752_v0, %v1809_v14 }
 0x97e   : > { %v1812_v16 = vpop.xlane.xlu1 %1811 }
 0x97f   : > { %v1815_v17 = vmul.f32 1.442695, %v1813_v15  ;;  %v1814_v18 = vsub.f32 %v1802_v6, %v1812_v16 }
 0x981   : > { %4763 = vpow2.f32 %v1815_v17  ;;  %v1817_v19 = vmul.f32 1.442695, %v1814_v18 }
 0x982   : > { %v1880_v20 = vpop.permute.xlu1 %1879 }
 0x983   : > { %4765 = vpow2.f32 %v1817_v19  ;;  %v1885_v21 = vsel %vm1171_vm2, %v1880_v20, 0 }
 0x984   : > { %4382 = vmatpush3.bf16.msra.mxu1 %v1885_v21 }
 0x985   : > { %4393 = vmatprep.subr.bf16.mxu1 %v4969_v5 }
 0x986   : > { %v1930_v34 = vpop.permute.xlu1 %1929 }
 0x987   : > { %v1935_v42 = vsel %vm1050_vm1, %v1930_v34, 0 }
 0x98a   : > { %v1980_v40 = vpop.permute.xlu1 %1979 }
 0x98b   : > { %v4764_v22 = vpop.eup %4763  ;;  %v1985_v53 = vsel %vm1050_vm1, %v1980_v40, 0 }
 0x98c   : > { %v1819_v23 = vsel %vm1143_vm3, %v4764_v22, 0.0 }
 0x98d   : > { %v4766_v24 = vpop.eup %4765  ;;  %1820 = vadd.xlane.f32.xlu0 %v1819_v23 }
 0x98e   : > { %v1822_v25 = vsel %vm1143_vm3, %v4766_v24, 0.0  ;;  %v1978_v57 = vpop.permute.xlu1 %1977 }
 0x991   : > { %1823 = vadd.xlane.f32.xlu0 %v1822_v25 }
 0x9a7   : > { %1831 = vrot.lane.b32.xlu0 %v5378_v58, %s4973_s1 }
 0x9ab   : > { %1927 = vrot.lane.b32.xlu0 %v5360_v48, %s4974_s26 }
 0xa1a   : > { %v1821_v26 = vpop.xlane.xlu0 %1820 }
 0xa1b   : > { %4767 = vrcp.f32 %v1821_v26 }
 0xa1e   : > { %v1824_v27 = vpop.xlane.xlu0 %1823 }
 0xa1f   : > { %4769 = vrcp.f32 %v1824_v27 }
 0xa22   : > { %v1832_v29 = vpop.permute.xlu0 %1831 }
 0xa23   : > { %v1837_v30 = vsel %vm1171_vm2, %v1832_v29, 0 }
 0xa24   : > { %4376 = vmatpush3.bf16.msra.mxu0 %v1837_v30 }
 0xa25   : > { %v4768_v31 = vpop.eup %4767  ;;  %4387 = vmatprep.subr.bf16.mxu0 %v4969_v5 }
 0xa26   : > { %v1827_v35 = vmul.f32 %v4768_v31, %v4764_v22  ;;  %v1928_v54 = vpop.permute.xlu0 %1927 }
 0xa28   : > { %v1829_v37 = vpack.c.bf16 %v1827_v35, %v1827_v35 }
 0xa29   : > { %v4770_v38 = vpop.eup %4769 }
 0xa2a   : > { %v1828_v39 = vmul.f32 %v4770_v38, %v4766_v24  ;;  %4378 = vmatmul.mubr.msk.bf16.vlgmr.msra.gmra.mrb[24].mxu0 %vm1143_vm3, %v1829_v37 }
 0xa2b   : > { %4389 = vmatprep.mubr.msk.bf16.mxu0 %vm4970_vm0, %v4969_v5 }
 0xa2c   : > { %v1830_v46 = vpack.c.bf16 %v1828_v39, %v1828_v39 }
 0xa2d   : > { %4388 = vmatpush3.bf16.xpose.msra.mxu0 %v1935_v42 }
 0xa2e   : > { %4384 = vmatmul.mubr.msk.bf16.vlgmr.msra.gmra.mrb[40].mxu1 %vm1143_vm3, %v1830_v46  ;;  %4399 = vmatprep.subr.bf16.mxu0 %v4969_v5 }
 0xa2f   : > { %4394 = vmatpush3.bf16.xpose.msra.mxu1 %v1985_v53  ;;  %4395 = vmatprep.mubr.msk.bf16.mxu1 %vm4970_vm0, %v4969_v5 }
 0xa30   : > { %4405 = vmatprep.subr.bf16.mxu1 %v4969_v5 }
 0xa34   : > { %4390 = vmatmul.mubr.msk.bf16.vlgmr.msra.gmra.mrb[28].mxu0 %vm1050_vm1, %v1928_v54 }
 0xa35   : > { %4401 = vmatprep.mubr.msk.bf16.mxu0 %vm4970_vm0, %v4969_v5 }
 0xa36   : > { %4396 = vmatmul.mubr.msk.bf16.vlgmr.msra.gmra.mrb[44].mxu1 %vm1050_vm1, %v1978_v57 }
 0xa37   : > { %4407 = vmatprep.mubr.msk.bf16.mxu1 %vm4970_vm0, %v4969_v5 }
 0xafd   : > { %v5558_v60 = vpop.f32.mrb[24].mxu0 }
 0xafe   : > { %v4379_v61 = vpop.f32.mrb[25].mxu0 }
 0xaff   : > { %v1876_v63 = vpop.f32.mrb[26].mxu0 }
 0xb00   : > { %v4380_v0 = vpop.f32.mrb[27].mxu0 }
 0xb01   : > { %v5560_v1 = vpop.f32.mrb[40].mxu1 }
 0xb02   : > { %v4594_v2 = vpack.i.bf16 %v5560_v1, %v5558_v60  ;;  %v4385_v3 = vpop.f32.mrb[41].mxu1 }
 0xb03   : > { %v1924_v6 = vpop.f32.mrb[42].mxu1 }
 0xb04   : > { %v4386_v8 = vpop.f32.mrb[43].mxu1 }
 0xb07   : > { %v1971_v9 = vpop.f32.mrb[28].mxu0 }
 0xb08   : > { %v1972_v10 = vadd.f32 %v5386_v62, %v1971_v9  ;;  %v4391_v11 = vpop.f32.mrb[29].mxu0 }
 0xb09   : > { %v1974_v12 = vpop.f32.mrb[30].mxu0  ;;  %v2021_v13 = vpop.f32.mrb[44].mxu1 }
 0xb0a   : > { %v2022_v14 = vadd.f32 %v5393_v7, %v2021_v13  ;;  %v4392_v15 = vpop.f32.mrb[31].mxu0  ;;  %v4397_v16 = vpop.f32.mrb[45].mxu1  ;;  %v2027_v17 = vsel %vm1143_vm3, %v1972_v10, -inf }
 0xb0b   : > { %2028 = vmax.xlane.f32.xlu0 %v2027_v17  ;;  %v2024_v18 = vpop.f32.mrb[46].mxu1 }
 0xb0c   : > { %v4398_v19 = vpop.f32.mrb[47].mxu1  ;;  %v2030_v20 = vsel %vm1143_vm3, %v2022_v14, -inf }
 0xb0d   : > { %2031 = vmax.xlane.f32.xlu1 %v2030_v20 }
 0xb1e   : > { %2099 = vrot.lane.b32.xlu1 %v5409_v28, %s4974_s26 }
 0xb22   : > { %2149 = vrot.lane.b32.xlu1 %v5353_v43, %s4975_s23 }
 0xb26   : > { %2199 = vrot.lane.b32.xlu1 %v5358_v47, %s4975_s23 }
 0xb2a   : > { %2197 = vrot.lane.b32.xlu1 %v5369_v51, %s4975_s23 }
 0xb98   : > { %v2029_v21 = vpop.xlane.xlu0 %2028 }
 0xb99   : > { %v2033_v22 = vsub.f32 %v1972_v10, %v2029_v21 }
 0xb9a   : > { %v2032_v23 = vpop.xlane.xlu1 %2031 }
 0xb9b   : > { %v2035_v24 = vmul.f32 1.442695, %v2033_v22  ;;  %v2034_v25 = vsub.f32 %v2022_v14, %v2032_v23 }
 0xb9d   : > { %4771 = vpow2.f32 %v2035_v24  ;;  %v2037_v26 = vmul.f32 1.442695, %v2034_v25 }
 0xb9e   : > { %v2100_v27 = vpop.permute.xlu1 %2099 }
 0xb9f   : > { %4773 = vpow2.f32 %v2037_v26  ;;  %v2105_v29 = vsel %vm1171_vm2, %v2100_v27, 0 }
 0xba0   : > { %4406 = vmatpush3.bf16.msra.mxu1 %v2105_v29 }
 0xba1   : > { %4417 = vmatprep.subr.bf16.mxu1 %v4969_v5 }
 0xba2   : > { %v2150_v46 = vpop.permute.xlu1 %2149 }
 0xba3   : > { %v2155_v0 = vsel %vm1050_vm1, %v2150_v46, 0 }
 0xba6   : > { %v2200_v63 = vpop.permute.xlu1 %2199 }
 0xba7   : > { %v4772_v30 = vpop.eup %4771  ;;  %v2205_v6 = vsel %vm1050_vm1, %v2200_v63, 0 }
 0xba8   : > { %v2039_v31 = vsel %vm1143_vm3, %v4772_v30, 0.0 }
 0xba9   : > { %v4774_v34 = vpop.eup %4773  ;;  %2040 = vadd.xlane.f32.xlu0 %v2039_v31 }
 0xbaa   : > { %v2042_v35 = vsel %vm1143_vm3, %v4774_v34, 0.0  ;;  %v2198_v9 = vpop.permute.xlu1 %2197 }
 0xbad   : > { %2043 = vadd.xlane.f32.xlu0 %v2042_v35 }
 0xbc3   : > { %2051 = vrot.lane.b32.xlu0 %v5378_v58, %s4974_s26 }
 0xbc7   : > { %2147 = vrot.lane.b32.xlu0 %v5360_v48, %s4975_s23 }
 0xc36   : > { %v2041_v37 = vpop.xlane.xlu0 %2040 }
 0xc37   : > { %4775 = vrcp.f32 %v2041_v37 }
 0xc3a   : > { %v2044_v38 = vpop.xlane.xlu0 %2043 }
 0xc3b   : > { %4777 = vrcp.f32 %v2044_v38 }
 0xc3e   : > { %v2052_v39 = vpop.permute.xlu0 %2051 }
 0xc3f   : > { %v2057_v40 = vsel %vm1171_vm2, %v2052_v39, 0 }
 0xc40   : > { %4400 = vmatpush3.bf16.msra.mxu0 %v2057_v40 }
 0xc41   : > { %v4776_v42 = vpop.eup %4775  ;;  %4411 = vmatprep.subr.bf16.mxu0 %v4969_v5 }
 0xc42   : > { %v2047_v53 = vmul.f32 %v4776_v42, %v4772_v30  ;;  %v2148_v8 = vpop.permute.xlu0 %2147 }
 0xc44   : > { %v2049_v54 = vpack.c.bf16 %v2047_v53, %v2047_v53 }
 0xc45   : > { %v4778_v57 = vpop.eup %4777 }
 0xc46   : > { %v2048_v61 = vmul.f32 %v4778_v57, %v4774_v34  ;;  %4402 = vmatmul.mubr.msk.bf16.vlgmr.msra.gmra.mrb[32].mxu0 %vm1143_vm3, %v2049_v54 }
 0xc47   : > { %4413 = vmatprep.mubr.msk.bf16.mxu0 %vm4970_vm0, %v4969_v5 }
 0xc48   : > { %v2050_v3 = vpack.c.bf16 %v2048_v61, %v2048_v61 }
 0xc49   : > { %4412 = vmatpush3.bf16.xpose.msra.mxu0 %v2155_v0 }
 0xc4a   : > { %4408 = vmatmul.mubr.msk.bf16.vlgmr.msra.gmra.mrb[48].mxu1 %vm1143_vm3, %v2050_v3  ;;  %4423 = vmatprep.subr.bf16.mxu0 %v4969_v5 }
 0xc4b   : > { %4418 = vmatpush3.bf16.xpose.msra.mxu1 %v2205_v6  ;;  %4419 = vmatprep.mubr.msk.bf16.mxu1 %vm4970_vm0, %v4969_v5 }
 0xc4c   : > { %4429 = vmatprep.subr.bf16.mxu1 %v4969_v5 }
 0xc50   : > { %4414 = vmatmul.mubr.msk.bf16.vlgmr.msra.gmra.mrb[36].mxu0 %vm1050_vm1, %v2148_v8 }
 0xc51   : > { %4425 = vmatprep.mubr.msk.bf16.mxu0 %vm4970_vm0, %v4969_v5 }
 0xc52   : > { %4420 = vmatmul.mubr.msk.bf16.vlgmr.msra.gmra.mrb[52].mxu1 %vm1050_vm1, %v2198_v9 }
 0xc53   : > { %4431 = vmatprep.mubr.msk.bf16.mxu1 %vm4970_vm0, %v4969_v5 }
 0xd19   : > { %v5602_v10 = vpop.f32.mrb[32].mxu0 }
 0xd1a   : > { %v4403_v11 = vpop.f32.mrb[33].mxu0 }
 0xd1b   : > { %v2096_v12 = vpop.f32.mrb[34].mxu0 }
 0xd1c   : > { %v4404_v13 = vpop.f32.mrb[35].mxu0 }
 0xd1d   : > { %v5604_v14 = vpop.f32.mrb[48].mxu1 }
 0xd1e   : > { %v4599_v15 = vpack.i.bf16 %v5604_v14, %v5602_v10  ;;  %v4409_v16 = vpop.f32.mrb[49].mxu1 }
 0xd1f   : > { %v2144_v17 = vpop.f32.mrb[50].mxu1 }
 0xd20   : > { %v4410_v18 = vpop.f32.mrb[51].mxu1 }
 0xd23   : > { %v2191_v19 = vpop.f32.mrb[36].mxu0 }
 0xd24   : > { %v2192_v20 = vadd.f32 %v5386_v62, %v2191_v19  ;;  %v4415_v21 = vpop.f32.mrb[37].mxu0 }
 0xd25   : > { %v2194_v22 = vpop.f32.mrb[38].mxu0  ;;  %v2241_v23 = vpop.f32.mrb[52].mxu1 }
 0xd26   : > { %v2242_v24 = vadd.f32 %v5393_v7, %v2241_v23  ;;  %v4416_v25 = vpop.f32.mrb[39].mxu0  ;;  %v4421_v26 = vpop.f32.mrb[53].mxu1  ;;  %v2247_v27 = vsel %vm1143_vm3, %v2192_v20, -inf }
 0xd27   : > { %2248 = vmax.xlane.f32.xlu0 %v2247_v27  ;;  %v2244_v29 = vpop.f32.mrb[54].mxu1 }
 0xd28   : > { %v4422_v30 = vpop.f32.mrb[55].mxu1  ;;  %v2250_v31 = vsel %vm1143_vm3, %v2242_v24, -inf }
 0xd29   : > { %2251 = vmax.xlane.f32.xlu1 %v2250_v31 }
 0xd3a   : > { %2319 = vrot.lane.b32.xlu1 %v5409_v28, %s4975_s23 }
 0xd3e   : > { %2369 = vrot.lane.b32.xlu1 %v5353_v43, %s4976_s15 }
 0xd42   : > { %2419 = vrot.lane.b32.xlu1 %v5358_v47, %s4976_s15 }
 0xd46   : > { %2417 = vrot.lane.b32.xlu1 %v5369_v51, %s4976_s15 }
 0xdb4   : > { %v2249_v34 = vpop.xlane.xlu0 %2248 }
 0xdb5   : > { %v2253_v35 = vsub.f32 %v2192_v20, %v2249_v34 }
 0xdb6   : > { %v2252_v37 = vpop.xlane.xlu1 %2251 }
 0xdb7   : > { %v2255_v38 = vmul.f32 1.442695, %v2253_v35  ;;  %v2254_v39 = vsub.f32 %v2242_v24, %v2252_v37 }
 0xdb9   : > { %4779 = vpow2.f32 %v2255_v38  ;;  %v2257_v40 = vmul.f32 1.442695, %v2254_v39 }
 0xdba   : > { %v2320_v42 = vpop.permute.xlu1 %2319 }
 0xdbb   : > { %4781 = vpow2.f32 %v2257_v40  ;;  %v2325_v46 = vsel %vm1171_vm2, %v2320_v42, 0 }
 0xdbc   : > { %4430 = vmatpush3.bf16.msra.mxu1 %v2325_v46 }
 0xdbd   : > { %4441 = vmatprep.subr.bf16.mxu1 %v4969_v5 }
 0xdbe   : > { %v2370_v9 = vpop.permute.xlu1 %2369 }
 0xdbf   : > { %v2375_v18 = vsel %vm1050_vm1, %v2370_v9, 0 }
 0xdc2   : > { %v2420_v17 = vpop.permute.xlu1 %2419 }
 0xdc3   : > { %v4780_v53 = vpop.eup %4779  ;;  %v2425_v20 = vsel %vm1050_vm1, %v2420_v17, 0 }
 0xdc4   : > { %v2259_v54 = vsel %vm1143_vm3, %v4780_v53, 0.0 }
 0xdc5   : > { %v4782_v57 = vpop.eup %4781  ;;  %2260 = vadd.xlane.f32.xlu0 %v2259_v54 }
 0xdc6   : > { %v2262_v61 = vsel %vm1143_vm3, %v4782_v57, 0.0  ;;  %v2418_v22 = vpop.permute.xlu1 %2417 }
 0xdc9   : > { %2263 = vadd.xlane.f32.xlu0 %v2262_v61 }
 0xddf   : > { %2271 = vrot.lane.b32.xlu0 %v5378_v58, %s4975_s23 }
 0xde3   : > { %2367 = vrot.lane.b32.xlu0 %v5360_v48, %s4976_s15 }
 0xe52   : > { %v2261_v63 = vpop.xlane.xlu0 %2260 }
 0xe53   : > { %4783 = vrcp.f32 %v2261_v63 }
 0xe56   : > { %v2264_v0 = vpop.xlane.xlu0 %2263 }
 0xe57   : > { %4785 = vrcp.f32 %v2264_v0 }
 0xe5a   : > { %v2272_v3 = vpop.permute.xlu0 %2271 }
 0xe5b   : > { %v2277_v6 = vsel %vm1171_vm2, %v2272_v3, 0 }
 0xe5c   : > { %4424 = vmatpush3.bf16.msra.mxu0 %v2277_v6 }
 0xe5d   : > { %v4784_v8 = vpop.eup %4783  ;;  %4435 = vmatprep.subr.bf16.mxu0 %v4969_v5 }
 0xe5e   : > { %v2267_v11 = vmul.f32 %v4784_v8, %v4780_v53  ;;  %v2368_v21 = vpop.permute.xlu0 %2367 }
 0xe60   : > { %v2269_v12 = vpack.c.bf16 %v2267_v11, %v2267_v11 }
 0xe61   : > { %v4786_v13 = vpop.eup %4785 }
 0xe62   : > { %v2268_v16 = vmul.f32 %v4786_v13, %v4782_v57  ;;  %4426 = vmatmul.mubr.msk.bf16.vlgmr.msra.gmra.mrb[40].mxu0 %vm1143_vm3, %v2269_v12 }
 0xe63   : > { %4437 = vmatprep.mubr.msk.bf16.mxu0 %vm4970_vm0, %v4969_v5 }
 0xe64   : > { %v2270_v19 = vpack.c.bf16 %v2268_v16, %v2268_v16 }
 0xe65   : > { %4436 = vmatpush3.bf16.xpose.msra.mxu0 %v2375_v18 }
 0xe66   : > { %4432 = vmatmul.mubr.msk.bf16.vlgmr.msra.gmra.mrb[56].mxu1 %vm1143_vm3, %v2270_v19  ;;  %4447 = vmatprep.subr.bf16.mxu0 %v4969_v5 }
 0xe67   : > { %4442 = vmatpush3.bf16.xpose.msra.mxu1 %v2425_v20  ;;  %4443 = vmatprep.mubr.msk.bf16.mxu1 %vm4970_vm0, %v4969_v5 }
 0xe68   : > { %4453 = vmatprep.subr.bf16.mxu1 %v4969_v5 }
 0xe6c   : > { %4438 = vmatmul.mubr.msk.bf16.vlgmr.msra.gmra.mrb[44].mxu0 %vm1050_vm1, %v2368_v21 }
 0xe6d   : > { %4449 = vmatprep.mubr.msk.bf16.mxu0 %vm4970_vm0, %v4969_v5 }
 0xe6e   : > { %4444 = vmatmul.mubr.msk.bf16.vlgmr.msra.gmra.mrb[60].mxu1 %vm1050_vm1, %v2418_v22 }
 0xe6f   : > { %4455 = vmatprep.mubr.msk.bf16.mxu1 %vm4970_vm0, %v4969_v5 }
 0xf35   : > { %v5646_v23 = vpop.f32.mrb[40].mxu0 }
 0xf36   : > { %v4427_v24 = vpop.f32.mrb[41].mxu0 }
 0xf37   : > { %v2316_v25 = vpop.f32.mrb[42].mxu0 }
 0xf38   : > { %v4428_v26 = vpop.f32.mrb[43].mxu0 }
 0xf39   : > { %v5648_v27 = vpop.f32.mrb[56].mxu1 }
 0xf3a   : > { %v4604_v29 = vpack.i.bf16 %v5648_v27, %v5646_v23  ;;  %v4433_v30 = vpop.f32.mrb[57].mxu1 }
 0xf3b   : > { %v2364_v31 = vpop.f32.mrb[58].mxu1 }
 0xf3c   : > { %v4434_v34 = vpop.f32.mrb[59].mxu1 }
 0xf3f   : > { %v2411_v35 = vpop.f32.mrb[44].mxu0 }
 0xf40   : > { %v2412_v37 = vadd.f32 %v5386_v62, %v2411_v35  ;;  %v4439_v38 = vpop.f32.mrb[45].mxu0 }
 0xf41   : > { %v2414_v39 = vpop.f32.mrb[46].mxu0  ;;  %v2461_v40 = vpop.f32.mrb[60].mxu1 }
 0xf42   : > { %v2462_v42 = vadd.f32 %v5393_v7, %v2461_v40  ;;  %v4440_v46 = vpop.f32.mrb[47].mxu0  ;;  %v4445_v53 = vpop.f32.mrb[61].mxu1  ;;  %v2467_v54 = vsel %vm1143_vm3, %v2412_v37, -inf }
 0xf43   : > { %2468 = vmax.xlane.f32.xlu0 %v2467_v54  ;;  %v2464_v57 = vpop.f32.mrb[62].mxu1 }
 0xf44   : > { %v4446_v61 = vpop.f32.mrb[63].mxu1  ;;  %v2470_v63 = vsel %vm1143_vm3, %v2462_v42, -inf }
 0xf45   : > { %2471 = vmax.xlane.f32.xlu1 %v2470_v63  ;;  %v4811_v63 = vld [vmem:[%s5956_s0] ss:$0 sm:$0xff] }
 0xf56   : > { %2539 = vrot.lane.b32.xlu1 %v5409_v28, %s4976_s15 }
 0xf5a   : > { %2589 = vrot.lane.b32.xlu1 %v5353_v43, %s4977_s8 }
 0xf5e   : > { %2639 = vrot.lane.b32.xlu1 %v5358_v47, %s4977_s8 }
 0xf62   : > { %2637 = vrot.lane.b32.xlu1 %v5369_v51, %s4977_s8 }
 0xfd0   : > { %v2469_v62 = vpop.xlane.xlu0 %2468 }
 0xfd1   : > { %v2473_v7 = vsub.f32 %v2412_v37, %v2469_v62 }
 0xfd2   : > { %v2472_v0 = vpop.xlane.xlu1 %2471 }
 0xfd3   : > { %v2475_v3 = vmul.f32 1.442695, %v2473_v7  ;;  %v2474_v6 = vsub.f32 %v2462_v42, %v2472_v0 }
 0xfd5   : > { %4787 = vpow2.f32 %v2475_v3  ;;  %v2477_v8 = vmul.f32 1.442695, %v2474_v6  ;;  %v4812_v6 = vld [vmem:[%s5956_s0 + $0x1] ss:$0 sm:$0xff] }
 0xfd6   : > { %v2540_v9 = vpop.permute.xlu1 %2539 }
 0xfd7   : > { %4789 = vpow2.f32 %v2477_v8  ;;  %v2545_v11 = vsel %vm1171_vm2, %v2540_v9, 0 }
 0xfd8   : > { %4454 = vmatpush3.bf16.msra.mxu1 %v2545_v11 }
 0xfd9   : > { %4465 = vmatprep.subr.bf16.mxu1 %v4969_v5 }
 0xfda   : > { %v2590_v20 = vpop.permute.xlu1 %2589 }
 0xfde   : > { %v2640_v26 = vpop.permute.xlu1 %2639 }
 0xfdf   : > { %v4788_v43 = vpop.eup %4787  ;;  %v2645_v31 = vsel %vm1050_vm1, %v2640_v26, 0  ;;  %v4656_v26 = vld [vmem:[%s5234_s12 + $0x28] sm:$0xff]  }
 0xfe0   : > { %v2479_v47 = vsel %vm1143_vm3, %v4788_v43, 0.0 }
 0xfe1   : > { %v4790_v12 = vpop.eup %4789  ;;  %2480 = vadd.xlane.f32.xlu0 %v2479_v47 }
 0xfe2   : > { %v2482_v51 = vsel %vm1143_vm3, %v4790_v12, 0.0  ;;  %v2638_v35 = vpop.permute.xlu1 %2637 }
 0xfe5   : > { %2483 = vadd.xlane.f32.xlu0 %v2482_v51 }
 0xffb   : > { %2491 = vrot.lane.b32.xlu0 %v5378_v58, %s4976_s15 }
 0xfff   : > { %2587 = vrot.lane.b32.xlu0 %v5360_v48, %s4977_s8  ;;  %v2595_v48 = vsel %vm1050_vm1, %v2590_v20, 0 }
0x106e   : > { %v2481_v13 = vpop.xlane.xlu0 %2480 }
0x106f   : > { %4791 = vrcp.f32 %v2481_v13 }
0x1072   : > { %v2484_v16 = vpop.xlane.xlu0 %2483 }
0x1073   : > { %4793 = vrcp.f32 %v2484_v16 }
0x1076   : > { %v2492_v17 = vpop.permute.xlu0 %2491 }
0x1077   : > { %v2497_v18 = vsel %vm1171_vm2, %v2492_v17, 0 }
0x1078   : > { %4448 = vmatpush3.bf16.msra.mxu0 %v2497_v18 }
0x1079   : > { %v4792_v19 = vpop.eup %4791  ;;  %4459 = vmatprep.subr.bf16.mxu0 %v4969_v5 }
0x107a   : > { %v2487_v21 = vmul.f32 %v4792_v19, %v4788_v43  ;;  %v2588_v34 = vpop.permute.xlu0 %2587 }
0x107c   : > { %v2489_v22 = vpack.c.bf16 %v2487_v21, %v2487_v21  ;;  %v4652_v21 = vld [vmem:[%s5234_s12 + $0x8] sm:$0xff]  }
0x107d   : > { %v4794_v24 = vpop.eup %4793 }
0x107e   : > { %v2488_v25 = vmul.f32 %v4794_v24, %v4790_v12  ;;  %4450 = vmatmul.mubr.msk.bf16.vlgmr.msra.gmra.mrb[48].mxu0 %vm1143_vm3, %v2489_v22  ;;  %v4653_v22 = vld [vmem:[%s5234_s12 + $0x10] sm:$0xff]   ;;  %v4654_v24 = vld [vmem:[%s5234_s12 + $0x18] sm:$0xff]  }
0x107f   : > { %4461 = vmatprep.mubr.msk.bf16.mxu0 %vm4970_vm0, %v4969_v5 }
0x1080   : > { %v2490_v30 = vpack.c.bf16 %v2488_v25, %v2488_v25  ;;  %v4655_v25 = vld [vmem:[%s5234_s12 + $0x20] sm:$0xff]  }
0x1081   : > { %4460 = vmatpush3.bf16.xpose.msra.mxu0 %v2595_v48  ;;  %v4657_v48 = vld [vmem:[%s5234_s12 + $0x30] sm:$0xff]  }
0x1082   : > { %4456 = vmatmul.mubr.msk.bf16.vlgmr.msra.gmra.mrb[64].mxu1 %vm1143_vm3, %v2490_v30  ;;  %4471 = vmatprep.subr.bf16.mxu0 %v4969_v5  ;;  %v4658_v30 = vld [vmem:[%s5234_s12 + $0x38] sm:$0xff]  }
0x1083   : > { %4466 = vmatpush3.bf16.xpose.msra.mxu1 %v2645_v31  ;;  %4467 = vmatprep.mubr.msk.bf16.mxu1 %vm4970_vm0, %v4969_v5 }
0x1084   : > { %4477 = vmatprep.subr.bf16.mxu1 %v4969_v5 }
0x1088   : > { %4462 = vmatmul.mubr.msk.bf16.vlgmr.msra.gmra.mrb[52].mxu0 %vm1050_vm1, %v2588_v34 }
0x1089   : > { %4473 = vmatprep.mubr.msk.bf16.mxu0 %vm4970_vm0, %v4969_v5 }
0x108a   : > { %4468 = vmatmul.mubr.msk.bf16.vlgmr.msra.gmra.mrb[68].mxu1 %vm1050_vm1, %v2638_v35 }
0x108b   : > { %4479 = vmatprep.mubr.msk.bf16.mxu1 %vm4970_vm0, %v4969_v5 }
0x1151   : > { %v2533_v37 = vpop.f32.mrb[48].mxu0 }
0x1152   : > { %v4451_v38 = vpop.f32.mrb[49].mxu0 }
0x1153   : > { %v2536_v39 = vpop.f32.mrb[50].mxu0 }
0x1154   : > { %v4452_v40 = vpop.f32.mrb[51].mxu0 }
0x1155   : > { %v2581_v42 = vpop.f32.mrb[64].mxu1 }
0x1156   : > { %v4609_v46 = vpack.i.bf16 %v2581_v42, %v2533_v37  ;;  %v4457_v53 = vpop.f32.mrb[65].mxu1 }
0x1157   : > { %v2584_v54 = vpop.f32.mrb[66].mxu1 }
0x1158   : > { %v4458_v57 = vpop.f32.mrb[67].mxu1 }
0x115b   : > { %v2631_v61 = vpop.f32.mrb[52].mxu0 }
0x115c   : > { %v2632_v62 = vadd.f32 %v4811_v63, %v2631_v61  ;;  %v4463_v7 = vpop.f32.mrb[53].mxu0 }
0x115d   : > { %v2634_v0 = vpop.f32.mrb[54].mxu0  ;;  %v2681_v3 = vpop.f32.mrb[68].mxu1 }
0x115e   : > { %v2682_v8 = vadd.f32 %v4812_v6, %v2681_v3  ;;  %v4464_v9 = vpop.f32.mrb[55].mxu0  ;;  %v4469_v11 = vpop.f32.mrb[69].mxu1  ;;  %v2687_v43 = vsel %vm1143_vm3, %v2632_v62, -inf }
0x115f   : > { %2688 = vmax.xlane.f32.xlu0 %v2687_v43  ;;  %v2684_v47 = vpop.f32.mrb[70].mxu1 }
0x1160   : > { %v4470_v12 = vpop.f32.mrb[71].mxu1  ;;  %v2690_v51 = vsel %vm1143_vm3, %v2682_v8, -inf }
0x1161   : > { %2691 = vmax.xlane.f32.xlu1 %v2690_v51 }
0x1172   : > { %2759 = vrot.lane.b32.xlu1 %v5409_v28, %s4977_s8 }
0x1176   : > { %4585 = vrot.lane.b32.xlu1 %v4584_v50, %s4977_s8 }
0x117a   : > { %4590 = vrot.lane.b32.xlu1 %v4589_v56, %s4976_s15 }
0x117e   : > { %4600 = vrot.lane.b32.xlu1 %v4599_v15, %s4974_s26 }
0x1182   : > { %4610 = vrot.lane.b32.xlu1 %v4609_v46, %s4972_s27  ;;  %s5958_s27 = scalar_lea.vmem %s5905_s6, %s5250_s22 }
0x11ec   : > { %v2689_v13 = vpop.xlane.xlu0 %2688 }
0x11ed   : > { %v2693_v16 = vsub.f32 %v2632_v62, %v2689_v13 }
0x11ee   : > { %v2692_v28 = vpop.xlane.xlu1 %2691 }
0x11ef   : > { %v2695_v17 = vmul.f32 1.442695, %v2693_v16  ;;  %v2694_v18 = vsub.f32 %v2682_v8, %v2692_v28 }
0x11f1   : > { %4795 = vpow2.f32 %v2695_v17  ;;  %v2697_v41 = vmul.f32 1.442695, %v2694_v18 }
0x11f2   : > { %v2760_v49 = vpop.permute.xlu1 %2759 }
0x11f3   : > { %4797 = vpow2.f32 %v2697_v41  ;;  %v2765_v50 = vsel %vm1171_vm2, %v2760_v49, 0 }
0x11f4   : > { %4478 = vmatpush3.bf16.msra.mxu1 %v2765_v50 }
0x11f6   : > { %v4586_v53 = vpop.permute.xlu1 %4585 }
0x11f7   : > { %v4588_v61 = vunpack.i.h.bf16 %v4586_v53  ;;  %v4587_v63 = vunpack.i.l.bf16 %v4586_v53 }
0x11f9   : > { %v2864_v8 = vsel %vm1050_vm1, %v5432_v59, %v4588_v61  ;;  %v2863_v9 = vsel %vm1050_vm1, %v5428_v44, %v4587_v63  ;;  %v4673_v61 = vld [vmem:[%s5242_s13 + $0x44] ss:$16 sps:$4 sm:$0xff]   ;;  %v4676_v63 = vld [vmem:[%s5242_s13 + $0x4c] ss:$16 sps:$4 sm:$0xff]  }
0x11fa   : > { %v4591_v54 = vpop.permute.xlu1 %4590 }
0x11fb   : > { %v4796_v45 = vpop.eup %4795  ;;  %v4593_v62 = vunpack.i.h.bf16 %v4591_v54 }
0x11fc   : > { %v2699_v55 = vsel %vm1143_vm3, %v4796_v45, 0.0 }
0x11fd   : > { %v4798_v56 = vpop.eup %4797  ;;  %2700 = vadd.xlane.f32.xlu0 %v2699_v55  ;;  %v2867_v43 = vsel %vm2865_vm4, %v2864_v8, %v4593_v62  ;;  %v4671_v62 = vld [vmem:[%s5242_s13 + $0x40] ss:$16 sps:$4 sm:$0xff]   ;;  %v4685_v8 = vld [vmem:[%s5242_s13 + $0x84] ss:$16 sps:$4 sm:$0xff]  }
0x11fe   : > { %v2702_v10 = vsel %vm1143_vm3, %v4798_v56, 0.0  ;;  %v4601_v7 = vpop.permute.xlu1 %4600 }
0x11ff   : > { %v4603_v16 = vunpack.i.h.bf16 %v4601_v7  ;;  %v4602_v28 = vunpack.i.l.bf16 %v4601_v7  ;;  %v4679_v7 = vld [vmem:[%s5242_s13 + $0x64] ss:$16 sps:$4 sm:$0xff]  }
0x1201   : > { %2703 = vadd.xlane.f32.xlu0 %v2702_v10 }
0x1202   : > { %v4611_v17 = vpop.permute.xlu1 %4610 }
0x1203   : > { %v4613_v59 = vunpack.i.h.bf16 %v4611_v17 }
0x1217   : > { %2711 = vrot.lane.b32.xlu0 %v5378_v58, %s4977_s8 }
0x121b   : > { %4595 = vrot.lane.b32.xlu0 %v4594_v2, %s4975_s23  ;;  %s5959_s23 = scalar_lea.vmem %s5906_s7, %s5250_s22 }
0x121f   : > { %4605 = vrot.lane.b32.xlu0 %v4604_v29, %s4973_s1  ;;  %v4651_v29 = vld [vmem:[%s5234_s12] sm:$0xff]  }
0x128a   : > { %v2701_v14 = vpop.xlane.xlu0 %2700 }
0x128b   : > { %4799 = vrcp.f32 %v2701_v14 }
0x128e   : > { %v2704_v15 = vpop.xlane.xlu0 %2703 }
0x128f   : > { %4801 = vrcp.f32 %v2704_v15 }
0x1292   : > { %v2712_v19 = vpop.permute.xlu0 %2711 }
0x1293   : > { %v2717_v20 = vsel %vm1171_vm2, %v2712_v19, 0 }
0x1294   : > { %4472 = vmatpush3.bf16.msra.mxu0 %v2717_v20 }
0x1295   : > { %v4800_v58 = vpop.eup %4799  ;;  %4483 = vmatprep.subr.bf16.mxu0 %v4969_v5 }
0x1296   : > { %v2707_v60 = vmul.f32 %v4800_v58, %v4796_v45  ;;  %v4596_v57 = vpop.permute.xlu0 %4595  ;;  %v4612_v45 = vunpack.i.l.bf16 %v4611_v17  ;;  %v4059_v58 = vld [vmem:[%s5957_s17] ss:$0 sm:$0xff] }
0x1297   : > { %v4598_v0 = vunpack.i.h.bf16 %v4596_v57  ;;  %v4597_v3 = vunpack.i.l.bf16 %v4596_v57  ;;  %v4695_v17 = vld [vmem:[%s5242_s13 + $0xc0] ss:$16 sps:$4 sm:$0xff]  }
0x1298   : > { %v2709_v1 = vpack.c.bf16 %v2707_v60, %v2707_v60 }
0x1299   : > { %v4802_v2 = vpop.eup %4801  ;;  %v2870_v12 = vsel %vm2868_vm5, %v2867_v43, %v4598_v0  ;;  %v4682_v0 = vld [vmem:[%s5242_s13 + $0x6c] ss:$16 sps:$4 sm:$0xff]   ;;  %v4686_v43 = vld [vmem:[%s5242_s13 + $0x88] ss:$16 sps:$4 sm:$0xff]  }
0x129a   : > { %v2708_v23 = vmul.f32 %v4802_v2, %v4798_v56  ;;  %4474 = vmatmul.mubr.msk.bf16.vlgmr.msra.gmra.mrb[56].mxu0 %vm1143_vm3, %v2709_v1  ;;  %v4606_v6 = vpop.permute.xlu0 %4605  ;;  %v2873_v41 = vsel %vm2871_vm6, %v2870_v12, %v4603_v16  ;;  %v4694_v12 = vld [vmem:[%s5242_s13 + $0xac] ss:$16 sps:$4 sm:$0xff]   ;;  %v4697_v16 = vld [vmem:[%s5242_s13 + $0xc4] ss:$16 sps:$4 sm:$0xff]  }
0x129b   : > { %4499 = vmatprep.mubr.msk.bf16.mxu0 %vm4970_vm0, %v4969_v5  ;;  %4484 = vmatpush3.bf16.msra.mxu0 %v4651_v29  ;;  %v4608_v51 = vunpack.i.h.bf16 %v4606_v6  ;;  %v4607_v13 = vunpack.i.l.bf16 %v4606_v6  ;;  %v4680_v6 = vld [vmem:[%s5242_s13 + $0x68] ss:$16 sps:$4 sm:$0xff]  }
0x129c   : > { %v2710_v27 = vpack.c.bf16 %v2708_v23, %v2708_v23  ;;  %4485 = vmatprep.subr.bf16.mxu0 %v4969_v5 }
0x129d   : > { %v2876_v50 = vsel %vm2874_vm7, %v2873_v41, %v4608_v51  ;;  %v4689_v51 = vld [vmem:[%s5242_s13 + $0xa0] ss:$16 sps:$4 sm:$0xff]   ;;  %v4703_v41 = vld [vmem:[%s5242_s13 + $0xe4] ss:$16 sps:$4 sm:$0xff]  }
0x129e   : > { %4480 = vmatmul.mubr.msk.bf16.vlgmr.msra.gmra.mrb[72].mxu1 %vm1143_vm3, %v2710_v27  ;;  %v2879_v14 = vsel %vm2877_vm8, %v2876_v50, %v4613_v59  ;;  %v4701_v50 = vld [vmem:[%s5242_s13 + $0xe0] ss:$16 sps:$4 sm:$0xff]   ;;  %v4704_v59 = vld [vmem:[%s5242_s13 + $0xe8] ss:$16 sps:$4 sm:$0xff]  }
0x129f   : > { %3286 = vmatprep.mubr.bf16.mxu1 %v4968_v4  ;;  %4486 = vmatpush3.bf16.msra.mxu0 %v4652_v21  ;;  %v4813_v21 = vld [vmem:[#allocation2] sm:$0xff] }
0x12a0   : > { %4487 = vmatprep.subr.bf16.mxu0 %v4969_v5 }
0x12a3   : > { %4488 = vmatpush3.bf16.msra.mxu0 %v4653_v22 }
0x12a4   : > { %4489 = vmatprep.subr.bf16.mxu0 %v4969_v5 }
0x12a7   : > { %4490 = vmatpush3.bf16.msra.mxu0 %v4654_v24 }
0x12a8   : > { %4491 = vmatprep.subr.bf16.mxu0 %v4969_v5 }
0x12ab   : > { %4492 = vmatpush3.bf16.msra.mxu0 %v4655_v25  ;;  %v4659_v25 = vld [vmem:[%s5242_s13] ss:$16 sps:$4 sm:$0xff]  }
0x12ac   : > { %4493 = vmatprep.subr.bf16.mxu0 %v4969_v5 }
0x12af   : > { %4494 = vmatpush3.bf16.msra.mxu0 %v4656_v26  ;;  %v4661_v26 = vld [vmem:[%s5242_s13 + $0x4] ss:$16 sps:$4 sm:$0xff]  }
0x12b0   : > { %4495 = vmatprep.subr.bf16.mxu0 %v4969_v5  ;;  %3254 = vmatprep.subr.bf16.mxu1 %v4661_v26  ;;  %v4711_v26 = vld [vmem:[%s5294_s29 + $0x48] sm:$0xff]  }
0x12b1   : > { %3255 = vmatpush1.bf16.msra.mxu1 %v4659_v25 }
0x12b3   : > { %4496 = vmatpush3.bf16.msra.mxu0 %v4657_v48  ;;  %v4662_v48 = vld [vmem:[%s5242_s13 + $0x8] ss:$16 sps:$4 sm:$0xff]  }
0x12b4   : > { %4497 = vmatprep.subr.bf16.mxu0 %v4969_v5  ;;  %v4592_v5 = vunpack.i.l.bf16 %v4591_v54 }
0x12b6   : > { %v2866_v11 = vsel %vm2865_vm4, %v2863_v9, %v4592_v5  ;;  %v4674_v5 = vld [vmem:[%s5242_s13 + $0x48] ss:$16 sps:$4 sm:$0xff]   ;;  %v4688_v9 = vld [vmem:[%s5242_s13 + $0x8c] ss:$16 sps:$4 sm:$0xff]  }
0x12b7   : > { %4498 = vmatpush3.bf16.msra.mxu0 %v4658_v30  ;;  %v2869_v47 = vsel %vm2868_vm5, %v2866_v11, %v4597_v3  ;;  %v4664_v30 = vld [vmem:[%s5242_s13 + $0xc] ss:$16 sps:$4 sm:$0xff]   ;;  %v4677_v3 = vld [vmem:[%s5242_s13 + $0x60] ss:$16 sps:$4 sm:$0xff]  }
0x12b8   : > { %v2872_v18 = vsel %vm2871_vm6, %v2869_v47, %v4602_v28  ;;  %3297 = vmatprep.subr.bf16.mxu0 %v4664_v30  ;;  %v4683_v11 = vld [vmem:[%s5242_s13 + $0x80] ss:$16 sps:$4 sm:$0xff]   ;;  %v4691_v47 = vld [vmem:[%s5242_s13 + $0xa4] ss:$16 sps:$4 sm:$0xff]   ;;  %v4700_v28 = vld [vmem:[%s5242_s13 + $0xcc] ss:$16 sps:$4 sm:$0xff]  }
0x12b9   : > { %v2875_v49 = vsel %vm2874_vm7, %v2872_v18, %v4607_v13  ;;  %v4692_v13 = vld [vmem:[%s5242_s13 + $0xa8] ss:$16 sps:$4 sm:$0xff]  }
0x12ba   : > { %v2878_v10 = vsel %vm2877_vm8, %v2875_v49, %v4612_v45  ;;  %v4698_v18 = vld [vmem:[%s5242_s13 + $0xc8] ss:$16 sps:$4 sm:$0xff]   ;;  %v4706_v49 = vld [vmem:[%s5242_s13 + $0xec] ss:$16 sps:$4 sm:$0xff]   ;;  %v4707_v45 = vld [vmem:[%s5294_s29 + $0x40] sm:$0xff]  }
0x12bb   : > { %v4713_v30 = vld [vmem:[%s5294_s29 + $0x8] sm:$0xff]  }
0x136d   : > { %v2753_v31 = vpop.f32.mrb[56].mxu0 }
0x136e   : > { %v4475_v34 = vpop.f32.mrb[57].mxu0 }
0x136f   : > { %v2756_v35 = vpop.f32.mrb[58].mxu0  ;;  %v4670_v34 = vld [vmem:[%s5242_s13 + $0x2c] ss:$16 sps:$4 sm:$0xff]  }
0x1370   : > { %v4476_v37 = vpop.f32.mrb[59].mxu0  ;;  %v4665_v35 = vld [vmem:[%s5242_s13 + $0x20] ss:$16 sps:$4 sm:$0xff]  }
0x1371   : > { %v2801_v38 = vpop.f32.mrb[72].mxu1  ;;  %v4668_v37 = vld [vmem:[%s5242_s13 + $0x28] ss:$16 sps:$4 sm:$0xff]  }
0x1372   : > { %v4614_v39 = vpack.i.bf16 %v2801_v38, %v2753_v31  ;;  %v4481_v40 = vpop.f32.mrb[73].mxu1  ;;  %v4667_v31 = vld [vmem:[%s5242_s13 + $0x24] ss:$16 sps:$4 sm:$0xff]  }
0x1373   : > { %v2804_v42 = vpop.f32.mrb[74].mxu1  ;;  %3256 = vmatprep.subr.bf16.mxu1 %v4667_v31  ;;  %v4714_v31 = vld [vmem:[%s5294_s29 + $0x88] sm:$0xff]  }
0x1374   : > { %4615 = vrot.lane.b32.xlu0 %v4614_v39, %s4971_s28  ;;  %v4482_v46 = vpop.f32.mrb[75].mxu1  ;;  %3257 = vmatpush1.bf16.msra.mxu1 %v4665_v35  ;;  %v4716_v35 = vld [vmem:[%s5294_s29 + $0xd0] sm:$0xff]  }
0x1375   : > { %3258 = vmatprep.subr.bf16.mxu1 %v4673_v61  ;;  %v4726_v61 = vld [vmem:[%s5294_s29 + $0xa0] sm:$0xff]  }
0x1378   : > { %3259 = vmatpush1.bf16.msra.mxu1 %v4671_v62  ;;  %v4728_v62 = vld [vmem:[%s5294_s29 + $0xe8] sm:$0xff]  }
0x1379   : > { %3260 = vmatprep.subr.bf16.mxu1 %v4679_v7  ;;  %v4730_v7 = vld [vmem:[%s5294_s29 + $0xa8] sm:$0xff]  }
0x137c   : > { %3261 = vmatpush1.bf16.msra.mxu1 %v4677_v3  ;;  %v4732_v3 = vld [vmem:[%s5294_s29 + $0xf0] sm:$0xff]  }
0x137d   : > { %3262 = vmatprep.subr.bf16.mxu1 %v4685_v8  ;;  %v4734_v8 = vld [vmem:[%s5294_s29 + $0xb0] sm:$0xff]  }
0x1380   : > { %3263 = vmatpush1.bf16.msra.mxu1 %v4683_v11  ;;  %v4736_v11 = vld [vmem:[%s5294_s29 + $0xf8] sm:$0xff]  }
0x1381   : > { %3264 = vmatprep.subr.bf16.mxu1 %v4691_v47  ;;  %v4738_v47 = vld [vmem:[%s5294_s29 + $0xb8] sm:$0xff]  }
0x1384   : > { %3265 = vmatpush1.bf16.msra.mxu1 %v4689_v51  ;;  %v3088_v51 = vsub.s32 3, %v5344_v32 }
0x1385   : > { %3266 = vmatprep.subr.bf16.mxu1 %v4697_v16 }
0x1388   : > { %3267 = vmatpush1.bf16.msra.mxu1 %v4695_v17 }
0x1389   : > { %3268 = vmatprep.subr.bf16.mxu1 %v4703_v41 }
0x138c   : > { %3269 = vmatpush1.bf16.msra.mxu1 %v4701_v50 }
0x138d   : > { %4227 = vmatprep.subr.bf16.mxu1 %v4707_v45 }
0x13e6   : > { %v4616_v44 = vpop.permute.xlu0 %4615 }
0x13e7   : > { %v4618_v55 = vunpack.i.h.bf16 %v4616_v44  ;;  %v4617_v56 = vunpack.i.l.bf16 %v4616_v44  ;;  %v4708_v44 = vld [vmem:[%s5294_s29 + $0xc0] sm:$0xff]  }
0x13e9   : > { %v2882_v15 = vsel %vm2880_vm9, %v2879_v14, %v4618_v55  ;;  %v2881_v19 = vsel %vm2880_vm9, %v2878_v10, %v4617_v56 }
0x13ea   : > { %v2883_v20 = vpack.c.bf16 %v2882_v15, %v2881_v19 }
0x13ec   : > { %4500 = vmatmul.mubr.bf16.vlgmr.msra.gmra.mrb[60].mxu0 %v2883_v20 }
0x13ed   : > { %3329 = vmatprep.mubr.bf16.mxu0 %v4968_v4  ;;  %v4814_v4 = vld [vmem:[#allocation2 + $0x8] sm:$0xff]  ;;  %3298 = vmatpush1.bf16.msra.mxu0 %v4662_v48  ;;  %v4712_v48 = vld [vmem:[%s5294_s29 + $0xc8] sm:$0xff]  }
0x13ee   : > { %3299 = vmatprep.subr.bf16.mxu0 %v4670_v34  ;;  %v4715_v34 = vld [vmem:[%s5294_s29 + $0x50] sm:$0xff]  }
0x13f1   : > { %3300 = vmatpush1.bf16.msra.mxu0 %v4668_v37  ;;  %v4717_v37 = vld [vmem:[%s5294_s29 + $0x10] sm:$0xff]  }
0x13f2   : > { %3301 = vmatprep.subr.bf16.mxu0 %v4676_v63  ;;  %v4727_v63 = vld [vmem:[%s5294_s29 + $0x68] sm:$0xff]  }
0x13f5   : > { %3302 = vmatpush1.bf16.msra.mxu0 %v4674_v5  ;;  %v4729_v5 = vld [vmem:[%s5294_s29 + $0x28] sm:$0xff]  }
0x13f6   : > { %3303 = vmatprep.subr.bf16.mxu0 %v4682_v0  ;;  %v4731_v0 = vld [vmem:[%s5294_s29 + $0x70] sm:$0xff]  }
0x13f9   : > { %3304 = vmatpush1.bf16.msra.mxu0 %v4680_v6  ;;  %v4733_v6 = vld [vmem:[%s5294_s29 + $0x30] sm:$0xff]  }
0x13fa   : > { %3305 = vmatprep.subr.bf16.mxu0 %v4688_v9  ;;  %v4735_v9 = vld [vmem:[%s5294_s29 + $0x78] sm:$0xff]  }
0x13fd   : > { %3306 = vmatpush1.bf16.msra.mxu0 %v4686_v43  ;;  %v4737_v43 = vld [vmem:[%s5294_s29 + $0x38] sm:$0xff]  }
0x13fe   : > { %3307 = vmatprep.subr.bf16.mxu0 %v4694_v12  ;;  %v3072_v12 = vld [vmem:[%s5280_s25] sm:$0xf] }
0x13ff   : > { %v3085_v16 = vrot.slane %v3072_v12, %v813_v52  ;;  %v3089_v17 = vrot.slane %v3072_v12, %v3088_v51 }
0x1401   : > { %3308 = vmatpush1.bf16.msra.mxu0 %v4692_v13  ;;  %v3077_v13 = vrot.slane %v3072_v12, %v805_v36 }
0x1402   : > { %3309 = vmatprep.subr.bf16.mxu0 %v4700_v28  ;;  %v3081_v28 = vrot.slane %v3072_v12, %v809_v33 }
0x1405   : > { %3310 = vmatpush1.bf16.msra.mxu0 %v4698_v18 }
0x1406   : > { %3311 = vmatprep.subr.bf16.mxu0 %v4706_v49 }
0x1409   : > { %3312 = vmatpush1.bf16.msra.mxu0 %v4704_v59 }
0x140a   : > { %4249 = vmatprep.subr.bf16.mxu0 %v4708_v44 }
0x14bf   : > { %v2989_v60 = vpop.f32.mrb[60].mxu0 }
0x14c0   : > { %v2990_v1 = vadd.f32 %v4059_v58, %v2989_v60  ;;  %v4501_v2 = vpop.f32.mrb[61].mxu0  ;;  %v4068_v60 = vld [vmem:[%s5958_s27] ss:$0 sm:$0xff] }
0x14c1   : > { %v2992_v23 = vpop.f32.mrb[62].mxu0 }
0x14c2   : > { %v2993_v27 = vadd.f32 %v4059_v58, %v2992_v23  ;;  %v4502_v29 = vpop.f32.mrb[63].mxu0  ;;  %v2996_v22 = vadd.f32 %v4813_v21, %v2990_v1 }
0x14c4   : > { %2998 = vadd.xlane.f32.xlu1 %v2996_v22  ;;  %v2997_v24 = vadd.f32 %v4814_v4, %v2993_v27  ;;  %v4069_v27 = vld [vmem:[%s5959_s23] ss:$0 sm:$0xff]  ;;  %v4709_v4 = vld [vmem:[%s5294_s29] sm:$0xff]  }
0x14c6   : > { %3000 = vadd.xlane.f32.xlu0 %v2997_v24 }
0x1551   : > { %v2999_v38 = vpop.xlane.xlu1 %2998 }
0x1552   : > { %v3003_v39 = vmul.f32 0.0078125, %v2999_v38  ;;  %v4718_v38 = vld [vmem:[%s5294_s29 + $0x90] sm:$0xff]  }
0x1553   : > { %v3001_v40 = vpop.xlane.xlu0 %3000 }
0x1554   : > { %v5767_v42 = vsub.f32 %v2996_v22, %v3003_v39  ;;  %v3004_v46 = vmul.f32 0.0078125, %v3001_v40  ;;  %v4719_v39 = vld [vmem:[%s5294_s29 + $0x58] sm:$0xff]  }
0x1555   : > { %v4720_v40 = vld [vmem:[%s5294_s29 + $0xd8] sm:$0xff]  }
0x1556   : > { %v5769_v53 = vsub.f32 %v2997_v24, %v3004_v46  ;;  %v3007_v54 = vmul.f32 %v5767_v42, %v5767_v42  ;;  %v4710_v24 = vld [vmem:[%s5294_s29 + $0x80] sm:$0xff]   ;;  %v4722_v46 = vld [vmem:[%s5294_s29 + $0x98] sm:$0xff]  }
0x1558   : > { %3009 = vadd.xlane.f32.xlu0 %v3007_v54  ;;  %v3008_v57 = vmul.f32 %v5769_v53, %v5769_v53  ;;  %v4724_v54 = vld [vmem:[%s5294_s29 + $0xe0] sm:$0xff]  }
0x155c   : > { %3011 = vadd.xlane.f32.xlu0 %v3008_v57  ;;  %v4725_v57 = vld [vmem:[%s5294_s29 + $0x20] sm:$0xff]  }
0x15e5   : > { %v3010_v55 = vpop.xlane.xlu0 %3009 }
0x15e6   : > { %v3013_v56 = vmul.f32 0.0078125, %v3010_v55 }
0x15e8   : > { %v3015_v10 = vadd.f32 1e-05, %v3013_v56 }
0x15e9   : > { %v3012_v14 = vpop.xlane.xlu0 %3011 }
0x15ea   : > { %4803 = vrsqrt.f32 %v3015_v10  ;;  %v3014_v15 = vmul.f32 0.0078125, %v3012_v14 }
0x15ec   : > { %v3016_v19 = vadd.f32 1e-05, %v3014_v15 }
0x15ee   : > { %4805 = vrsqrt.f32 %v3016_v19 }
0x15f4   : > { %v4804_v20 = vpop.eup %4803 }
0x15f5   : > { %v3019_v58 = vmul.f32 %v4804_v20, %v5767_v42  ;;  %v4721_v42 = vld [vmem:[%s5294_s29 + $0x18] sm:$0xff]  }
0x15f7   : > { %v3028_v23 = vmul.f32 %v4068_v60, %v3019_v58 }
0x15f8   : > { %v4806_v1 = vpop.eup %4805 }
0x15f9   : > { %v3020_v2 = vmul.f32 %v4806_v1, %v5769_v53  ;;  %v5813_v21 = vadd.f32 %v4069_v27, %v3028_v23  ;;  %v4723_v53 = vld [vmem:[%s5294_s29 + $0x60] sm:$0xff]  }
0x15fb   : > { %v3029_v29 = vmul.f32 %v4068_v60, %v3020_v2 }
0x15fd   : > { %v5815_v22 = vadd.f32 %v4069_v27, %v3029_v29 }
0x15ff   : > { %v3039_v25 = vpack.c.bf16 %v5815_v22, %v5813_v21 }
0x1601   : > { %3287 = vmatmul.mubr.bf16.vlgmr.msra.gmra.mrb[76].mxu1 %v3039_v25  ;;  %3330 = vmatmul.mubr.bf16.vlgmr.msra.gmra.mrb[64].mxu0 %v3039_v25 }
0x1602   : > { %4228 = vmatpush3.bf16.msra.mxu1 %v4709_v4  ;;  %4250 = vmatpush3.bf16.msra.mxu0 %v4710_v24 }
0x1603   : > { %4229 = vmatprep.subr.bf16.mxu1 %v4711_v26  ;;  %4251 = vmatprep.subr.bf16.mxu0 %v4712_v48 }
0x1606   : > { %4230 = vmatpush3.bf16.msra.mxu1 %v4713_v30  ;;  %4252 = vmatpush3.bf16.msra.mxu0 %v4714_v31  ;;  %v4102_v30 = vld [vmem:[%s744_s19] ss:$0 sm:$0xff] }
0x1607   : > { %4231 = vmatprep.subr.bf16.mxu1 %v4715_v34  ;;  %4253 = vmatprep.subr.bf16.mxu0 %v4716_v35 }
0x160a   : > { %4232 = vmatpush3.bf16.msra.mxu1 %v4717_v37  ;;  %4254 = vmatpush3.bf16.msra.mxu0 %v4718_v38 }
0x160b   : > { %4233 = vmatprep.subr.bf16.mxu1 %v4719_v39  ;;  %4255 = vmatprep.subr.bf16.mxu0 %v4720_v40 }
0x160e   : > { %4234 = vmatpush3.bf16.msra.mxu1 %v4721_v42  ;;  %4256 = vmatpush3.bf16.msra.mxu0 %v4722_v46 }
0x160f   : > { %4235 = vmatprep.subr.bf16.mxu1 %v4723_v53  ;;  %4257 = vmatprep.subr.bf16.mxu0 %v4724_v54 }
0x1612   : > { %4236 = vmatpush3.bf16.msra.mxu1 %v4725_v57  ;;  %4258 = vmatpush3.bf16.msra.mxu0 %v4726_v61 }
0x1613   : > { %4237 = vmatprep.subr.bf16.mxu1 %v4727_v63  ;;  %4259 = vmatprep.subr.bf16.mxu0 %v4728_v62 }
0x1616   : > { %4238 = vmatpush3.bf16.msra.mxu1 %v4729_v5  ;;  %4260 = vmatpush3.bf16.msra.mxu0 %v4730_v7 }
0x1617   : > { %4239 = vmatprep.subr.bf16.mxu1 %v4731_v0  ;;  %4261 = vmatprep.subr.bf16.mxu0 %v4732_v3 }
0x161a   : > { %4240 = vmatpush3.bf16.msra.mxu1 %v4733_v6  ;;  %4262 = vmatpush3.bf16.msra.mxu0 %v4734_v8 }
0x161b   : > { %4241 = vmatprep.subr.bf16.mxu1 %v4735_v9  ;;  %4263 = vmatprep.subr.bf16.mxu0 %v4736_v11 }
0x161e   : > { %4242 = vmatpush3.bf16.msra.mxu1 %v4737_v43  ;;  %4264 = vmatpush3.bf16.msra.mxu0 %v4738_v47 }
0x16d4   : > { %v3288_v18 = vpop.f32.mrb[76].mxu1  ;;  %v3331_v41 = vpop.f32.mrb[64].mxu0 }
0x16d5   : > { %v3289_v49 = vadd.f32 %v3288_v18, %v3077_v13  ;;  %v3332_v50 = vadd.f32 %v3331_v41, %v3085_v16  ;;  %v3290_v59 = vpop.f32.mrb[77].mxu1  ;;  %v3333_v45 = vpop.f32.mrb[65].mxu0  ;;  %v4136_v41 = vld [vmem:[%s750_s4] ss:$0 sm:$0xff] }
0x16d6   : > { %v3291_v44 = vadd.f32 %v3290_v59, %v3081_v28  ;;  %v3334_v55 = vadd.f32 %v3333_v45, %v3089_v17  ;;  %v3292_v56 = vpop.f32.mrb[78].mxu1  ;;  %v3335_v10 = vpop.f32.mrb[66].mxu0 }
0x16d7   : > { %v3293_v14 = vadd.f32 %v3292_v56, %v3077_v13  ;;  %v3336_v15 = vadd.f32 %v3335_v10, %v3085_v16  ;;  %v3294_v36 = vpop.f32.mrb[79].mxu1  ;;  %v3337_v19 = vpop.f32.mrb[67].mxu0  ;;  %v3340_v58 = vmax.f32 %v3289_v49, 0.0  ;;  %v3342_v32 = vmax.f32 %v3332_v50, 0.0 }
0x16d8   : > { %v3295_v20 = vadd.f32 %v3294_v36, %v3081_v28  ;;  %v3338_v52 = vadd.f32 %v3337_v19, %v3089_v17  ;;  %v3341_v1 = vmax.f32 %v3291_v44, 0.0  ;;  %v3343_v2 = vmax.f32 %v3334_v55, 0.0  ;;  %v4135_v28 = vld [vmem:[%s747_s14] ss:$0 sm:$0xff]  ;;  %s5962_s14 = sld [smem:[#allocation23_spill]] (!%p4137_p7) }
0x16d9   : > { %v3344_v33 = vmax.f32 %v3293_v14, 0.0  ;;  %v3346_v60 = vmax.f32 %v3336_v15, 0.0 }
0x16da   : > { %v3345_v23 = vmax.f32 %v3295_v20, 0.0  ;;  %v3347_v27 = vmax.f32 %v3338_v52, 0.0 }
0x16db   : > { %v3348_v29 = vpack.c.bf16 %v3344_v33, %v3340_v58  ;;  %v3350_v4 = vpack.c.bf16 %v3346_v60, %v3342_v32 }
0x16dc   : > { %v3349_v24 = vpack.c.bf16 %v3345_v23, %v3341_v1  ;;  %v3351_v25 = vpack.c.bf16 %v3347_v27, %v3343_v2 }
0x16de   : > { %3647 = vmatprep.mubr.bf16.mxu1 %v3349_v24  ;;  %3688 = vmatprep.mubr.bf16.mxu0 %v3351_v25 }
0x16df   : > { %3648 = vmatmul.mubr.bf16.vlgmr.msra.gmra.mrb[80].mxu1 %v3348_v29  ;;  %3689 = vmatmul.mubr.bf16.vlgmr.msra.gmra.mrb[68].mxu0 %v3350_v4 }
0x17b2   : > { %v4243_v26 = vpop.f32.mrb[80].mxu1  ;;  %v4265_v48 = vpop.f32.mrb[68].mxu0 }
0x17b3   : > { %v4244_v31 = vpop.f32.mrb[81].mxu1  ;;  %v4266_v34 = vpop.f32.mrb[69].mxu0 }
0x17b4   : > { %v4245_v35 = vadd.f32 %v4244_v31, %v4243_v26  ;;  %v4267_v37 = vadd.f32 %v4266_v34, %v4265_v48  ;;  %v4246_v38 = vpop.f32.mrb[82].mxu1  ;;  %v4268_v39 = vpop.f32.mrb[70].mxu0 }
0x17b5   : > { %v4247_v40 = vpop.f32.mrb[83].mxu1  ;;  %v4269_v42 = vpop.f32.mrb[71].mxu0 }
0x17b6   : > { %v3650_v46 = vadd.f32 %v4245_v35, %v4102_v30  ;;  %v4248_v53 = vadd.f32 %v4247_v40, %v4246_v38  ;;  %v4270_v54 = vadd.f32 %v4269_v42, %v4268_v39 }
0x17b8   : > { %v3691_v57 = vadd.f32 %v4267_v37, %v3650_v46  ;;  %v3653_v61 = vadd.f32 %v4248_v53, %v4102_v30 }
0x17ba   : > { %v3694_v63 = vadd.f32 %v4270_v54, %v3653_v61  ;;  %v3697_v62 = vadd.f32 %v3691_v57, %v5813_v21 }
0x17bc   : > { %3699 = vadd.xlane.f32.xlu1 %v3697_v62  ;;  %v3698_v5 = vadd.f32 %v3694_v63, %v5815_v22 }
0x17be   : > { %3701 = vadd.xlane.f32.xlu0 %v3698_v5 }
0x1849   : > { %v3700_v7 = vpop.xlane.xlu1 %3699 }
0x184a   : > { %v3703_v0 = vmul.f32 0.0078125, %v3700_v7 }
0x184b   : > { %v3702_v3 = vpop.xlane.xlu0 %3701 }
0x184c   : > { %v3705_v6 = vsub.f32 %v3697_v62, %v3703_v0  ;;  %v3704_v8 = vmul.f32 0.0078125, %v3702_v3 }
0x184e   : > { %v3706_v9 = vsub.f32 %v3698_v5, %v3704_v8  ;;  %v3707_v11 = vmul.f32 %v3705_v6, %v3705_v6 }
0x1850   : > { %3709 = vadd.xlane.f32.xlu1 %v3707_v11  ;;  %v3708_v43 = vmul.f32 %v3706_v9, %v3706_v9 }
0x1852   : > { %3711 = vadd.xlane.f32.xlu0 %v3708_v43 }
0x18dd   : > { %v3710_v47 = vpop.xlane.xlu1 %3709 }
0x18de   : > { %v3713_v12 = vmul.f32 0.0078125, %v3710_v47 }
0x18df   : > { %v3712_v51 = vpop.xlane.xlu0 %3711 }
0x18e0   : > { %v3715_v21 = vadd.f32 1e-05, %v3713_v12  ;;  %v3714_v13 = vmul.f32 0.0078125, %v3712_v51 }
0x18e2   : > { %4807 = vrsqrt.f32 %v3715_v21  ;;  %v3716_v22 = vadd.f32 1e-05, %v3714_v13 }
0x18e4   : > { %4809 = vrsqrt.f32 %v3716_v22 }
0x18ec   : > { %v4808_v16 = vpop.eup %4807 }
0x18ed   : > { %v3719_v17 = vmul.f32 %v4808_v16, %v3705_v6 }
0x18ee   : > { %v4810_v18 = vpop.eup %4809 }
0x18ef   : > { %v3728_v49 = vmul.f32 %v4135_v28, %v3719_v17  ;;  %v3720_v50 = vmul.f32 %v4810_v18, %v3706_v9  ;;  %3744 = sbr.rel (%p4137_p7) target bundleno = 6390 (0x18f6), region = 96 }
0x18f1   : > { %v3737_v59 = vadd.f32 %v4136_v41, %v3728_v49  ;;  %v3729_v45 = vmul.f32 %v4135_v28, %v3720_v50 }
0x18f3   : > { %3739 = vst [vmem:[#allocation2] sm:$0xff] %v3737_v59  ;;  %v3738_v44 = vadd.f32 %v4136_v41, %v3729_v45  ;;  %3745 = vst [vmem:[%s5962_s14] sm:$0xff] (!%p4137_p7), %v3737_v59 }
0x18f5   : > { %3740 = vst [vmem:[#allocation2 + $0x8] sm:$0xff] %v3738_v44  ;;  %3746 = vst [vmem:[%s5962_s14 + $0x8] sm:$0xff] (!%p4137_p7), %v3738_v44 }
0x18f6 PF: > { %s30_s18 = sadd.s32 1, %s4959_s18   ;;  %s5963_s29 = sld [smem:[#allocation10_spill]] }
0x18f7   : > { %p27_p13 = scmp.ge.s32.totalorder %s30_s18, 4   ;;  %s5964_s30 = sld [smem:[#allocation11_spill]] }
0x18f8   : > { %s5965_s15 = sld [smem:[#allocation14_spill]]  ;;  %s5966_s16 = sld [smem:[#allocation12_spill]] }
0x18f9   : > { %s5967_s17 = sld [smem:[#allocation13_spill]]  ;;  %29 = sbr.rel (!%p27_p13) target bundleno = 16 (0x10), region = 181 }
0x1900   :  { %3769 = vsyncpa [#allocation4], 1 }
0x1901   :  { %3771 = vsyncpa [#allocation4 + $0x1], 1 }
0x1902   :  { %3772 = vsyncpa [#allocation6], 1 }
0x1903   :  { %3774 = vsyncpa [#allocation6 + $0x1], 1 }

</bundles_post_ra>
